<compile_context>
chip_gen: v7x
topology: tpu7x:2x2x1
jax: 0.10.0
libtpu: 0.0.40
codegen_flags: <defaults>
</compile_context>

<pallas_src>
import functools

import jax
import jax.numpy as jnp
from jax.experimental import pallas as pl
from jax.experimental.pallas import tpu as pltpu

_EPS = 1e-5                    # BatchNorm2d default eps
_ACT_DTYPE = jnp.bfloat16      # activation / weight dtype fed to the MXU


@functools.lru_cache(maxsize=1)
def _vmem_limit_bytes():
    """~3/4 of physical VMEM: ~48 MiB on v7x, ~96 MiB on v5e/v6e."""
    try:
        cap = getattr(pltpu.get_tpu_info(), "vmem_capacity_bytes", None)
        if cap:
            return int(cap) * 3 // 4
    except Exception:
        pass
    return 48 * 1024 * 1024


# ----------------------------- kernels ---------------------------------------

def _conv3x3_kernel(*refs, height, width, cins, tco, relu, n_in):
    """Fused multi-input 3x3 'same' conv + affine(+ReLU).  One (Cout-tile, image)
    pair per grid step.  refs = x_0..x_{n-1}, w_0..w_{n-1}, scale, shift, o,
    pad_0..pad_{n-1} (bf16 padded-input scratch)."""
    H, W = height, width
    x_refs = refs[:n_in]
    w_refs = refs[n_in:2 * n_in]
    s_ref = refs[2 * n_in]
    b_ref = refs[2 * n_in + 1]
    o_ref = refs[2 * n_in + 2]
    pad_refs = refs[2 * n_in + 3:]

    acc = None
    for i in range(n_in):
        ci = cins[i]
        pad = pad_refs[i]
        # zero only the halo ring (interior fully overwritten below); done every
        # step so it is correct irrespective of how the grid is split over cores.
        zrow = jnp.zeros((1, W + 2, ci), pad.dtype)
        zcol = jnp.zeros((H + 2, 1, ci), pad.dtype)
        pad[0:1, :, :] = zrow
        pad[H + 1:H + 2, :, :] = zrow
        pad[:, 0:1, :] = zcol
        pad[:, W + 1:W + 2, :] = zcol
        # single f32 -> bf16 cast when filling the interior.
        pad[1:H + 1, 1:W + 1, :] = x_refs[i][0].astype(pad.dtype)

        # padded-width trick: one contiguous band matmul per (kh), only three
        # output-side slices per input (instead of 9 per-tap input copies).
        for kw in range(3):
            s = None
            for kh in range(3):
                band = pad[kh:kh + H, :, :].reshape(H * (W + 2), ci)
                c = jnp.dot(band, w_refs[i][kh, kw],
                            preferred_element_type=jnp.float32)
                s = c if s is None else s + c
            s = s.reshape(H, W + 2, tco)[:, kw:kw + W, :]
            acc = s if acc is None else acc + s

    # epilogue: folded conv-bias + BN affine (+ReLU), applied once per tile.
    y = acc * s_ref[...].reshape(1, 1, tco) + b_ref[...].reshape(1, 1, tco)
    if relu:
        y = jnp.maximum(y, 0.0)
    o_ref[0] = y.astype(o_ref.dtype)


def _conv1x1_kernel(x_ref, w_ref, s_ref, b_ref, o_ref, *, tile_h, width, cin,
                    tco, relu, upsample):
    """1x1 conv + affine(+ReLU), optional fused 2x nearest upsample realized as
    a broadcast store (channels stay on lanes; no XLU, no MXU for the upsample)."""
    xv = x_ref[0].reshape(tile_h * width, cin).astype(_ACT_DTYPE)
    y = jnp.dot(xv, w_ref[...], preferred_element_type=jnp.float32)
    y = y * s_ref[...] + b_ref[...]
    if relu:
        y = jnp.maximum(y, 0.0)
    if upsample:
        y = jnp.broadcast_to(y.reshape(tile_h, 1, width, 1, tco),
                             (tile_h, 2, width, 2, tco))
        o_ref[0] = y.astype(o_ref.dtype)
    else:
        o_ref[0] = y.reshape(tile_h, width, tco).astype(o_ref.dtype)


# ----------------------------- wrappers ---------------------------------------

def _pick_cout_tile(cout):
    # 256-wide tiles for the 256x256 MXU (v6e/v7x); 128 also fine for v5e.
    if cout % 256 == 0:
        return 256
    if cout % 128 == 0:
        return 128
    return cout


def _pick_tile_rows(H, W, cin, tco, out_itemsize, upsample):
    """Largest divisor TH of H whose double-buffered tiles fit a VMEM budget,
    targeting a matmul M = TH*W large enough to feed the MXU rows."""
    budget = 6 * 1024 * 1024
    up = 4 if upsample else 1
    best = 1
    for th in range(1, H + 1):
        if H % th:
            continue
        tile_bytes = 2 * th * W * (cin * 4 + up * tco * out_itemsize)
        if th > 1 and tile_bytes > budget:
            break
        best = th
        if th * W >= 1024:
            break
    return best


def conv3x3_fused(xs, ws, scale, shift, *, relu, out_dtype=_ACT_DTYPE):
    """y = [relu]( conv3x3_same(concat(xs, ch), concat(ws, ch)) * scale + shift )."""
    N, H, W = xs[0].shape[:3]
    cins = tuple(int(x.shape[3]) for x in xs)
    Cout = int(ws[0].shape[3])
    TCO = _pick_cout_tile(Cout)
    n_co = Cout // TCO
    n_in = len(xs)

    ws = [w.astype(_ACT_DTYPE) for w in ws]
    scale = scale.reshape(1, Cout).astype(jnp.float32)
    shift = shift.reshape(1, Cout).astype(jnp.float32)

    args, in_specs = [], []
    for x, ci in zip(xs, cins):
        args.append(x)
        in_specs.append(pl.BlockSpec((1, H, W, ci), lambda co, n: (n, 0, 0, 0)))
    for w, ci in zip(ws, cins):
        args.append(w)
        # TODO(synk): single-buffer these weight tiles (pl.Buffered(1)) on v7x.
        in_specs.append(pl.BlockSpec((3, 3, ci, TCO), lambda co, n: (0, 0, 0, co)))
    args += [scale, shift]
    in_specs += [pl.BlockSpec((1, TCO), lambda co, n: (0, co))] * 2

    out_shape = jax.ShapeDtypeStruct((N, H, W, Cout), out_dtype)
    out_specs = pl.BlockSpec((1, H, W, TCO), lambda co, n: (n, 0, 0, co))
    # TODO(synk): for production image sizes add H-tiling with halo DMA here.
    scratch = [pltpu.VMEM((H + 2, W + 2, ci), _ACT_DTYPE) for ci in cins]

    flops = 2 * N * H * (W + 2) * 9 * sum(cins) * Cout
    bytes_accessed = int(sum(a.size * a.dtype.itemsize for a in args)
                         + N * H * W * Cout * jnp.dtype(out_dtype).itemsize)

    kernel = functools.partial(_conv3x3_kernel, height=H, width=W, cins=cins,
                               tco=TCO, relu=relu, n_in=n_in)
    return pl.pallas_call(
        kernel,
        out_shape=out_shape,
        grid_spec=pltpu.PrefetchScalarGridSpec(
            num_scalar_prefetch=0,
            grid=(n_co, N),
            in_specs=in_specs,
            out_specs=out_specs,
            scratch_shapes=scratch),
        compiler_params=pltpu.CompilerParams(
            dimension_semantics=("parallel", "parallel"),
            vmem_limit_bytes=_vmem_limit_bytes()),
        cost_estimate=pl.CostEstimate(flops=int(flops), transcendentals=0,
                                      bytes_accessed=bytes_accessed),
    )(*args)


def conv1x1_fused(x, w, scale, shift, *, relu, upsample, out_dtype=_ACT_DTYPE):
    """1x1 conv + affine(+ReLU) (+ fused 2x nearest upsample).  x is NHWC."""
    N, H, W, Cin = x.shape
    w2 = w.reshape(w.shape[-2], w.shape[-1]).astype(_ACT_DTYPE)
    Cout = int(w2.shape[1])
    TCO = _pick_cout_tile(Cout)
    n_co = Cout // TCO
    out_isz = jnp.dtype(out_dtype).itemsize
    TH = _pick_tile_rows(H, W, Cin, TCO, out_isz, upsample)
    n_h = H // TH
    scale = scale.reshape(1, Cout).astype(jnp.float32)
    shift = shift.reshape(1, Cout).astype(jnp.float32)

    in_specs = [
        pl.BlockSpec((1, TH, W, Cin), lambda co, n, h: (n, h, 0, 0)),
        pl.BlockSpec((Cin, TCO), lambda co, n, h: (0, co)),
        pl.BlockSpec((1, TCO), lambda co, n, h: (0, co)),
        pl.BlockSpec((1, TCO), lambda co, n, h: (0, co)),
    ]
    if upsample:
        out_shape = jax.ShapeDtypeStruct((N, H, 2, W, 2, Cout), out_dtype)
        out_specs = pl.BlockSpec((1, TH, 2, W, 2, TCO),
                                 lambda co, n, h: (n, h, 0, 0, 0, co))
    else:
        out_shape = jax.ShapeDtypeStruct((N, H, W, Cout), out_dtype)
        out_specs = pl.BlockSpec((1, TH, W, TCO), lambda co, n, h: (n, h, 0, co))

    flops = 2 * N * H * W * Cin * Cout
    bytes_accessed = int(x.size * x.dtype.itemsize + w2.size * 2
                         + (4 if upsample else 1) * N * H * W * Cout * out_isz)

    kernel = functools.partial(_conv1x1_kernel, tile_h=TH, width=W, cin=Cin,
                               tco=TCO, relu=relu, upsample=upsample)
    out = pl.pallas_call(
        kernel,
        out_shape=out_shape,
        grid_spec=pltpu.PrefetchScalarGridSpec(
            num_scalar_prefetch=0,
            grid=(n_co, N, n_h),
            in_specs=in_specs,
            out_specs=out_specs),
        compiler_params=pltpu.CompilerParams(
            dimension_semantics=("parallel", "parallel", "parallel"),
            vmem_limit_bytes=_vmem_limit_bytes()),
        cost_estimate=pl.CostEstimate(flops=int(flops), transcendentals=0,
                                      bytes_accessed=bytes_accessed),
    )(x, w2, scale, shift)

    if upsample:
        # (N, H, 2, W, 2, C) -> (N, 2H, 2W, C): free row-major metadata reshape.
        out = out.reshape(N, 2 * H, 2 * W, Cout)
    return out


# ---------------- deterministic parameter construction -----------------------

def _round_up(c, m):
    return ((c + m - 1) // m) * m


def _pad_to(a, axis, new):
    if a.shape[axis] == new:
        return a
    widths = [(0, 0)] * a.ndim
    widths[axis] = (0, new - a.shape[axis])
    return jnp.pad(a, widths)


def _pad_affine(scale, shift, new):
    n = new - scale.shape[0]
    if n == 0:
        return scale, shift
    return (jnp.concatenate([scale, jnp.ones((n,), scale.dtype)]),
            jnp.concatenate([shift, jnp.zeros((n,), shift.dtype)]))


def _fold_bn(gamma, beta, mean, var, conv_bias):
    scale = gamma / jnp.sqrt(var + _EPS)
    shift = beta - mean * scale + conv_bias * scale
    return scale, shift


def _conv_init(key, cin, cout, k):
    kw, kb = jax.random.split(key)
    w = jax.random.normal(kw, (k, k, cin, cout), jnp.float32) / jnp.sqrt(cin * k * k)
    b = 0.01 * jax.random.normal(kb, (cout,), jnp.float32)
    return w, b


def _bn_init(key, c):
    k1, k2, k3 = jax.random.split(key, 3)
    gamma = 1.0 + 0.1 * jax.random.normal(k1, (c,), jnp.float32)
    beta = 0.1 * jax.random.normal(k2, (c,), jnp.float32)
    mean = 0.05 * jax.random.normal(k3, (c,), jnp.float32)
    var = jnp.ones((c,), jnp.float32)
    return gamma, beta, mean, var


def _decoder_block_init(key, in_ch, out_ch, x_pad):
    """Build one DecoderBlock's folded params.  Cout is zero-padded up to a
    multiple of 128 (lane-dense stores); consumers get matching zero Cin rows,
    so the padded channels are exactly zero end-to-end (numerically exact)."""
    half = in_ch // 2                      # logical channels of x (== of skip)
    out_pad = _round_up(out_ch, 128)
    red_out = out_ch // 2
    red_pad = _round_up(red_out, 128)
    ks = jax.random.split(key, 5)
    w1, b1 = _conv_init(ks[0], in_ch, out_ch, 3)
    s1, sh1 = _fold_bn(*_bn_init(ks[1], out_ch), b1)
    w2, b2 = _conv_init(ks[2], out_ch, out_ch, 3)
    s2, sh2 = _fold_bn(*_bn_init(ks[3], out_ch), b2)
    wr, br = _conv_init(ks[4], out_ch, red_out, 1)

    # torch.cat([x, skip], dim=1) fused into conv1: split w1 along Cin.
    w1x = _pad_to(_pad_to(w1[:, :, :half, :], 2, x_pad), 3, out_pad)
    w1s = _pad_to(w1[:, :, half:, :], 3, out_pad)
    s1, sh1 = _pad_affine(s1, sh1, out_pad)
    w2 = _pad_to(_pad_to(w2, 2, out_pad), 3, out_pad)
    s2, sh2 = _pad_affine(s2, sh2, out_pad)
    wr = _pad_to(_pad_to(wr, 2, out_pad), 3, red_pad).reshape(out_pad, red_pad)
    sr, shr = _pad_affine(jnp.ones_like(br), br, red_pad)

    params = dict(w1x=w1x, w1s=w1s, s1=s1, sh1=sh1,
                  w2=w2, s2=s2, sh2=sh2,
                  wr=wr, sr=sr, shr=shr)
    return params, red_pad


def init_decoder_params(key):
    ks = jax.random.split(key, 9)
    w_pre, b_pre = _conv_init(ks[0], 1024, 512, 3)
    s_pre, sh_pre = _fold_bn(*_bn_init(ks[1], 512), b_pre)
    p = dict(w_pre=w_pre, s_pre=s_pre, sh_pre=sh_pre)
    p['block0'], xp = _decoder_block_init(ks[2], 1024, 512, x_pad=512)
    p['block1'], xp = _decoder_block_init(ks[3], 512, 256, x_pad=xp)
    p['block2'], xp = _decoder_block_init(ks[4], 256, 128, x_pad=xp)
    p['block3'], _ = _decoder_block_init(ks[5], 128, 64, x_pad=xp)
    # conv_out heads: pad Cout only 7 -> 8 (cheap writeback); sliced outside.
    for name, cin, k in (('out_full', 64, ks[6]),
                         ('out_half', 128, ks[7]),
                         ('out_quarter', 256, ks[8])):
        w, b = _conv_init(k, cin, 7, 1)
        p['w_' + name] = _pad_to(w.reshape(cin, 7), 1, 8)
        p['s_' + name] = jnp.ones((8,), jnp.float32)
        p['sh_' + name] = _pad_to(b, 0, 8)
    return p


# ---------------- forward pass -----------------------------------------------

def decoder_block_apply(p, x, skip):
    h = conv3x3_fused([x, skip], [p['w1x'], p['w1s']], p['s1'], p['sh1'], relu=True)
    feat = conv3x3_fused([h], [p['w2']], p['s2'], p['sh2'], relu=True)
    x_up = conv1x1_fused(feat, p['wr'], p['sr'], p['shr'], relu=False, upsample=True)
    return feat, x_up


@jax.jit
def decoder_forward(params, x, x_full, x_half, x_quarter, x_prebottle):
    """Args/returns are NCHW (PyTorch convention)."""
    to_nhwc = lambda t: jnp.transpose(t, (0, 2, 3, 1))
    x, x_full, x_half, x_quarter, x_prebottle = map(
        to_nhwc, (x, x_full, x_half, x_quarter, x_prebottle))

    # Decoder trunk: faithful to the reference, but (as in the reference) it
    # does not feed the returned reconstructions -> dead code under jit.
    h = conv3x3_fused([x], [params['w_pre']], params['s_pre'], params['sh_pre'],
                      relu=True)
    _, h = decoder_block_apply(params['block0'], h, x_prebottle)
    _, h = decoder_block_apply(params['block1'], h, x_quarter)
    _, h = decoder_block_apply(params['block2'], h, x_half)
    _, h = decoder_block_apply(params['block3'], h, x_full)
    del h

    def head(t, name):
        y = conv1x1_fused(t, params['w_' + name], params['s_' + name],
                          params['sh_' + name], relu=False, upsample=True,
                          out_dtype=jnp.float32)
        return jnp.transpose(y[..., :7], (0, 3, 1, 2))

    return (head(x_full, 'out_full'),
            head(x_half, 'out_half'),
            head(x_quarter, 'out_quarter'))


if __name__ == "__main__":
    key = jax.random.PRNGKey(0)
    k_in = jax.random.split(key, 5)
    N, H, W = 2, 2, 2  # bottleneck spatial size (small synthetic shapes)
    x           = jax.random.normal(k_in[0], (N, 1024, H, W), jnp.float32)
    x_prebottle = jax.random.normal(k_in[1], (N,  512, H, W), jnp.float32)
    x_quarter   = jax.random.normal(k_in[2], (N,  256, 2 * H, 2 * W), jnp.float32)
    x_half      = jax.random.normal(k_in[3], (N,  128, 4 * H, 4 * W), jnp.float32)
    x_full      = jax.random.normal(k_in[4], (N,   64, 8 * H, 8 * W), jnp.float32)

    params = init_decoder_params(jax.random.PRNGKey(42))

    recon_full, recon_half, recon_quarter = decoder_forward(
        params, x, x_full, x_half, x_quarter, x_prebottle)
    jax.block_until_ready((recon_full, recon_half, recon_quarter))

    assert recon_full.shape == (N, 7, 16 * H, 16 * W)
    assert recon_half.shape == (N, 7, 8 * H, 8 * W)
    assert recon_quarter.shape == (N, 7, 4 * H, 4 * W)

    # Cross-check the conv_out (1x1 conv) + nearest-upsample path against a
    # plain-JAX reference mirroring the kernel's bf16-in / f32-accum math.
    def ref_out(t_nchw, w2d, bias):
        t = jnp.transpose(t_nchw, (0, 2, 3, 1)).astype(_ACT_DTYPE)
        y = jnp.einsum('nhwc,co->nhwo', t, w2d[:, :7].astype(_ACT_DTYPE),
                       preferred_element_type=jnp.float32) + bias[:7]
        y = jnp.repeat(jnp.repeat(y, 2, axis=1), 2, axis=2)
        return jnp.transpose(y, (0, 3, 1, 2))

    rf = ref_out(x_full, params['w_out_full'], params['sh_out_full'])
    rh = ref_out(x_half, params['w_out_half'], params['sh_out_half'])
    rq = ref_out(x_quarter, params['w_out_quarter'], params['sh_out_quarter'])
    assert jnp.allclose(recon_full, rf, atol=5e-3, rtol=5e-3)
    assert jnp.allclose(recon_half, rh, atol=5e-3, rtol=5e-3)
    assert jnp.allclose(recon_quarter, rq, atol=5e-3, rtol=5e-3)

    print("KERNEL_OK")
</pallas_src>

<mosaic_0001>
module attributes {stable_mosaic.version = 11 : i64} {
  func.func @_conv1x1_kernel(%arg0: i32, %arg1: i32, %arg2: i32, %arg3: memref<1x16x16x64xf32, #tpu.memory_space<vmem>>, %arg4: memref<64x8xbf16, #tpu.memory_space<vmem>>, %arg5: memref<1x8xf32, #tpu.memory_space<vmem>>, %arg6: memref<1x8xf32, #tpu.memory_space<vmem>>, %arg7: memref<1x16x2x16x2x8xf32, #tpu.memory_space<vmem>>) attributes {dimension_semantics = [#tpu.dimension_semantics<parallel>, #tpu.dimension_semantics<parallel>, #tpu.dimension_semantics<parallel>], iteration_bounds = array<i64: 1, 2, 1>, scalar_prefetch = 0 : i64, scratch_operands = 0 : i64, tpu.core_type = #tpu.core_type<tc>, window_params = [{transform_indices = @transform_0, window_bounds = array<i64: 1, 16, 16, 64>}, {transform_indices = @transform_1, window_bounds = array<i64: 64, 8>}, {transform_indices = @transform_2, window_bounds = array<i64: 1, 8>}, {transform_indices = @transform_3, window_bounds = array<i64: 1, 8>}, {transform_indices = @transform_4, window_bounds = array<i64: 1, 16, 2, 16, 2, 8>}]} {
    %c0 = arith.constant 0 : index
    %c0_0 = arith.constant 0 : index
    %c0_1 = arith.constant 0 : index
    %c0_2 = arith.constant 0 : index
    %0 = vector.load %arg3[%c0, %c0_0, %c0_1, %c0_2] : memref<1x16x16x64xf32, #tpu.memory_space<vmem>>, vector<1x16x16x64xf32>
    %1 = vector.shape_cast %0 : vector<1x16x16x64xf32> to vector<16x16x64xf32>
    %2 = vector.shape_cast %1 : vector<16x16x64xf32> to vector<256x64xf32>
    %3 = arith.truncf %2 : vector<256x64xf32> to vector<256x64xbf16>
    %c0_3 = arith.constant 0 : index
    %c0_4 = arith.constant 0 : index
    %4 = vector.load %arg4[%c0_3, %c0_4] : memref<64x8xbf16, #tpu.memory_space<vmem>>, vector<64x8xbf16>
    %cst = arith.constant dense<0.000000e+00> : vector<256x8xf32>
    %5 = tpu.matmul %3, %4, %cst {dimension_numbers = #tpu.dot_dimension_numbers<[1], [0], [0], [1], [0, 0, 1, 1], [], []>} : vector<256x64xbf16>, vector<64x8xbf16>, vector<256x8xf32> -> vector<256x8xf32>
    %c0_5 = arith.constant 0 : index
    %c0_6 = arith.constant 0 : index
    %6 = vector.load %arg5[%c0_5, %c0_6] : memref<1x8xf32, #tpu.memory_space<vmem>>, vector<1x8xf32>
    %7 = vector.broadcast %6 : vector<1x8xf32> to vector<256x8xf32>
    %8 = arith.mulf %5, %7 : vector<256x8xf32>
    %c0_7 = arith.constant 0 : index
    %c0_8 = arith.constant 0 : index
    %9 = vector.load %arg6[%c0_7, %c0_8] : memref<1x8xf32, #tpu.memory_space<vmem>>, vector<1x8xf32>
    %10 = vector.broadcast %9 : vector<1x8xf32> to vector<256x8xf32>
    %11 = arith.addf %8, %10 : vector<256x8xf32>
    %12 = vector.shape_cast %11 : vector<256x8xf32> to vector<16x1x16x1x8xf32>
    %13 = vector.shape_cast %12 : vector<16x1x16x1x8xf32> to vector<16x1x16x1x8xf32>
    %14 = vector.broadcast %13 : vector<16x1x16x1x8xf32> to vector<16x2x16x2x8xf32>
    %c0_9 = arith.constant 0 : index
    %c0_10 = arith.constant 0 : index
    %c0_11 = arith.constant 0 : index
    %c0_12 = arith.constant 0 : index
    %c0_13 = arith.constant 0 : index
    %c0_14 = arith.constant 0 : index
    %15 = vector.load %arg7[%c0_9, %c0_10, %c0_11, %c0_12, %c0_13, %c0_14] : memref<1x16x2x16x2x8xf32, #tpu.memory_space<vmem>>, vector<1x16x2x16x2x8xf32>
    %16 = vector.shape_cast %15 : vector<1x16x2x16x2x8xf32> to vector<16x2x16x2x8xf32>
    %17 = vector.shape_cast %14 : vector<16x2x16x2x8xf32> to vector<1x16x2x16x2x8xf32>
    tpu.vector_store %arg7[%c0_9, %c0_10, %c0_11, %c0_12, %c0_13, %c0_14], %17 {strides = array<i32>} : memref<1x16x2x16x2x8xf32, #tpu.memory_space<vmem>>, vector<1x16x2x16x2x8xf32>,
    return
  }
  func.func @transform_0(%arg0: i32, %arg1: i32, %arg2: i32) -> (i32, i32, i32, i32) {
    %c0_i32 = arith.constant 0 : i32
    %c0_i32_0 = arith.constant 0 : i32
    %c0_i32_1 = arith.constant 0 : i32
    return %arg1, %arg2, %c0_i32, %c0_i32_0 : i32, i32, i32, i32
  }
  func.func @transform_1(%arg0: i32, %arg1: i32, %arg2: i32) -> (i32, i32) {
    %c0_i32 = arith.constant 0 : i32
    %c0_i32_0 = arith.constant 0 : i32
    return %c0_i32, %arg0 : i32, i32
  }
  func.func @transform_2(%arg0: i32, %arg1: i32, %arg2: i32) -> (i32, i32) {
    %c0_i32 = arith.constant 0 : i32
    %c0_i32_0 = arith.constant 0 : i32
    return %c0_i32, %arg0 : i32, i32
  }
  func.func @transform_3(%arg0: i32, %arg1: i32, %arg2: i32) -> (i32, i32) {
    %c0_i32 = arith.constant 0 : i32
    %c0_i32_0 = arith.constant 0 : i32
    return %c0_i32, %arg0 : i32, i32
  }
  func.func @transform_4(%arg0: i32, %arg1: i32, %arg2: i32) -> (i32, i32, i32, i32, i32, i32) {
    %c0_i32 = arith.constant 0 : i32
    %c0_i32_0 = arith.constant 0 : i32
    %c0_i32_1 = arith.constant 0 : i32
    %c0_i32_2 = arith.constant 0 : i32
    return %arg1, %arg2, %c0_i32, %c0_i32_0, %c0_i32_1, %arg0 : i32, i32, i32, i32, i32, i32
  }
}

module attributes {stable_mosaic.version = 11 : i64} {
  func.func @_conv1x1_kernel(%arg0: i32, %arg1: i32, %arg2: i32, %arg3: memref<1x8x8x128xf32, #tpu.memory_space<vmem>>, %arg4: memref<128x8xbf16, #tpu.memory_space<vmem>>, %arg5: memref<1x8xf32, #tpu.memory_space<vmem>>, %arg6: memref<1x8xf32, #tpu.memory_space<vmem>>, %arg7: memref<1x8x2x8x2x8xf32, #tpu.memory_space<vmem>>) attributes {dimension_semantics = [#tpu.dimension_semantics<parallel>, #tpu.dimension_semantics<parallel>, #tpu.dimension_semantics<parallel>], iteration_bounds = array<i64: 1, 2, 1>, scalar_prefetch = 0 : i64, scratch_operands = 0 : i64, tpu.core_type = #tpu.core_type<tc>, window_params = [{transform_indices = @transform_0, window_bounds = array<i64: 1, 8, 8, 128>}, {transform_indices = @transform_1, window_bounds = array<i64: 128, 8>}, {transform_indices = @transform_2, window_bounds = array<i64: 1, 8>}, {transform_indices = @transform_3, window_bounds = array<i64: 1, 8>}, {transform_indices = @transform_4, window_bounds = array<i64: 1, 8, 2, 8, 2, 8>}]} {
    %c0 = arith.constant 0 : index
    %c0_0 = arith.constant 0 : index
    %c0_1 = arith.constant 0 : index
    %c0_2 = arith.constant 0 : index
    %0 = vector.load %arg3[%c0, %c0_0, %c0_1, %c0_2] : memref<1x8x8x128xf32, #tpu.memory_space<vmem>>, vector<1x8x8x128xf32>
    %1 = vector.shape_cast %0 : vector<1x8x8x128xf32> to vector<8x8x128xf32>
    %2 = vector.shape_cast %1 : vector<8x8x128xf32> to vector<64x128xf32>
    %3 = arith.truncf %2 : vector<64x128xf32> to vector<64x128xbf16>
    %c0_3 = arith.constant 0 : index
    %c0_4 = arith.constant 0 : index
    %4 = vector.load %arg4[%c0_3, %c0_4] : memref<128x8xbf16, #tpu.memory_space<vmem>>, vector<128x8xbf16>
    %cst = arith.constant dense<0.000000e+00> : vector<64x8xf32>
    %5 = tpu.matmul %3, %4, %cst {dimension_numbers = #tpu.dot_dimension_numbers<[1], [0], [0], [1], [0, 0, 1, 1], [], []>} : vector<64x128xbf16>, vector<128x8xbf16>, vector<64x8xf32> -> vector<64x8xf32>
    %c0_5 = arith.constant 0 : index
    %c0_6 = arith.constant 0 : index
    %6 = vector.load %arg5[%c0_5, %c0_6] : memref<1x8xf32, #tpu.memory_space<vmem>>, vector<1x8xf32>
    %7 = vector.broadcast %6 : vector<1x8xf32> to vector<64x8xf32>
    %8 = arith.mulf %5, %7 : vector<64x8xf32>
    %c0_7 = arith.constant 0 : index
    %c0_8 = arith.constant 0 : index
    %9 = vector.load %arg6[%c0_7, %c0_8] : memref<1x8xf32, #tpu.memory_space<vmem>>, vector<1x8xf32>
    %10 = vector.broadcast %9 : vector<1x8xf32> to vector<64x8xf32>
    %11 = arith.addf %8, %10 : vector<64x8xf32>
    %12 = vector.shape_cast %11 : vector<64x8xf32> to vector<8x1x8x1x8xf32>
    %13 = vector.shape_cast %12 : vector<8x1x8x1x8xf32> to vector<8x1x8x1x8xf32>
    %14 = vector.broadcast %13 : vector<8x1x8x1x8xf32> to vector<8x2x8x2x8xf32>
    %c0_9 = arith.constant 0 : index
    %c0_10 = arith.constant 0 : index
    %c0_11 = arith.constant 0 : index
    %c0_12 = arith.constant 0 : index
    %c0_13 = arith.constant 0 : index
    %c0_14 = arith.constant 0 : index
    %15 = vector.load %arg7[%c0_9, %c0_10, %c0_11, %c0_12, %c0_13, %c0_14] : memref<1x8x2x8x2x8xf32, #tpu.memory_space<vmem>>, vector<1x8x2x8x2x8xf32>
    %16 = vector.shape_cast %15 : vector<1x8x2x8x2x8xf32> to vector<8x2x8x2x8xf32>
    %17 = vector.shape_cast %14 : vector<8x2x8x2x8xf32> to vector<1x8x2x8x2x8xf32>
    tpu.vector_store %arg7[%c0_9, %c0_10, %c0_11, %c0_12, %c0_13, %c0_14], %17 {strides = array<i32>} : memref<1x8x2x8x2x8xf32, #tpu.memory_space<vmem>>, vector<1x8x2x8x2x8xf32>,
    return
  }
  func.func @transform_0(%arg0: i32, %arg1: i32, %arg2: i32) -> (i32, i32, i32, i32) {
    %c0_i32 = arith.constant 0 : i32
    %c0_i32_0 = arith.constant 0 : i32
    %c0_i32_1 = arith.constant 0 : i32
    return %arg1, %arg2, %c0_i32, %c0_i32_0 : i32, i32, i32, i32
  }
  func.func @transform_1(%arg0: i32, %arg1: i32, %arg2: i32) -> (i32, i32) {
    %c0_i32 = arith.constant 0 : i32
    %c0_i32_0 = arith.constant 0 : i32
    return %c0_i32, %arg0 : i32, i32
  }
  func.func @transform_2(%arg0: i32, %arg1: i32, %arg2: i32) -> (i32, i32) {
    %c0_i32 = arith.constant 0 : i32
    %c0_i32_0 = arith.constant 0 : i32
    return %c0_i32, %arg0 : i32, i32
  }
  func.func @transform_3(%arg0: i32, %arg1: i32, %arg2: i32) -> (i32, i32) {
    %c0_i32 = arith.constant 0 : i32
    %c0_i32_0 = arith.constant 0 : i32
    return %c0_i32, %arg0 : i32, i32
  }
  func.func @transform_4(%arg0: i32, %arg1: i32, %arg2: i32) -> (i32, i32, i32, i32, i32, i32) {
    %c0_i32 = arith.constant 0 : i32
    %c0_i32_0 = arith.constant 0 : i32
    %c0_i32_1 = arith.constant 0 : i32
    %c0_i32_2 = arith.constant 0 : i32
    return %arg1, %arg2, %c0_i32, %c0_i32_0, %c0_i32_1, %arg0 : i32, i32, i32, i32, i32, i32
  }
}

module attributes {stable_mosaic.version = 11 : i64} {
  func.func @_conv1x1_kernel(%arg0: i32, %arg1: i32, %arg2: i32, %arg3: memref<1x4x4x256xf32, #tpu.memory_space<vmem>>, %arg4: memref<256x8xbf16, #tpu.memory_space<vmem>>, %arg5: memref<1x8xf32, #tpu.memory_space<vmem>>, %arg6: memref<1x8xf32, #tpu.memory_space<vmem>>, %arg7: memref<1x4x2x4x2x8xf32, #tpu.memory_space<vmem>>) attributes {dimension_semantics = [#tpu.dimension_semantics<parallel>, #tpu.dimension_semantics<parallel>, #tpu.dimension_semantics<parallel>], iteration_bounds = array<i64: 1, 2, 1>, scalar_prefetch = 0 : i64, scratch_operands = 0 : i64, tpu.core_type = #tpu.core_type<tc>, window_params = [{transform_indices = @transform_0, window_bounds = array<i64: 1, 4, 4, 256>}, {transform_indices = @transform_1, window_bounds = array<i64: 256, 8>}, {transform_indices = @transform_2, window_bounds = array<i64: 1, 8>}, {transform_indices = @transform_3, window_bounds = array<i64: 1, 8>}, {transform_indices = @transform_4, window_bounds = array<i64: 1, 4, 2, 4, 2, 8>}]} {
    %c0 = arith.constant 0 : index
    %c0_0 = arith.constant 0 : index
    %c0_1 = arith.constant 0 : index
    %c0_2 = arith.constant 0 : index
    %0 = vector.load %arg3[%c0, %c0_0, %c0_1, %c0_2] : memref<1x4x4x256xf32, #tpu.memory_space<vmem>>, vector<1x4x4x256xf32>
    %1 = vector.shape_cast %0 : vector<1x4x4x256xf32> to vector<4x4x256xf32>
    %2 = vector.shape_cast %1 : vector<4x4x256xf32> to vector<16x256xf32>
    %3 = arith.truncf %2 : vector<16x256xf32> to vector<16x256xbf16>
    %c0_3 = arith.constant 0 : index
    %c0_4 = arith.constant 0 : index
    %4 = vector.load %arg4[%c0_3, %c0_4] : memref<256x8xbf16, #tpu.memory_space<vmem>>, vector<256x8xbf16>
    %cst = arith.constant dense<0.000000e+00> : vector<16x8xf32>
    %5 = tpu.matmul %3, %4, %cst {dimension_numbers = #tpu.dot_dimension_numbers<[1], [0], [0], [1], [0, 0, 1, 1], [], []>} : vector<16x256xbf16>, vector<256x8xbf16>, vector<16x8xf32> -> vector<16x8xf32>
    %c0_5 = arith.constant 0 : index
    %c0_6 = arith.constant 0 : index
    %6 = vector.load %arg5[%c0_5, %c0_6] : memref<1x8xf32, #tpu.memory_space<vmem>>, vector<1x8xf32>
    %7 = vector.broadcast %6 : vector<1x8xf32> to vector<16x8xf32>
    %8 = arith.mulf %5, %7 : vector<16x8xf32>
    %c0_7 = arith.constant 0 : index
    %c0_8 = arith.constant 0 : index
    %9 = vector.load %arg6[%c0_7, %c0_8] : memref<1x8xf32, #tpu.memory_space<vmem>>, vector<1x8xf32>
    %10 = vector.broadcast %9 : vector<1x8xf32> to vector<16x8xf32>
    %11 = arith.addf %8, %10 : vector<16x8xf32>
    %12 = vector.shape_cast %11 : vector<16x8xf32> to vector<4x1x4x1x8xf32>
    %13 = vector.shape_cast %12 : vector<4x1x4x1x8xf32> to vector<4x1x4x1x8xf32>
    %14 = vector.broadcast %13 : vector<4x1x4x1x8xf32> to vector<4x2x4x2x8xf32>
    %c0_9 = arith.constant 0 : index
    %c0_10 = arith.constant 0 : index
    %c0_11 = arith.constant 0 : index
    %c0_12 = arith.constant 0 : index
    %c0_13 = arith.constant 0 : index
    %c0_14 = arith.constant 0 : index
    %15 = vector.load %arg7[%c0_9, %c0_10, %c0_11, %c0_12, %c0_13, %c0_14] : memref<1x4x2x4x2x8xf32, #tpu.memory_space<vmem>>, vector<1x4x2x4x2x8xf32>
    %16 = vector.shape_cast %15 : vector<1x4x2x4x2x8xf32> to vector<4x2x4x2x8xf32>
    %17 = vector.shape_cast %14 : vector<4x2x4x2x8xf32> to vector<1x4x2x4x2x8xf32>
    tpu.vector_store %arg7[%c0_9, %c0_10, %c0_11, %c0_12, %c0_13, %c0_14], %17 {strides = array<i32>} : memref<1x4x2x4x2x8xf32, #tpu.memory_space<vmem>>, vector<1x4x2x4x2x8xf32>,
    return
  }
  func.func @transform_0(%arg0: i32, %arg1: i32, %arg2: i32) -> (i32, i32, i32, i32) {
    %c0_i32 = arith.constant 0 : i32
    %c0_i32_0 = arith.constant 0 : i32
    %c0_i32_1 = arith.constant 0 : i32
    return %arg1, %arg2, %c0_i32, %c0_i32_0 : i32, i32, i32, i32
  }
  func.func @transform_1(%arg0: i32, %arg1: i32, %arg2: i32) -> (i32, i32) {
    %c0_i32 = arith.constant 0 : i32
    %c0_i32_0 = arith.constant 0 : i32
    return %c0_i32, %arg0 : i32, i32
  }
  func.func @transform_2(%arg0: i32, %arg1: i32, %arg2: i32) -> (i32, i32) {
    %c0_i32 = arith.constant 0 : i32
    %c0_i32_0 = arith.constant 0 : i32
    return %c0_i32, %arg0 : i32, i32
  }
  func.func @transform_3(%arg0: i32, %arg1: i32, %arg2: i32) -> (i32, i32) {
    %c0_i32 = arith.constant 0 : i32
    %c0_i32_0 = arith.constant 0 : i32
    return %c0_i32, %arg0 : i32, i32
  }
  func.func @transform_4(%arg0: i32, %arg1: i32, %arg2: i32) -> (i32, i32, i32, i32, i32, i32) {
    %c0_i32 = arith.constant 0 : i32
    %c0_i32_0 = arith.constant 0 : i32
    %c0_i32_1 = arith.constant 0 : i32
    %c0_i32_2 = arith.constant 0 : i32
    return %arg1, %arg2, %c0_i32, %c0_i32_0, %c0_i32_1, %arg0 : i32, i32, i32, i32, i32, i32
  }
}

</mosaic_0001>

<bundles_post_ra>
// kernel: decoder_forward.4
= control target key start
LH: loop header
LB: loop body
LE: loop exit
PB: predicated region body
PF: predicated region fallthrough
CT: control target
= control target key end

     0   :  { %s1626_s15 = smov 0   ;;  %s1628_s16 = smov 0   ;;  %s2127_s0 = inlined_call_operand.vmem [shape: f32[2,8,8,128], index: 0, kind: input, shape index: {}]   ;;  %s2128_s1 = inlined_call_operand.vmem [shape: bf16[128,8], index: 1, kind: input, shape index: {}]   ;;  %s2129_s2 = inlined_call_operand.vmem [shape: f32[1,8], index: 2, kind: input, shape index: {}]   ;;  %s2130_s3 = inlined_call_operand.vmem [shape: f32[1,8], index: 3, kind: input, shape index: {}]   ;;  %s2131_s4 = inlined_call_operand.vmem [shape: f32[2,8,2,8,2,8], index: 4, kind: output, shape index: {}]  }
   0x1   :  { %s1630_s17 = smov 0  }
   0x2 LB: > { %s29_s18 = sadd.s32 1, %s1594_s16  ;;  %p1472_p0 = scmp.ge.s32.totalorder %s1598_s17, 1  ;;  %s1598_s17 = sphi %s1630_s17, %s14_s17   ;;  %s1594_s16 = sphi %s1628_s16, %s2133_s16   ;;  %s1590_s15 = sphi %s1626_s15, %s2132_s15  }
   0x3   : > { %p31_p1 = scmp.ge.s32.totalorder %s29_s18, 2  ;;  %p217_p2 = scmp.lt.s32.totalorder %s1598_s17, 3 }
   0x5   : > { %s2135_s18 = smov (%p31_p1, %s29_s18), 0  ;;  %p218_p3 = pnand %p1472_p0, %p217_p2 }
   0x6   : > { %v1568_v0 = vld [vmem:[%s2128_s1] sm:$0xff] (!%p218_p3)   ;;  %p266_p4 = scmp.lt.s32.totalorder (!%p218_p3), %s1590_s15, 1  ;;  %v1569_v1 = vld [vmem:[%s2128_s1 + $0x8] sm:$0xff] (!%p218_p3)   ;;  %v1570_v2 = vld [vmem:[%s2128_s1 + $0x10] sm:$0xff] (!%p218_p3)   ;;  %v1600_v20 = vmov (!%p218_p3), 1966171168   ;;  %v483_v22 = vlaneseq (!%p218_p3) }
   0x7   : > { %221 = sbr.rel (%p218_p3) target bundleno = 327 (0x147), region = 36  ;;  %1503 = vmatprep.subr.bf16.mxu0 (!%p218_p3), %v1568_v0  ;;  %1527 = vmatprep.subr.bf16.mxu1 (!%p218_p3), %v1568_v0  ;;  %v1571_v3 = vld [vmem:[%s2128_s1 + $0x18] sm:$0xff] (!%p218_p3)   ;;  %v1572_v10 = vld [vmem:[%s2128_s1 + $0x20] sm:$0xff] (!%p218_p3)   ;;  %v1573_v11 = vld [vmem:[%s2128_s1 + $0x28] sm:$0xff] (!%p218_p3)   ;;  %v481_v21 = vunpack.c.l.s4 (!%p218_p3), %v1600_v20  ;;  %vm1191_vm0 = vcmask (!%p218_p3), 58368  }
   0x8   : > { %1504 = vmatpush3.bf16.msra.mxu0 (!%p218_p3), %v1568_v0  ;;  %1535 = vmatpush3.bf16.msra.mxu1 (!%p218_p3), %v1568_v0  ;;  %v1574_v12 = vld [vmem:[%s2128_s1 + $0x30] sm:$0xff] (!%p218_p3)   ;;  %v1575_v13 = vld [vmem:[%s2128_s1 + $0x38] sm:$0xff] (!%p218_p3)   ;;  %v484_v24 = vshrl.u32 (!%p218_p3), %v483_v22, 7  ;;  %v1485_v25 = vld [vmem:[%s2129_s2] ss:$0 sm:$0xff] (!%p218_p3) }
   0x9   : > { %1505 = vmatprep.subr.bf16.mxu0 (!%p218_p3), %v1569_v1  ;;  %1528 = vmatprep.subr.bf16.mxu1 (!%p218_p3), %v1569_v1  ;;  %v482_v23 = vunpack.c.0.s8 (!%p218_p3), %v481_v21  ;;  %v1690_v27 = vld [vmem:[%s2130_s3] ss:$0 sm:$0xff] (!%p218_p3) }
   0xa   : > { %v1694_v34 = vsub.s32 (!%p218_p3), 0, %v484_v24 }
   0xb   : > { %v1692_v30 = vsub.s32 (!%p218_p3), %v482_v23, %v484_v24 }
   0xc   : > { %1506 = vmatpush3.bf16.msra.mxu0 (!%p218_p3), %v1569_v1  ;;  %1536 = vmatpush3.bf16.msra.mxu1 (!%p218_p3), %v1569_v1 }
   0xd   : > { %1507 = vmatprep.subr.bf16.mxu0 (!%p218_p3), %v1570_v2  ;;  %1529 = vmatprep.subr.bf16.mxu1 (!%p218_p3), %v1570_v2 }
   0xe   : > { %s2137_s15 = smov (!%p266_p4, %s1590_s15), 1 }
   0xf   : > { %s1489_s25 = sshll.u32 %s2137_s15, 6  ;;  %s1490_s21 = sshll.u32 %s2137_s15, 8 }
  0x10   : > { %s1659_s28 = scalar_lea.vmem %s2127_s0, %s1489_s25  ;;  %1508 = vmatpush3.bf16.msra.mxu0 %v1570_v2  ;;  %1537 = vmatpush3.bf16.msra.mxu1 %v1570_v2  ;;  %s1734_s23 = scalar_lea.vmem %s2131_s4, %s1490_s21 }
  0x11   : > { %v300_v4 = vld [vmem:[%s1659_s28] sm:$0xff]  ;;  %v301_v5 = vld [vmem:[%s1659_s28 + $0x8] sm:$0xff]  ;;  %1509 = vmatprep.subr.bf16.mxu0 %v1571_v3  ;;  %1530 = vmatprep.subr.bf16.mxu1 %v1571_v3  ;;  %v302_v14 = vld [vmem:[%s1659_s28 + $0x10] sm:$0xff] }
  0x12   : > { %v304_v6 = vld [vmem:[%s1659_s28 + $0x20] sm:$0xff]  ;;  %v308_v7 = vpack.c.bf16 %v301_v5, %v300_v4  ;;  %v305_v8 = vld [vmem:[%s1659_s28 + $0x28] sm:$0xff]  ;;  %v303_v15 = vld [vmem:[%s1659_s28 + $0x18] sm:$0xff] }
  0x13   : > { %v310_v9 = vpack.c.bf16 %v305_v8, %v304_v6  ;;  %v306_v16 = vld [vmem:[%s1659_s28 + $0x30] sm:$0xff]  ;;  %v307_v17 = vld [vmem:[%s1659_s28 + $0x38] sm:$0xff]  ;;  %v309_v18 = vpack.c.bf16 %v303_v15, %v302_v14 }
  0x14   : > { %1519 = vmatprep.mubr.bf16.mxu0 %v308_v7  ;;  %1510 = vmatpush3.bf16.msra.mxu0 %v1571_v3  ;;  %v311_v19 = vpack.c.bf16 %v307_v17, %v306_v16 }
  0x15   : > { %1523 = vmatprep.mubr.bf16.mxu1 %v310_v9  ;;  %1538 = vmatpush3.bf16.msra.mxu1 %v1571_v3 }
  0x16   : > { %1511 = vmatprep.subr.bf16.mxu0 %v1572_v10  ;;  %1531 = vmatprep.subr.bf16.mxu1 %v1572_v10 }
  0x18   : > { %1512 = vmatpush3.bf16.msra.mxu0 %v1572_v10 }
  0x19   : > { %1539 = vmatpush3.bf16.msra.mxu1 %v1572_v10  ;;  %1513 = vmatprep.subr.bf16.mxu0 %v1573_v11 }
  0x1a   : > { %1532 = vmatprep.subr.bf16.mxu1 %v1573_v11 }
  0x1c   : > { %1514 = vmatpush3.bf16.msra.mxu0 %v1573_v11 }
  0x1d   : > { %1540 = vmatpush3.bf16.msra.mxu1 %v1573_v11  ;;  %1515 = vmatprep.subr.bf16.mxu0 %v1574_v12 }
  0x1e   : > { %1533 = vmatprep.subr.bf16.mxu1 %v1574_v12 }
  0x20   : > { %1516 = vmatpush3.bf16.msra.mxu0 %v1574_v12 }
  0x21   : > { %1541 = vmatpush3.bf16.msra.mxu1 %v1574_v12  ;;  %1517 = vmatprep.subr.bf16.mxu0 %v1575_v13 }
  0x22   : > { %1534 = vmatprep.subr.bf16.mxu1 %v1575_v13 }
  0x24   : > { %1518 = vmatpush3.bf16.msra.mxu0 %v1575_v13 }
  0x25   : > { %1542 = vmatpush3.bf16.msra.mxu1 %v1575_v13 }
  0x27   : > { %1520 = vmatmul.mubr.bf16.vlgmr.msra.gmra.mrb[0].mxu0 %v309_v18 }
  0x28   : > { %1524 = vmatmul.mubr.bf16.vlgmr.msra.gmra.mrb[0].mxu1 %v311_v19 }
  0xfa   : > { %v1521_v26 = vpop.f32.mrb[0].mxu0 }
  0xfb   : > { %v1525_v28 = vpop.f32.mrb[0].mxu1  ;;  %v450_v29 = vmul.f32 %v1521_v26, %v1485_v25  ;;  %v410_v32 = vpop.f32.mrb[1].mxu0 }
  0xfc   : > { %v454_v31 = vmul.f32 %v1525_v28, %v1485_v25  ;;  %v426_v33 = vpop.f32.mrb[1].mxu1  ;;  %v448_v35 = vmul.f32 %v1485_v25, %v410_v32  ;;  %v1522_v37 = vpop.f32.mrb[2].mxu0 }
  0xfd   : > { %v452_v36 = vmul.f32 %v1485_v25, %v426_v33  ;;  %v1526_v38 = vpop.f32.mrb[2].mxu1  ;;  %v465_v39 = vadd.f32 %v1690_v27, %v450_v29  ;;  %v1698_v41 = vmul.f32 %v1522_v37, %v1485_v25  ;;  %v413_v43 = vpop.f32.mrb[3].mxu0 }
  0xfe   : > { %v469_v40 = vadd.f32 %v1690_v27, %v454_v31  ;;  %v1700_v42 = vmul.f32 %v1526_v38, %v1485_v25  ;;  %v429_v44 = vpop.f32.mrb[3].mxu1  ;;  %v463_v45 = vadd.f32 %v1690_v27, %v448_v35  ;;  %v1706_v47 = vmul.f32 %v1485_v25, %v413_v43 }
  0xff   : > { %v1704_v46 = vadd.f32 %v1690_v27, %v452_v36  ;;  %v1708_v48 = vmul.f32 %v1485_v25, %v429_v44  ;;  %v577_v49 = vcombine.high %v465_v39, %v465_v39  ;;  %v584_v50 = vrot.slane %v465_v39, %v1692_v30 }
 0x100   : > { %v773_v51 = vcombine.high %v469_v40, %v469_v40  ;;  %v780_v52 = vrot.slane %v469_v40, %v1692_v30  ;;  %v479_v53 = vcombine.high %v463_v45, %v463_v45  ;;  %v1714_v54 = vrot.slane %v463_v45, %v1692_v30 }
 0x101   : > { %v675_v55 = vcombine.high %v1704_v46, %v1704_v46  ;;  %v1720_v56 = vrot.slane %v1704_v46, %v1692_v30  ;;  %v591_v57 = vrot.slane %v577_v49, %v1692_v30  ;;  %v592_v58 = vcombine.high %v584_v50, %v584_v50 }
 0x102   : > { %v600_v59 = vrot.slane %v584_v50, %v1692_v30  ;;  %v787_v60 = vrot.slane %v773_v51, %v1692_v30  ;;  %v788_v61 = vcombine.high %v780_v52, %v780_v52  ;;  %v796_v62 = vrot.slane %v780_v52, %v1692_v30 }
 0x103   : > { %v1727_v63 = vrot.slane %v479_v53, %v1692_v30  ;;  %v494_v0 = vcombine.high %v1714_v54, %v1714_v54  ;;  %v593_v1 = vcombine.high %v591_v57, %v591_v57  ;;  %v607_v2 = vrot.slane %v591_v57, %v1692_v30 }
 0x104   : > { %v614_v3 = vrot.slane %v592_v58, %v1692_v30  ;;  %v622_v4 = vcombine.high %v600_v59, %v600_v59  ;;  %v938_v5 = vrot.slane %v600_v59, %v1694_v34  ;;  %v789_v6 = vcombine.high %v787_v60, %v787_v60 }
 0x105   : > { %v803_v7 = vrot.slane %v787_v60, %v1692_v30  ;;  %v810_v8 = vrot.slane %v788_v61, %v1692_v30  ;;  %v621_v9 = vrot.slane %v593_v1, %v1692_v30  ;;  %v623_v10 = vcombine.high %v607_v2, %v607_v2 }
 0x106   : > { %v624_v11 = vcombine.high %v614_v3, %v614_v3  ;;  %v942_v12 = vrot.slane %v614_v3, %v1694_v34  ;;  %v946_v13 = vrot.slane %v622_v4, %v1694_v34  ;;  %v954_v14 = vrot.slane %v607_v2, %v1694_v34  ;;  %1224 = vst.msk [vmem:[%s1734_s23 + $0x40] sm:$0x3] %vm1191_vm0, %v938_v5 }
 0x107   : > { %1232 = vst.msk [vmem:[%s1734_s23 + $0x50] sm:$0x3] %vm1191_vm0, %v938_v5  ;;  %v817_v15 = vrot.slane %v789_v6, %v1692_v30  ;;  %v818_v16 = vcombine.high %v796_v62, %v796_v62  ;;  %v625_v17 = vcombine.high %v621_v9, %v621_v9  ;;  %v958_v19 = vrot.slane %v621_v9, %v1694_v34 }
 0x108   : > { %v950_v18 = vrot.slane %v624_v11, %v1694_v34  ;;  %v962_v20 = vrot.slane %v623_v10, %v1694_v34  ;;  %1225 = vst.msk [vmem:[%s1734_s23 + $0x42] sm:$0x3] %vm1191_vm0, %v942_v12  ;;  %1233 = vst.msk [vmem:[%s1734_s23 + $0x52] sm:$0x3] %vm1191_vm0, %v942_v12  ;;  %v819_v21 = vcombine.high %v803_v7, %v803_v7 }
 0x109   : > { %1226 = vst.msk [vmem:[%s1734_s23 + $0x44] sm:$0x3] %vm1191_vm0, %v946_v13  ;;  %1228 = vst.msk [vmem:[%s1734_s23 + $0x48] sm:$0x3] %vm1191_vm0, %v954_v14  ;;  %v820_v22 = vcombine.high %v810_v8, %v810_v8  ;;  %v821_v23 = vcombine.high %v817_v15, %v817_v15  ;;  %v1066_v24 = vrot.slane %v796_v62, %v1694_v34 }
 0x10a   : > { %1234 = vst.msk [vmem:[%s1734_s23 + $0x54] sm:$0x3] %vm1191_vm0, %v946_v13  ;;  %1236 = vst.msk [vmem:[%s1734_s23 + $0x58] sm:$0x3] %vm1191_vm0, %v954_v14  ;;  %v966_v25 = vrot.slane %v625_v17, %v1694_v34  ;;  %v1070_v26 = vrot.slane %v810_v8, %v1694_v34  ;;  %v1074_v28 = vrot.slane %v818_v16, %v1694_v34 }
 0x10b   : > { %1227 = vst.msk [vmem:[%s1734_s23 + $0x46] sm:$0x3] %vm1191_vm0, %v950_v18  ;;  %1229 = vst.msk [vmem:[%s1734_s23 + $0x4a] sm:$0x3] %vm1191_vm0, %v958_v19  ;;  %v1082_v29 = vrot.slane %v803_v7, %v1694_v34  ;;  %v1078_v31 = vrot.slane %v820_v22, %v1694_v34  ;;  %v1086_v32 = vrot.slane %v817_v15, %v1694_v34 }
 0x10c   : > { %1230 = vst.msk [vmem:[%s1734_s23 + $0x4c] sm:$0x3] %vm1191_vm0, %v962_v20  ;;  %1235 = vst.msk [vmem:[%s1734_s23 + $0x56] sm:$0x3] %vm1191_vm0, %v950_v18  ;;  %v1090_v33 = vrot.slane %v819_v21, %v1694_v34  ;;  %v1094_v35 = vrot.slane %v821_v23, %v1694_v34  ;;  %v495_v36 = vcombine.high %v1727_v63, %v1727_v63 }
 0x10d   : > { %1237 = vst.msk [vmem:[%s1734_s23 + $0x5a] sm:$0x3] %vm1191_vm0, %v958_v19  ;;  %1238 = vst.msk [vmem:[%s1734_s23 + $0x5c] sm:$0x3] %vm1191_vm0, %v962_v20  ;;  %v502_v37 = vrot.slane %v1714_v54, %v1692_v30  ;;  %v509_v38 = vrot.slane %v1727_v63, %v1692_v30  ;;  %v516_v39 = vrot.slane %v494_v0, %v1692_v30 }
 0x10e   : > { %1288 = vst.msk [vmem:[%s1734_s23 + $0xc0] sm:$0x3] %vm1191_vm0, %v1066_v24  ;;  %1296 = vst.msk [vmem:[%s1734_s23 + $0xd0] sm:$0x3] %vm1191_vm0, %v1066_v24  ;;  %v689_v40 = vrot.slane %v675_v55, %v1692_v30  ;;  %v690_v43 = vcombine.high %v1720_v56, %v1720_v56  ;;  %v698_v44 = vrot.slane %v1720_v56, %v1692_v30 }
 0x10f   : > { %1231 = vst.msk [vmem:[%s1734_s23 + $0x4e] sm:$0x3] %vm1191_vm0, %v966_v25  ;;  %1239 = vst.msk [vmem:[%s1734_s23 + $0x5e] sm:$0x3] %vm1191_vm0, %v966_v25  ;;  %v466_v45 = vadd.f32 %v1690_v27, %v1698_v41  ;;  %v523_v49 = vrot.slane %v495_v36, %v1692_v30  ;;  %v524_v50 = vcombine.high %v502_v37, %v502_v37 }
 0x110   : > { %1289 = vst.msk [vmem:[%s1734_s23 + $0xc2] sm:$0x3] %vm1191_vm0, %v1070_v26  ;;  %1290 = vst.msk [vmem:[%s1734_s23 + $0xc4] sm:$0x3] %vm1191_vm0, %v1074_v28  ;;  %v525_v51 = vcombine.high %v509_v38, %v509_v38  ;;  %v526_v46 = vcombine.high %v516_v39, %v516_v39  ;;  %v874_v52 = vrot.slane %v502_v37, %v1694_v34 }
 0x111   : > { %1292 = vst.msk [vmem:[%s1734_s23 + $0xc8] sm:$0x3] %vm1191_vm0, %v1082_v29  ;;  %1297 = vst.msk [vmem:[%s1734_s23 + $0xd2] sm:$0x3] %vm1191_vm0, %v1070_v26  ;;  %v878_v53 = vrot.slane %v516_v39, %v1694_v34  ;;  %v890_v54 = vrot.slane %v509_v38, %v1694_v34  ;;  %v691_v55 = vcombine.high %v689_v40, %v689_v40 }
 0x112   : > { %1298 = vst.msk [vmem:[%s1734_s23 + $0xd4] sm:$0x3] %vm1191_vm0, %v1074_v28  ;;  %1300 = vst.msk [vmem:[%s1734_s23 + $0xd8] sm:$0x3] %vm1191_vm0, %v1082_v29  ;;  %v527_v56 = vcombine.high %v523_v49, %v523_v49  ;;  %v882_v41 = vrot.slane %v524_v50, %v1694_v34  ;;  %v886_v57 = vrot.slane %v526_v46, %v1694_v34 }
 0x113   : > { %1291 = vst.msk [vmem:[%s1734_s23 + $0xc6] sm:$0x3] %vm1191_vm0, %v1078_v31  ;;  %1293 = vst.msk [vmem:[%s1734_s23 + $0xca] sm:$0x3] %vm1191_vm0, %v1086_v32  ;;  %v894_v58 = vrot.slane %v523_v49, %v1694_v34  ;;  %v898_v59 = vrot.slane %v525_v51, %v1694_v34  ;;  %v705_v60 = vrot.slane %v689_v40, %v1692_v30 }
 0x114   : > { %1294 = vst.msk [vmem:[%s1734_s23 + $0xcc] sm:$0x3] %vm1191_vm0, %v1090_v33  ;;  %1295 = vst.msk [vmem:[%s1734_s23 + $0xce] sm:$0x3] %vm1191_vm0, %v1094_v35  ;;  %v712_v61 = vrot.slane %v690_v43, %v1692_v30  ;;  %v719_v62 = vrot.slane %v691_v55, %v1692_v30  ;;  %v902_v63 = vrot.slane %v527_v56, %v1694_v34 }
 0x115   : > { %1299 = vst.msk [vmem:[%s1734_s23 + $0xd6] sm:$0x3] %vm1191_vm0, %v1078_v31  ;;  %1301 = vst.msk [vmem:[%s1734_s23 + $0xda] sm:$0x3] %vm1191_vm0, %v1086_v32  ;;  %v720_v0 = vcombine.high %v698_v44, %v698_v44  ;;  %v1002_v1 = vrot.slane %v698_v44, %v1694_v34  ;;  %v626_v2 = vcombine.high %v466_v45, %v466_v45 }
 0x116   : > { %1302 = vst.msk [vmem:[%s1734_s23 + $0xdc] sm:$0x3] %vm1191_vm0, %v1090_v33  ;;  %1303 = vst.msk [vmem:[%s1734_s23 + $0xde] sm:$0x3] %vm1191_vm0, %v1094_v35  ;;  %v721_v3 = vcombine.high %v705_v60, %v705_v60  ;;  %v722_v4 = vcombine.high %v712_v61, %v712_v61  ;;  %v723_v5 = vcombine.high %v719_v62, %v719_v62 }
 0x117   : > { %1192 = vst.msk [vmem:[%s1734_s23] sm:$0x3] %vm1191_vm0, %v874_v52  ;;  %1193 = vst.msk [vmem:[%s1734_s23 + $0x2] sm:$0x3] %vm1191_vm0, %v878_v53  ;;  %v1006_v6 = vrot.slane %v712_v61, %v1694_v34  ;;  %v1010_v7 = vrot.slane %v720_v0, %v1694_v34  ;;  %v1018_v8 = vrot.slane %v705_v60, %v1694_v34 }
 0x118   : > { %1196 = vst.msk [vmem:[%s1734_s23 + $0x8] sm:$0x3] %vm1191_vm0, %v890_v54  ;;  %1200 = vst.msk [vmem:[%s1734_s23 + $0x10] sm:$0x3] %vm1191_vm0, %v874_v52  ;;  %v1022_v9 = vrot.slane %v719_v62, %v1694_v34  ;;  %v633_v10 = vrot.slane %v466_v45, %v1692_v30  ;;  %v1014_v11 = vrot.slane %v722_v4, %v1694_v34 }
 0x119   : > { %1201 = vst.msk [vmem:[%s1734_s23 + $0x12] sm:$0x3] %vm1191_vm0, %v878_v53  ;;  %1204 = vst.msk [vmem:[%s1734_s23 + $0x18] sm:$0x3] %vm1191_vm0, %v890_v54  ;;  %v1026_v12 = vrot.slane %v721_v3, %v1694_v34  ;;  %v1030_v13 = vrot.slane %v723_v5, %v1694_v34  ;;  %v640_v14 = vrot.slane %v626_v2, %v1692_v30 }
 0x11a   : > { %1194 = vst.msk [vmem:[%s1734_s23 + $0x4] sm:$0x3] %vm1191_vm0, %v882_v41  ;;  %1195 = vst.msk [vmem:[%s1734_s23 + $0x6] sm:$0x3] %vm1191_vm0, %v886_v57  ;;  %v641_v15 = vcombine.high %v633_v10, %v633_v10  ;;  %v649_v16 = vrot.slane %v633_v10, %v1692_v30  ;;  %v470_v17 = vadd.f32 %v1690_v27, %v1700_v42 }
 0x11b   : > { %1197 = vst.msk [vmem:[%s1734_s23 + $0xa] sm:$0x3] %vm1191_vm0, %v894_v58  ;;  %1202 = vst.msk [vmem:[%s1734_s23 + $0x14] sm:$0x3] %vm1191_vm0, %v882_v41  ;;  %v642_v18 = vcombine.high %v640_v14, %v640_v14  ;;  %v656_v19 = vrot.slane %v640_v14, %v1692_v30  ;;  %v464_v42 = vadd.f32 %v1690_v27, %v1706_v47 }
 0x11c   : > { %1203 = vst.msk [vmem:[%s1734_s23 + $0x16] sm:$0x3] %vm1191_vm0, %v886_v57  ;;  %1205 = vst.msk [vmem:[%s1734_s23 + $0x1a] sm:$0x3] %vm1191_vm0, %v894_v58  ;;  %v1933_v20 = vadd.f32 %v1690_v27, %v1708_v48  ;;  %v663_v21 = vrot.slane %v641_v15, %v1692_v30  ;;  %v671_v22 = vcombine.high %v649_v16, %v649_v16 }
 0x11d   : > { %1198 = vst.msk [vmem:[%s1734_s23 + $0xc] sm:$0x3] %vm1191_vm0, %v898_v59  ;;  %1206 = vst.msk [vmem:[%s1734_s23 + $0x1c] sm:$0x3] %vm1191_vm0, %v898_v59  ;;  %v970_v23 = vrot.slane %v649_v16, %v1694_v34  ;;  %v822_v24 = vcombine.high %v470_v17, %v470_v17  ;;  %v670_v25 = vrot.slane %v642_v18, %v1692_v30 }
 0x11e   : > { %1199 = vst.msk [vmem:[%s1734_s23 + $0xe] sm:$0x3] %vm1191_vm0, %v902_v63  ;;  %1207 = vst.msk [vmem:[%s1734_s23 + $0x1e] sm:$0x3] %vm1191_vm0, %v902_v63  ;;  %v672_v26 = vcombine.high %v656_v19, %v656_v19  ;;  %v986_v28 = vrot.slane %v656_v19, %v1694_v34  ;;  %v829_v47 = vrot.slane %v470_v17, %v1692_v30 }
 0x11f   : > { %1256 = vst.msk [vmem:[%s1734_s23 + $0x80] sm:$0x3] %vm1191_vm0, %v1002_v1  ;;  %1264 = vst.msk [vmem:[%s1734_s23 + $0x90] sm:$0x3] %vm1191_vm0, %v1002_v1  ;;  %v673_v27 = vcombine.high %v663_v21, %v663_v21  ;;  %v974_v48 = vrot.slane %v663_v21, %v1694_v34  ;;  %v978_v29 = vrot.slane %v671_v22, %v1694_v34 }
 0x120   : > { %1257 = vst.msk [vmem:[%s1734_s23 + $0x82] sm:$0x3] %vm1191_vm0, %v1006_v6  ;;  %1265 = vst.msk [vmem:[%s1734_s23 + $0x92] sm:$0x3] %vm1191_vm0, %v1006_v6  ;;  %v836_v31 = vrot.slane %v822_v24, %v1692_v30  ;;  %v674_v32 = vcombine.high %v670_v25, %v670_v25  ;;  %v990_v33 = vrot.slane %v670_v25, %v1694_v34 }
 0x121   : > { %1258 = vst.msk [vmem:[%s1734_s23 + $0x84] sm:$0x3] %vm1191_vm0, %v1010_v7  ;;  %1260 = vst.msk [vmem:[%s1734_s23 + $0x88] sm:$0x3] %vm1191_vm0, %v1018_v8  ;;  %v994_v35 = vrot.slane %v672_v26, %v1694_v34  ;;  %v837_v36 = vcombine.high %v829_v47, %v829_v47  ;;  %v982_v37 = vrot.slane %v673_v27, %v1694_v34 }
 0x122   : > { %1261 = vst.msk [vmem:[%s1734_s23 + $0x8a] sm:$0x3] %vm1191_vm0, %v1022_v9  ;;  %1266 = vst.msk [vmem:[%s1734_s23 + $0x94] sm:$0x3] %vm1191_vm0, %v1010_v7  ;;  %v838_v38 = vcombine.high %v836_v31, %v836_v31  ;;  %v845_v39 = vrot.slane %v829_v47, %v1692_v30  ;;  %v852_v40 = vrot.slane %v836_v31, %v1692_v30 }
 0x123   : > { %1268 = vst.msk [vmem:[%s1734_s23 + $0x98] sm:$0x3] %vm1191_vm0, %v1018_v8  ;;  %1269 = vst.msk [vmem:[%s1734_s23 + $0x9a] sm:$0x3] %vm1191_vm0, %v1022_v9  ;;  %v998_v43 = vrot.slane %v674_v32, %v1694_v34  ;;  %v859_v44 = vrot.slane %v837_v36, %v1692_v30  ;;  %v528_v45 = vcombine.high %v464_v42, %v464_v42 }
 0x124   : > { %1259 = vst.msk [vmem:[%s1734_s23 + $0x86] sm:$0x3] %vm1191_vm0, %v1014_v11  ;;  %1262 = vst.msk [vmem:[%s1734_s23 + $0x8c] sm:$0x3] %vm1191_vm0, %v1026_v12  ;;  %v535_v49 = vrot.slane %v464_v42, %v1692_v30  ;;  %v866_v50 = vrot.slane %v838_v38, %v1692_v30  ;;  %v867_v51 = vcombine.high %v845_v39, %v845_v39 }
 0x125   : > { %1263 = vst.msk [vmem:[%s1734_s23 + $0x8e] sm:$0x3] %vm1191_vm0, %v1030_v13  ;;  %1267 = vst.msk [vmem:[%s1734_s23 + $0x96] sm:$0x3] %vm1191_vm0, %v1014_v11  ;;  %v868_v46 = vcombine.high %v852_v40, %v852_v40  ;;  %v1098_v52 = vrot.slane %v845_v39, %v1694_v34  ;;  %v869_v53 = vcombine.high %v859_v44, %v859_v44 }
 0x126   : > { %1270 = vst.msk [vmem:[%s1734_s23 + $0x9c] sm:$0x3] %vm1191_vm0, %v1026_v12  ;;  %1271 = vst.msk [vmem:[%s1734_s23 + $0x9e] sm:$0x3] %vm1191_vm0, %v1030_v13  ;;  %v1102_v54 = vrot.slane %v859_v44, %v1694_v34  ;;  %v1114_v55 = vrot.slane %v852_v40, %v1694_v34  ;;  %v542_v56 = vrot.slane %v528_v45, %v1692_v30 }
 0x127   : > { %1240 = vst.msk [vmem:[%s1734_s23 + $0x60] sm:$0x3] %vm1191_vm0, %v970_v23  ;;  %1248 = vst.msk [vmem:[%s1734_s23 + $0x70] sm:$0x3] %vm1191_vm0, %v970_v23  ;;  %v870_v41 = vcombine.high %v866_v50, %v866_v50  ;;  %v1106_v57 = vrot.slane %v867_v51, %v1694_v34  ;;  %v1118_v58 = vrot.slane %v866_v50, %v1694_v34 }
 0x128   : > { %1244 = vst.msk [vmem:[%s1734_s23 + $0x68] sm:$0x3] %vm1191_vm0, %v986_v28  ;;  %1252 = vst.msk [vmem:[%s1734_s23 + $0x78] sm:$0x3] %vm1191_vm0, %v986_v28  ;;  %v1122_v59 = vrot.slane %v868_v46, %v1694_v34  ;;  %v1110_v60 = vrot.slane %v869_v53, %v1694_v34  ;;  %v543_v61 = vcombine.high %v535_v49, %v535_v49 }
 0x129   : > { %1241 = vst.msk [vmem:[%s1734_s23 + $0x62] sm:$0x3] %vm1191_vm0, %v974_v48  ;;  %1242 = vst.msk [vmem:[%s1734_s23 + $0x64] sm:$0x3] %vm1191_vm0, %v978_v29  ;;  %v544_v62 = vcombine.high %v542_v56, %v542_v56  ;;  %v551_v63 = vrot.slane %v535_v49, %v1692_v30  ;;  %v1126_v0 = vrot.slane %v870_v41, %v1694_v34 }
 0x12a   : > { %1249 = vst.msk [vmem:[%s1734_s23 + $0x72] sm:$0x3] %vm1191_vm0, %v974_v48  ;;  %1250 = vst.msk [vmem:[%s1734_s23 + $0x74] sm:$0x3] %vm1191_vm0, %v978_v29  ;;  %v558_v1 = vrot.slane %v542_v56, %v1692_v30  ;;  %v724_v2 = vcombine.high %v1933_v20, %v1933_v20  ;;  %v731_v3 = vrot.slane %v1933_v20, %v1692_v30 }
 0x12b   : > { %1245 = vst.msk [vmem:[%s1734_s23 + $0x6a] sm:$0x3] %vm1191_vm0, %v990_v33  ;;  %1246 = vst.msk [vmem:[%s1734_s23 + $0x6c] sm:$0x3] %vm1191_vm0, %v994_v35  ;;  %v565_v4 = vrot.slane %v543_v61, %v1692_v30  ;;  %v572_v5 = vrot.slane %v544_v62, %v1692_v30  ;;  %v573_v6 = vcombine.high %v551_v63, %v551_v63 }
 0x12c   : > { %1253 = vst.msk [vmem:[%s1734_s23 + $0x7a] sm:$0x3] %vm1191_vm0, %v990_v33  ;;  %1254 = vst.msk [vmem:[%s1734_s23 + $0x7c] sm:$0x3] %vm1191_vm0, %v994_v35  ;;  %v906_v7 = vrot.slane %v551_v63, %v1694_v34  ;;  %v574_v8 = vcombine.high %v558_v1, %v558_v1  ;;  %v922_v9 = vrot.slane %v558_v1, %v1694_v34 }
 0x12d   : > { %1243 = vst.msk [vmem:[%s1734_s23 + $0x66] sm:$0x3] %vm1191_vm0, %v982_v37  ;;  %1251 = vst.msk [vmem:[%s1734_s23 + $0x76] sm:$0x3] %vm1191_vm0, %v982_v37  ;;  %v738_v10 = vrot.slane %v724_v2, %v1692_v30  ;;  %v739_v11 = vcombine.high %v731_v3, %v731_v3  ;;  %v575_v12 = vcombine.high %v565_v4, %v565_v4 }
 0x12e   : > { %1247 = vst.msk [vmem:[%s1734_s23 + $0x6e] sm:$0x3] %vm1191_vm0, %v998_v43  ;;  %1255 = vst.msk [vmem:[%s1734_s23 + $0x7e] sm:$0x3] %vm1191_vm0, %v998_v43  ;;  %v576_v13 = vcombine.high %v572_v5, %v572_v5  ;;  %v910_v14 = vrot.slane %v565_v4, %v1694_v34  ;;  %v914_v15 = vrot.slane %v573_v6, %v1694_v34 }
 0x12f   : > { %1304 = vst.msk [vmem:[%s1734_s23 + $0xe0] sm:$0x3] %vm1191_vm0, %v1098_v52  ;;  %1312 = vst.msk [vmem:[%s1734_s23 + $0xf0] sm:$0x3] %vm1191_vm0, %v1098_v52  ;;  %v926_v16 = vrot.slane %v572_v5, %v1694_v34  ;;  %v930_v17 = vrot.slane %v574_v8, %v1694_v34  ;;  %v740_v18 = vcombine.high %v738_v10, %v738_v10 }
 0x130   : > { %1305 = vst.msk [vmem:[%s1734_s23 + $0xe2] sm:$0x3] %vm1191_vm0, %v1102_v54  ;;  %1308 = vst.msk [vmem:[%s1734_s23 + $0xe8] sm:$0x3] %vm1191_vm0, %v1114_v55  ;;  %v747_v19 = vrot.slane %v731_v3, %v1692_v30  ;;  %v918_v42 = vrot.slane %v575_v12, %v1694_v34  ;;  %v934_v20 = vrot.slane %v576_v13, %v1694_v34 }
 0x131   : > { %1313 = vst.msk [vmem:[%s1734_s23 + $0xf2] sm:$0x3] %vm1191_vm0, %v1102_v54  ;;  %1316 = vst.msk [vmem:[%s1734_s23 + $0xf8] sm:$0x3] %vm1191_vm0, %v1114_v55  ;;  %v754_v21 = vrot.slane %v738_v10, %v1692_v30  ;;  %v761_v22 = vrot.slane %v739_v11, %v1692_v30  ;;  %v768_v23 = vrot.slane %v740_v18, %v1692_v30 }
 0x132   : > { %1306 = vst.msk [vmem:[%s1734_s23 + $0xe4] sm:$0x3] %vm1191_vm0, %v1106_v57  ;;  %1309 = vst.msk [vmem:[%s1734_s23 + $0xea] sm:$0x3] %vm1191_vm0, %v1118_v58  ;;  %v769_v24 = vcombine.high %v747_v19, %v747_v19  ;;  %v1034_v25 = vrot.slane %v747_v19, %v1694_v34 }
 0x133   : > { %1310 = vst.msk [vmem:[%s1734_s23 + $0xec] sm:$0x3] %vm1191_vm0, %v1122_v59  ;;  %1314 = vst.msk [vmem:[%s1734_s23 + $0xf4] sm:$0x3] %vm1191_vm0, %v1106_v57  ;;  %v770_v26 = vcombine.high %v754_v21, %v754_v21  ;;  %v771_v28 = vcombine.high %v761_v22, %v761_v22  ;;  %v1038_v30 = vrot.slane %v761_v22, %v1694_v34 }
 0x134   : > { %1317 = vst.msk [vmem:[%s1734_s23 + $0xfa] sm:$0x3] %vm1191_vm0, %v1118_v58  ;;  %1318 = vst.msk [vmem:[%s1734_s23 + $0xfc] sm:$0x3] %vm1191_vm0, %v1122_v59  ;;  %v1050_v47 = vrot.slane %v754_v21, %v1694_v34  ;;  %v772_v27 = vcombine.high %v768_v23, %v768_v23  ;;  %v1042_v48 = vrot.slane %v769_v24, %v1694_v34 }
 0x135   : > { %1307 = vst.msk [vmem:[%s1734_s23 + $0xe6] sm:$0x3] %vm1191_vm0, %v1110_v60  ;;  %1315 = vst.msk [vmem:[%s1734_s23 + $0xf6] sm:$0x3] %vm1191_vm0, %v1110_v60  ;;  %v1054_v29 = vrot.slane %v768_v23, %v1694_v34  ;;  %v1046_v31 = vrot.slane %v771_v28, %v1694_v34  ;;  %v1058_v32 = vrot.slane %v770_v26, %v1694_v34 }
 0x136   : > { %1311 = vst.msk [vmem:[%s1734_s23 + $0xee] sm:$0x3] %vm1191_vm0, %v1126_v0  ;;  %1319 = vst.msk [vmem:[%s1734_s23 + $0xfe] sm:$0x3] %vm1191_vm0, %v1126_v0  ;;  %v1062_v33 = vrot.slane %v772_v27, %v1694_v34 }
 0x137   : > { %1208 = vst.msk [vmem:[%s1734_s23 + $0x20] sm:$0x3] %vm1191_vm0, %v906_v7  ;;  %1216 = vst.msk [vmem:[%s1734_s23 + $0x30] sm:$0x3] %vm1191_vm0, %v906_v7 }
 0x138   : > { %1212 = vst.msk [vmem:[%s1734_s23 + $0x28] sm:$0x3] %vm1191_vm0, %v922_v9  ;;  %1220 = vst.msk [vmem:[%s1734_s23 + $0x38] sm:$0x3] %vm1191_vm0, %v922_v9 }
 0x139   : > { %1209 = vst.msk [vmem:[%s1734_s23 + $0x22] sm:$0x3] %vm1191_vm0, %v910_v14  ;;  %1210 = vst.msk [vmem:[%s1734_s23 + $0x24] sm:$0x3] %vm1191_vm0, %v914_v15 }
 0x13a   : > { %1217 = vst.msk [vmem:[%s1734_s23 + $0x32] sm:$0x3] %vm1191_vm0, %v910_v14  ;;  %1218 = vst.msk [vmem:[%s1734_s23 + $0x34] sm:$0x3] %vm1191_vm0, %v914_v15 }
 0x13b   : > { %1213 = vst.msk [vmem:[%s1734_s23 + $0x2a] sm:$0x3] %vm1191_vm0, %v926_v16  ;;  %1214 = vst.msk [vmem:[%s1734_s23 + $0x2c] sm:$0x3] %vm1191_vm0, %v930_v17 }
 0x13c   : > { %1221 = vst.msk [vmem:[%s1734_s23 + $0x3a] sm:$0x3] %vm1191_vm0, %v926_v16  ;;  %1222 = vst.msk [vmem:[%s1734_s23 + $0x3c] sm:$0x3] %vm1191_vm0, %v930_v17 }
 0x13d   : > { %1211 = vst.msk [vmem:[%s1734_s23 + $0x26] sm:$0x3] %vm1191_vm0, %v918_v42  ;;  %1215 = vst.msk [vmem:[%s1734_s23 + $0x2e] sm:$0x3] %vm1191_vm0, %v934_v20 }
 0x13e   : > { %1219 = vst.msk [vmem:[%s1734_s23 + $0x36] sm:$0x3] %vm1191_vm0, %v918_v42  ;;  %1223 = vst.msk [vmem:[%s1734_s23 + $0x3e] sm:$0x3] %vm1191_vm0, %v934_v20 }
 0x13f   : > { %1272 = vst.msk [vmem:[%s1734_s23 + $0xa0] sm:$0x3] %vm1191_vm0, %v1034_v25  ;;  %1280 = vst.msk [vmem:[%s1734_s23 + $0xb0] sm:$0x3] %vm1191_vm0, %v1034_v25 }
 0x140   : > { %1273 = vst.msk [vmem:[%s1734_s23 + $0xa2] sm:$0x3] %vm1191_vm0, %v1038_v30  ;;  %1276 = vst.msk [vmem:[%s1734_s23 + $0xa8] sm:$0x3] %vm1191_vm0, %v1050_v47 }
 0x141   : > { %1281 = vst.msk [vmem:[%s1734_s23 + $0xb2] sm:$0x3] %vm1191_vm0, %v1038_v30  ;;  %1284 = vst.msk [vmem:[%s1734_s23 + $0xb8] sm:$0x3] %vm1191_vm0, %v1050_v47 }
 0x142   : > { %1274 = vst.msk [vmem:[%s1734_s23 + $0xa4] sm:$0x3] %vm1191_vm0, %v1042_v48  ;;  %1277 = vst.msk [vmem:[%s1734_s23 + $0xaa] sm:$0x3] %vm1191_vm0, %v1054_v29 }
 0x143   : > { %1282 = vst.msk [vmem:[%s1734_s23 + $0xb4] sm:$0x3] %vm1191_vm0, %v1042_v48  ;;  %1285 = vst.msk [vmem:[%s1734_s23 + $0xba] sm:$0x3] %vm1191_vm0, %v1054_v29 }
 0x144   : > { %1275 = vst.msk [vmem:[%s1734_s23 + $0xa6] sm:$0x3] %vm1191_vm0, %v1046_v31  ;;  %1278 = vst.msk [vmem:[%s1734_s23 + $0xac] sm:$0x3] %vm1191_vm0, %v1058_v32 }
 0x145   : > { %1283 = vst.msk [vmem:[%s1734_s23 + $0xb6] sm:$0x3] %vm1191_vm0, %v1046_v31  ;;  %1286 = vst.msk [vmem:[%s1734_s23 + $0xbc] sm:$0x3] %vm1191_vm0, %v1058_v32 }
 0x146   : > { %1279 = vst.msk [vmem:[%s1734_s23 + $0xae] sm:$0x3] %vm1191_vm0, %v1062_v33  ;;  %1287 = vst.msk [vmem:[%s1734_s23 + $0xbe] sm:$0x3] %vm1191_vm0, %v1062_v33 }
 0x147 PF: > { %s14_s17 = sadd.s32 1, %s1598_s17   ;;  %s2132_s15 = smov %s1594_s16 }
 0x148   : > { %p11_p5 = scmp.ge.s32.totalorder %s14_s17, 4   ;;  %s2133_s16 = smov %s2135_s18 }
 0x14a   :  { %13 = sbr.rel (!%p11_p5) target bundleno = 2 (0x2), region = 75 }

// kernel: decoder_forward.5
= control target key start
LH: loop header
LB: loop body
LE: loop exit
PB: predicated region body
PF: predicated region fallthrough
CT: control target
= control target key end

     0   :  { %s1022_s15 = smov 0   ;;  %s1024_s16 = smov 0   ;;  %s1179_s0 = inlined_call_operand.vmem [shape: f32[2,4,4,256], index: 0, kind: input, shape index: {}]   ;;  %s1180_s1 = inlined_call_operand.vmem [shape: bf16[256,8], index: 1, kind: input, shape index: {}]   ;;  %s1181_s2 = inlined_call_operand.vmem [shape: f32[1,8], index: 2, kind: input, shape index: {}]   ;;  %s1182_s3 = inlined_call_operand.vmem [shape: f32[1,8], index: 3, kind: input, shape index: {}]   ;;  %s1183_s4 = inlined_call_operand.vmem [shape: f32[2,4,2,4,2,8], index: 4, kind: output, shape index: {}]  }
   0x1   :  { %s1026_s17 = smov 0  }
   0x2 LB: > { %s29_s18 = sadd.s32 1, %s990_s16  ;;  %p876_p0 = scmp.ge.s32.totalorder %s994_s17, 1  ;;  %s994_s17 = sphi %s1026_s17, %s14_s17   ;;  %s990_s16 = sphi %s1024_s16, %s1185_s16   ;;  %s986_s15 = sphi %s1022_s15, %s1184_s15  }
   0x3   : > { %p31_p1 = scmp.ge.s32.totalorder %s29_s18, 2  ;;  %p218_p2 = scmp.lt.s32.totalorder %s994_s17, 3 }
   0x5   : > { %s1187_s18 = smov (%p31_p1, %s29_s18), 0  ;;  %p219_p3 = pnand %p876_p0, %p218_p2 }
   0x6   : > { %v950_v0 = vld [vmem:[%s1180_s1 + $0x40] sm:$0xff] (!%p219_p3)   ;;  %v952_v2 = vld [vmem:[%s1180_s1 + $0x48] sm:$0xff] (!%p219_p3)   ;;  %p268_p4 = scmp.lt.s32.totalorder (!%p219_p3), %s986_s15, 1  ;;  %v954_v4 = vld [vmem:[%s1180_s1 + $0x50] sm:$0xff] (!%p219_p3)   ;;  %v996_v22 = vmov (!%p219_p3), 1966171168   ;;  %v514_v24 = vlaneseq (!%p219_p3) }
   0x7   : > { %222 = sbr.rel (%p219_p3) target bundleno = 282 (0x11a), region = 36  ;;  %v951_v1 = vld [vmem:[%s1180_s1] sm:$0xff] (!%p219_p3)   ;;  %903 = vmatprep.subr.bf16.mxu0 (!%p219_p3), %v950_v0  ;;  %v953_v3 = vld [vmem:[%s1180_s1 + $0x8] sm:$0xff] (!%p219_p3)   ;;  %v955_v5 = vld [vmem:[%s1180_s1 + $0x10] sm:$0xff] (!%p219_p3)   ;;  %v512_v23 = vunpack.c.l.s4 (!%p219_p3), %v996_v22  ;;  %vm688_vm0 = vcmask (!%p219_p3), 58368  }
   0x8   : > { %904 = vmatpush3.bf16.msra.mxu0 (!%p219_p3), %v951_v1  ;;  %v956_v6 = vld [vmem:[%s1180_s1 + $0x58] sm:$0xff] (!%p219_p3)   ;;  %v958_v8 = vld [vmem:[%s1180_s1 + $0x60] sm:$0xff] (!%p219_p3)   ;;  %v960_v10 = vld [vmem:[%s1180_s1 + $0x68] sm:$0xff] (!%p219_p3)   ;;  %v515_v27 = vshrl.u32 (!%p219_p3), %v514_v24, 7 }
   0x9   : > { %905 = vmatprep.subr.bf16.mxu0 (!%p219_p3), %v952_v2  ;;  %v957_v7 = vld [vmem:[%s1180_s1 + $0x18] sm:$0xff] (!%p219_p3)   ;;  %v959_v9 = vld [vmem:[%s1180_s1 + $0x20] sm:$0xff] (!%p219_p3)   ;;  %v961_v13 = vld [vmem:[%s1180_s1 + $0x28] sm:$0xff] (!%p219_p3)   ;;  %v513_v26 = vunpack.c.0.s8 (!%p219_p3), %v512_v23 }
   0xa   : > { %v962_v14 = vld [vmem:[%s1180_s1 + $0x70] sm:$0xff] (!%p219_p3)   ;;  %v964_v17 = vld [vmem:[%s1180_s1 + $0x78] sm:$0xff] (!%p219_p3)   ;;  %v897_v29 = vld [vmem:[%s1181_s2] ss:$0 sm:$0xff] (!%p219_p3)  ;;  %v610_v42 = vsub.s32 (!%p219_p3), 0, %v515_v27 }
   0xb   : > { %v963_v16 = vld [vmem:[%s1180_s1 + $0x30] sm:$0xff] (!%p219_p3)   ;;  %v965_v20 = vld [vmem:[%s1180_s1 + $0x38] sm:$0xff] (!%p219_p3)   ;;  %v898_v32 = vld [vmem:[%s1182_s3] ss:$0 sm:$0xff] (!%p219_p3)  ;;  %v516_v35 = vsub.s32 (!%p219_p3), %v513_v26, %v515_v27 }
   0xc   : > { %906 = vmatpush3.bf16.msra.mxu0 (!%p219_p3), %v953_v3 }
   0xd   : > { %907 = vmatprep.subr.bf16.mxu0 (!%p219_p3), %v954_v4 }
   0xe   : > { %s1189_s15 = smov (!%p268_p4, %s986_s15), 1 }
   0xf   : > { %s901_s9 = sshll.u32 %s1189_s15, 5  ;;  %s902_s11 = sshll.u32 %s1189_s15, 6 }
  0x10   : > { %908 = vmatpush3.bf16.msra.mxu0 %v955_v5  ;;  %s276_s20 = scalar_lea.vmem %s1179_s0, %s901_s9  ;;  %s1104_s14 = scalar_lea.vmem %s1183_s4, %s902_s11 }
  0x11   : > { %909 = vmatprep.subr.bf16.mxu0 %v956_v6  ;;  %v968_v11 = vld [vmem:[%s276_s20 + $0x4] ss:$8 sps:$4 sm:$0xff]   ;;  %v971_v12 = vld [vmem:[%s276_s20 + $0x14] ss:$8 sps:$4 sm:$0xff]   ;;  %v966_v18 = vld [vmem:[%s276_s20] ss:$8 sps:$4 sm:$0xff]  }
  0x12   : > { %v320_v15 = vpack.c.bf16 %v971_v12, %v968_v11  ;;  %v969_v19 = vld [vmem:[%s276_s20 + $0x10] ss:$8 sps:$4 sm:$0xff]  }
  0x13   : > { %v319_v21 = vpack.c.bf16 %v969_v19, %v966_v18 }
  0x14   : > { %910 = vmatpush3.bf16.msra.mxu0 %v957_v7  ;;  %481 = vmatprep.mubr.bf16.mxu0 %v320_v15 }
  0x15   : > { %911 = vmatprep.subr.bf16.mxu0 %v958_v8 }
  0x18   : > { %912 = vmatpush3.bf16.msra.mxu0 %v959_v9 }
  0x19   : > { %913 = vmatprep.subr.bf16.mxu0 %v960_v10 }
  0x1c   : > { %914 = vmatpush3.bf16.msra.mxu0 %v961_v13 }
  0x1d   : > { %915 = vmatprep.subr.bf16.mxu0 %v962_v14 }
  0x20   : > { %916 = vmatpush3.bf16.msra.mxu0 %v963_v16 }
  0x21   : > { %917 = vmatprep.subr.bf16.mxu0 %v964_v17 }
  0x24   : > { %918 = vmatpush3.bf16.msra.mxu0 %v965_v20 }
  0x27   : > { %482 = vmatmul.mubr.bf16.vlgmr.msra.gmra.mrb[0].mxu0 %v319_v21 }
  0xfa   : > { %v919_v25 = vpop.f32.mrb[0].mxu0 }
  0xfb   : > { %v920_v28 = vpop.f32.mrb[1].mxu0 }
  0xfc   : > { %v921_v30 = vadd.f32 %v920_v28, %v919_v25  ;;  %v922_v31 = vpop.f32.mrb[2].mxu0 }
  0xfd   : > { %v923_v33 = vpop.f32.mrb[3].mxu0 }
  0xfe   : > { %v497_v34 = vmul.f32 %v921_v30, %v897_v29  ;;  %v924_v36 = vadd.f32 %v923_v33, %v922_v31 }
 0x100   : > { %v506_v37 = vadd.f32 %v898_v32, %v497_v34  ;;  %v498_v38 = vmul.f32 %v924_v36, %v897_v29 }
 0x102   : > { %v510_v39 = vcombine.high %v506_v37, %v506_v37  ;;  %v517_v40 = vrot.slane %v506_v37, %v516_v35  ;;  %v507_v41 = vadd.f32 %v898_v32, %v498_v38 }
 0x104   : > { %v524_v43 = vrot.slane %v510_v39, %v516_v35  ;;  %v525_v44 = vcombine.high %v517_v40, %v517_v40  ;;  %v533_v45 = vrot.slane %v517_v40, %v516_v35  ;;  %v559_v46 = vcombine.high %v507_v41, %v507_v41 }
 0x105   : > { %v566_v47 = vrot.slane %v507_v41, %v516_v35 }
 0x106   : > { %v526_v48 = vcombine.high %v524_v43, %v524_v43  ;;  %v540_v49 = vrot.slane %v524_v43, %v516_v35  ;;  %v547_v50 = vrot.slane %v525_v44, %v516_v35  ;;  %v555_v51 = vcombine.high %v533_v45, %v533_v45 }
 0x107   : > { %v611_v52 = vrot.slane %v533_v45, %v610_v42  ;;  %v573_v53 = vrot.slane %v559_v46, %v516_v35  ;;  %v574_v54 = vcombine.high %v566_v47, %v566_v47  ;;  %v582_v55 = vrot.slane %v566_v47, %v516_v35 }
 0x108   : > { %v554_v56 = vrot.slane %v526_v48, %v516_v35  ;;  %v556_v57 = vcombine.high %v540_v49, %v540_v49  ;;  %v557_v58 = vcombine.high %v547_v50, %v547_v50  ;;  %v615_v59 = vrot.slane %v547_v50, %v610_v42 }
 0x109   : > { %v619_v60 = vrot.slane %v555_v51, %v610_v42  ;;  %v627_v61 = vrot.slane %v540_v49, %v610_v42  ;;  %689 = vst.msk [vmem:[%s1104_s14] sm:$0x3] %vm688_vm0, %v611_v52  ;;  %693 = vst.msk [vmem:[%s1104_s14 + $0x8] sm:$0x3] %vm688_vm0, %v611_v52  ;;  %v575_v62 = vcombine.high %v573_v53, %v573_v53 }
 0x10a   : > { %v589_v63 = vrot.slane %v573_v53, %v516_v35  ;;  %v558_v0 = vcombine.high %v554_v56, %v554_v56  ;;  %v623_v1 = vrot.slane %v557_v58, %v610_v42  ;;  %v631_v2 = vrot.slane %v554_v56, %v610_v42  ;;  %690 = vst.msk [vmem:[%s1104_s14 + $0x2] sm:$0x3] %vm688_vm0, %v615_v59 }
 0x10b   : > { %v635_v3 = vrot.slane %v556_v57, %v610_v42  ;;  %694 = vst.msk [vmem:[%s1104_s14 + $0xa] sm:$0x3] %vm688_vm0, %v615_v59  ;;  %691 = vst.msk [vmem:[%s1104_s14 + $0x4] sm:$0x3] %vm688_vm0, %v619_v60  ;;  %v596_v4 = vrot.slane %v574_v54, %v516_v35  ;;  %v603_v5 = vrot.slane %v575_v62, %v516_v35 }
 0x10c   : > { %695 = vst.msk [vmem:[%s1104_s14 + $0xc] sm:$0x3] %vm688_vm0, %v619_v60  ;;  %697 = vst.msk [vmem:[%s1104_s14 + $0x10] sm:$0x3] %vm688_vm0, %v627_v61  ;;  %v604_v6 = vcombine.high %v582_v55, %v582_v55  ;;  %v605_v7 = vcombine.high %v589_v63, %v589_v63  ;;  %v639_v8 = vrot.slane %v558_v0, %v610_v42 }
 0x10d   : > { %701 = vst.msk [vmem:[%s1104_s14 + $0x18] sm:$0x3] %vm688_vm0, %v627_v61  ;;  %692 = vst.msk [vmem:[%s1104_s14 + $0x6] sm:$0x3] %vm688_vm0, %v623_v1  ;;  %v643_v9 = vrot.slane %v582_v55, %v610_v42  ;;  %v659_v10 = vrot.slane %v589_v63, %v610_v42  ;;  %v606_v11 = vcombine.high %v596_v4, %v596_v4 }
 0x10e   : > { %696 = vst.msk [vmem:[%s1104_s14 + $0xe] sm:$0x3] %vm688_vm0, %v623_v1  ;;  %698 = vst.msk [vmem:[%s1104_s14 + $0x12] sm:$0x3] %vm688_vm0, %v631_v2  ;;  %v607_v12 = vcombine.high %v603_v5, %v603_v5  ;;  %v647_v13 = vrot.slane %v596_v4, %v610_v42  ;;  %v651_v14 = vrot.slane %v604_v6, %v610_v42 }
 0x10f   : > { %699 = vst.msk [vmem:[%s1104_s14 + $0x14] sm:$0x3] %vm688_vm0, %v635_v3  ;;  %702 = vst.msk [vmem:[%s1104_s14 + $0x1a] sm:$0x3] %vm688_vm0, %v631_v2  ;;  %v663_v15 = vrot.slane %v603_v5, %v610_v42  ;;  %v667_v16 = vrot.slane %v605_v7, %v610_v42  ;;  %v655_v17 = vrot.slane %v606_v11, %v610_v42 }
 0x110   : > { %703 = vst.msk [vmem:[%s1104_s14 + $0x1c] sm:$0x3] %vm688_vm0, %v635_v3  ;;  %700 = vst.msk [vmem:[%s1104_s14 + $0x16] sm:$0x3] %vm688_vm0, %v639_v8  ;;  %v671_v18 = vrot.slane %v607_v12, %v610_v42 }
 0x111   : > { %704 = vst.msk [vmem:[%s1104_s14 + $0x1e] sm:$0x3] %vm688_vm0, %v639_v8  ;;  %705 = vst.msk [vmem:[%s1104_s14 + $0x20] sm:$0x3] %vm688_vm0, %v643_v9 }
 0x112   : > { %709 = vst.msk [vmem:[%s1104_s14 + $0x28] sm:$0x3] %vm688_vm0, %v643_v9  ;;  %713 = vst.msk [vmem:[%s1104_s14 + $0x30] sm:$0x3] %vm688_vm0, %v659_v10 }
 0x113   : > { %717 = vst.msk [vmem:[%s1104_s14 + $0x38] sm:$0x3] %vm688_vm0, %v659_v10  ;;  %706 = vst.msk [vmem:[%s1104_s14 + $0x22] sm:$0x3] %vm688_vm0, %v647_v13 }
 0x114   : > { %707 = vst.msk [vmem:[%s1104_s14 + $0x24] sm:$0x3] %vm688_vm0, %v651_v14  ;;  %710 = vst.msk [vmem:[%s1104_s14 + $0x2a] sm:$0x3] %vm688_vm0, %v647_v13 }
 0x115   : > { %711 = vst.msk [vmem:[%s1104_s14 + $0x2c] sm:$0x3] %vm688_vm0, %v651_v14  ;;  %714 = vst.msk [vmem:[%s1104_s14 + $0x32] sm:$0x3] %vm688_vm0, %v663_v15 }
 0x116   : > { %715 = vst.msk [vmem:[%s1104_s14 + $0x34] sm:$0x3] %vm688_vm0, %v667_v16  ;;  %718 = vst.msk [vmem:[%s1104_s14 + $0x3a] sm:$0x3] %vm688_vm0, %v663_v15 }
 0x117   : > { %719 = vst.msk [vmem:[%s1104_s14 + $0x3c] sm:$0x3] %vm688_vm0, %v667_v16  ;;  %708 = vst.msk [vmem:[%s1104_s14 + $0x26] sm:$0x3] %vm688_vm0, %v655_v17 }
 0x118   : > { %712 = vst.msk [vmem:[%s1104_s14 + $0x2e] sm:$0x3] %vm688_vm0, %v655_v17  ;;  %716 = vst.msk [vmem:[%s1104_s14 + $0x36] sm:$0x3] %vm688_vm0, %v671_v18 }
 0x119   : > { %720 = vst.msk [vmem:[%s1104_s14 + $0x3e] sm:$0x3] %vm688_vm0, %v671_v18 }
 0x11a PF: > { %s14_s17 = sadd.s32 1, %s994_s17   ;;  %s1184_s15 = smov %s990_s16 }
 0x11b   : > { %p11_p5 = scmp.ge.s32.totalorder %s14_s17, 4   ;;  %s1185_s16 = smov %s1187_s18 }
 0x11d   :  { %13 = sbr.rel (!%p11_p5) target bundleno = 2 (0x2), region = 75 }

// kernel: decoder_forward.3
= control target key start
LH: loop header
LB: loop body
LE: loop exit
PB: predicated region body
PF: predicated region fallthrough
CT: control target
= control target key end

     0   :  { %9 = vsyncpa [#allocation3], 0  ;;  %s6422_s0 = inlined_call_operand.hbm [shape: f32[2,16,16,64], index: 0, kind: input, shape index: {}]   ;;  %s6423_s1 = inlined_call_operand.vmem [shape: bf16[64,8], index: 1, kind: input, shape index: {}]   ;;  %s6424_s2 = inlined_call_operand.vmem [shape: f32[1,8], index: 2, kind: input, shape index: {}]   ;;  %s6425_s3 = inlined_call_operand.vmem [shape: f32[1,8], index: 3, kind: input, shape index: {}]   ;;  %s6426_s4 = inlined_call_operand.vmem [shape: f32[2,16,2,16,2,8], index: 4, kind: output, shape index: {}]  }
   0x1   :  { %11 = vsyncpa [#allocation3 + $0x1], 0  ;;  %s4509_s15 = smov 0   ;;  %s4511_s16 = smov 0  }
   0x2   :  { %s4513_s17 = smov 0   ;;  %s4515_s18 = smov 0  }
   0x3   :  { %s4517_s19 = smov 0   ;;  %s4519_s20 = smov 0  }
   0x4 LB: > { %s4224_s21 = sadd.s32 4294967295, %s4478_s20   ;;  %s32_s22 = sadd.s32 1, %s4474_s19  ;;  %s4478_s20 = sphi %s4519_s20, %s17_s20   ;;  %s4474_s19 = sphi %s4517_s19, %s6434_s19   ;;  %s4470_s18 = sphi %s4515_s18, %s6433_s18   ;;  %s4466_s17 = sphi %s4513_s17, %s6432_s17   ;;  %s4462_s16 = sphi %s4511_s16, %s6431_s16   ;;  %s4458_s15 = sphi %s4509_s15, %s6430_s15  }
   0x5   : > { %p34_p0 = scmp.ge.s32.totalorder %s32_s22, 2  ;;  %s45_s23 = sadd.s32 1, %s4466_s17 }
   0x6   : > { %p52_p1 = scmp.ne.s32.totalorder %s4466_s17, %s4462_s16  ;;  %p53_p2 = scmp.eq.s32.totalorder %s4478_s20, 0 }
   0x7   : > { %s6436_s22 = smov (%p34_p0, %s32_s22), 0  ;;  %p58_p4 = scmp.ne.s32.totalorder %s4462_s16, %s4458_s15 }
   0x8   : > { %p4545_p3 = por %p53_p2, %p52_p1  ;;  %s40_s25 = ssub.s32 %s4474_s19, %s6436_s22 }
   0x9   : > { %p59_p5 = scmp.eq.s32.totalorder %s4224_s21, 0  ;;  %p43_p6 = scmp.eq.s32.totalorder %s40_s25, 0 }
   0xa   : > { %p4338_p8 = scmp.lt.s32.totalorder %s4478_s20, 2  ;;  %s209_s28 = sand.u32 1, %s4466_s17  }
   0xb   : > { %p4552_p7 = por %p59_p5, %p58_p4  ;;  %s4262_s29 = sshll.u32 %s4474_s19, 12 }
   0xc   : > { %s4558_s27 = scalar_select %p43_p6, %s4466_s17, %s45_s23  }
   0xd   : > { %s4231_s30 = sshll.u32 %s209_s28, 8  ;;  %s4565_s7 = scalar_lea.hbm %s6422_s0, %s4262_s29 }
   0xe   : > { %s213_s8 = scalar_lea.vmem [#allocation2], %s4231_s30  ;;  %p4569_p9 = pnand %p4338_p8, %p4545_p3 }
   0xf   : > { %s223_s9 = sshll.u32 %s213_s8, 4  ;;  %s4575_s11 = scalar_lea.sflag [#allocation3], %s209_s28  ;;  %s4573_s9 = int_to_ptr.vmem [resolvable:$true] %s223_s9 }
  0x10   : > { %s4398_s12 = scalar_lea.hbm %s4565_s7, 4096  ;;  %p4400_p11 = pneg %p4569_p9 }
  0x11   : > { %p4399_p10 = scmp.ne.s32.totalorder %s4565_s7, %s4398_s12  ;;  %s4403_s15 = scalar_lea.hbm %s6422_s0, 8192 }
  0x12   : > { %p4404_p0 = scmp.lt.u32.totalorder %s4565_s7, %s6422_s0  ;;  %p4405_p1 = scmp.lt.u32.totalorder %s4403_s15, %s4398_s12 }
  0x13   : > { %p4401_p12 = pnand %p4400_p11, %p4399_p10  ;;  %p4407_p3 = scmp.lt.u32.totalorder %s4398_s12, %s4565_s7 }
  0x14   : > { %p4406_p2 = por %p4405_p1, %p4404_p0 }
  0x15   : > { %p4402_p13 = pneg %p4401_p12 }
  0x16   : > { %p4408_p4 = por %p4407_p3, %p4406_p2 }
  0x18   : > { %p4409_p5 = pnand %p4408_p4, %p4402_p13 }
  0x1a   : > { %4412 = shalt.err (!%p4409_p5)
}
  0x1b   : > { %s4413_s24 = scalar_lea.vmem %s4573_s9, 4096  ;;  %s4480_s25 = smov [#allocation2]  }
  0x1c   : > { %p4414_p6 = scmp.ne.s32.totalorder %s4573_s9, %s4413_s24  ;;  %s4418_s28 = sshll.u32 %s4480_s25, 4  ;;  %s4419_s28 = int_to_ptr.vmem [resolvable:$false] %s4418_s28 }
  0x1d   : > { %s4420_s29 = scalar_lea.vmem %s4419_s28, 8192  ;;  %p4421_p12 = scmp.lt.s32.totalorder %s4573_s9, %s4419_s28 }
  0x1e   : > { %p4416_p8 = pnand %p4414_p6, %p4400_p11  ;;  %p4422_p0 = scmp.lt.s32.totalorder %s4420_s29, %s4413_s24 }
  0x20   : > { %p4417_p10 = pneg %p4416_p8  ;;  %p4423_p1 = por %p4422_p0, %p4421_p12 }
  0x22   : > { %p4424_p2 = pnand %p4423_p1, %p4417_p10 }
  0x24   : > { %4427 = shalt.err (!%p4424_p2)
}
  0x25   : > { %s4481_s30 = smov 128   ;;  %s4482_s5 = smov 8  }
  0x26   : > { %4337 = dma.hbm_to_vmem [thread:$0]  (!%p4569_p9), %s4565_s7, 4096, %s4573_s9, %s4575_s11, %s4481_s30, %s4481_s30, %s4482_s5  }
  0x27   : > { %p4234_p11 = scmp.ge.s32.totalorder %s4478_s20, 1  ;;  %p231_p13 = scmp.lt.s32.totalorder %s4478_s20, 3 }
  0x29   : > { %p232_p3 = pnand %p4234_p11, %p231_p13 }
  0x2a   : > { %s237_s6 = sand.u32 (!%p232_p3), 1, %s4462_s16  }
  0x2b   : > { %235 = sbr.rel (%p232_p3) target bundleno = 548 (0x224), region = 36  ;;  %s4235_s8 = sshll.u32 (!%p232_p3), %s237_s6, 8 }
  0x2c   : > { %s238_s12 = scalar_lea.sflag (!%p232_p3), [#allocation3], %s237_s6  ;;  %s4606_s13 = scalar_lea.vmem (!%p232_p3), [#allocation2], %s4235_s8 }
  0x32   : > { %4453 = dma.done.wait (%p4552_p7), %s238_s12, 4096  }
  0x33   : > { %4455 = vsyncadd (%p4552_p7), %s238_s12, 4294963200  ;;  %v4390_v0 = vld [vmem:[%s6423_s1] sm:$0xff]   ;;  %v4391_v1 = vld [vmem:[%s6423_s1 + $0x8] sm:$0xff]   ;;  %vm390_vm0 = vcmask 523264   ;;  %v4483_v52 = vmov 1966171168   ;;  %v714_v54 = vlaneseq }
  0x34   : > { %4284 = vmatprep.subr.bf16.mxu0 %v4390_v0  ;;  %4324 = vmatprep.subr.bf16.mxu1 %v4390_v0  ;;  %v4392_v2 = vld [vmem:[%s6423_s1 + $0x10] sm:$0xff]   ;;  %v310_v3 = vld [vmem:[%s4606_s13] sm:$0xff]  ;;  %v311_v4 = vld [vmem:[%s4606_s13 + $0x8] sm:$0xff]  ;;  %v712_v53 = vunpack.c.l.s4 %v4483_v52  ;;  %p296_p7 = scmp.lt.s32.totalorder %s4470_s18, 1  ;;  %vm3558_vm1 = vcmask 58368  }
  0x35   : > { %4285 = vmatpush3.bf16.msra.mxu0 %v4390_v0  ;;  %4328 = vmatpush3.bf16.msra.mxu1 %v4390_v0  ;;  %v326_v5 = vld [vmem:[%s4606_s13 + $0x80] sm:$0xff]  ;;  %v342_v6 = vpack.c.bf16 %v311_v4, %v310_v3  ;;  %v327_v7 = vld [vmem:[%s4606_s13 + $0x88] sm:$0xff]  ;;  %v4393_v9 = vld [vmem:[%s6423_s1 + $0x18] sm:$0xff]   ;;  %v715_v56 = vshrl.u32 %v714_v54, 7 }
  0x36   : > { %4286 = vmatprep.subr.bf16.mxu0 %v4391_v1  ;;  %4325 = vmatprep.subr.bf16.mxu1 %v4391_v1  ;;  %v350_v8 = vpack.c.bf16 %v327_v7, %v326_v5  ;;  %v312_v10 = vld [vmem:[%s4606_s13 + $0x10] sm:$0xff]  ;;  %v313_v11 = vld [vmem:[%s4606_s13 + $0x18] sm:$0xff]  ;;  %v314_v14 = vld [vmem:[%s4606_s13 + $0x20] sm:$0xff]  ;;  %v713_v55 = vunpack.c.0.s8 %v712_v53  ;;  %s6438_s18 = smov (!%p296_p7, %s4470_s18), 1 }
  0x37   : > { %4292 = vmatprep.mubr.msk.bf16.mxu0 %vm390_vm0, %v342_v6  ;;  %v328_v12 = vld [vmem:[%s4606_s13 + $0x90] sm:$0xff]  ;;  %v329_v13 = vld [vmem:[%s4606_s13 + $0x98] sm:$0xff]  ;;  %v315_v15 = vld [vmem:[%s4606_s13 + $0x28] sm:$0xff]  ;;  %v343_v18 = vpack.c.bf16 %v313_v11, %v312_v10  ;;  %s4263_s29 = sshll.u32 %s6438_s18, 10 }
  0x38   : > { %4308 = vmatprep.mubr.msk.bf16.mxu1 %vm390_vm0, %v350_v8  ;;  %v330_v16 = vld [vmem:[%s4606_s13 + $0xa0] sm:$0xff]  ;;  %v331_v17 = vld [vmem:[%s4606_s13 + $0xa8] sm:$0xff]  ;;  %v351_v19 = vpack.c.bf16 %v329_v13, %v328_v12  ;;  %v344_v20 = vpack.c.bf16 %v315_v15, %v314_v14  ;;  %v316_v22 = vld [vmem:[%s4606_s13 + $0x30] sm:$0xff]  ;;  %v4684_v62 = vsub.s32 %v713_v55, %v715_v56  ;;  %s4740_s5 = scalar_lea.vmem %s6426_s4, %s4263_s29 }
  0x39   : > { %4287 = vmatpush3.bf16.msra.mxu0 %v4391_v1  ;;  %4329 = vmatpush3.bf16.msra.mxu1 %v4391_v1  ;;  %v352_v21 = vpack.c.bf16 %v331_v17, %v330_v16  ;;  %v317_v23 = vld [vmem:[%s4606_s13 + $0x38] sm:$0xff]  ;;  %v332_v24 = vld [vmem:[%s4606_s13 + $0xb0] sm:$0xff]  ;;  %v318_v26 = vld [vmem:[%s4606_s13 + $0x40] sm:$0xff] }
  0x3a   : > { %4288 = vmatprep.subr.bf16.mxu0 %v4392_v2  ;;  %4326 = vmatprep.subr.bf16.mxu1 %v4392_v2  ;;  %v333_v25 = vld [vmem:[%s4606_s13 + $0xb8] sm:$0xff]  ;;  %v319_v27 = vld [vmem:[%s4606_s13 + $0x48] sm:$0xff]  ;;  %v334_v28 = vld [vmem:[%s4606_s13 + $0xc0] sm:$0xff]  ;;  %v345_v30 = vpack.c.bf16 %v317_v23, %v316_v22 }
  0x3b   : > { %v335_v29 = vld [vmem:[%s4606_s13 + $0xc8] sm:$0xff]  ;;  %v353_v31 = vpack.c.bf16 %v333_v25, %v332_v24  ;;  %v346_v32 = vpack.c.bf16 %v319_v27, %v318_v26  ;;  %v320_v34 = vld [vmem:[%s4606_s13 + $0x50] sm:$0xff]  ;;  %v321_v35 = vld [vmem:[%s4606_s13 + $0x58] sm:$0xff] }
  0x3c   : > { %v354_v33 = vpack.c.bf16 %v335_v29, %v334_v28  ;;  %v336_v36 = vld [vmem:[%s4606_s13 + $0xd0] sm:$0xff]  ;;  %v337_v37 = vld [vmem:[%s4606_s13 + $0xd8] sm:$0xff]  ;;  %v322_v38 = vld [vmem:[%s4606_s13 + $0x60] sm:$0xff]  ;;  %v347_v42 = vpack.c.bf16 %v321_v35, %v320_v34 }
  0x3d   : > { %4289 = vmatpush3.bf16.msra.mxu0 %v4392_v2  ;;  %4330 = vmatpush3.bf16.msra.mxu1 %v4392_v2  ;;  %v323_v39 = vld [vmem:[%s4606_s13 + $0x68] sm:$0xff]  ;;  %v338_v40 = vld [vmem:[%s4606_s13 + $0xe0] sm:$0xff]  ;;  %v355_v43 = vpack.c.bf16 %v337_v37, %v336_v36  ;;  %v324_v46 = vld [vmem:[%s4606_s13 + $0x70] sm:$0xff]  ;;  %v4690_v2 = vsub.s32 0, %v715_v56 }
  0x3e   : > { %4290 = vmatprep.subr.bf16.mxu0 %v4393_v9  ;;  %4327 = vmatprep.subr.bf16.mxu1 %v4393_v9  ;;  %v339_v41 = vld [vmem:[%s4606_s13 + $0xe8] sm:$0xff]  ;;  %v348_v44 = vpack.c.bf16 %v323_v39, %v322_v38  ;;  %v325_v47 = vld [vmem:[%s4606_s13 + $0x78] sm:$0xff]  ;;  %v340_v48 = vld [vmem:[%s4606_s13 + $0xf0] sm:$0xff] }
  0x3f   : > { %v356_v45 = vpack.c.bf16 %v339_v41, %v338_v40  ;;  %v341_v49 = vld [vmem:[%s4606_s13 + $0xf8] sm:$0xff]  ;;  %v349_v50 = vpack.c.bf16 %v325_v47, %v324_v46  ;;  %v4676_v57 = vld [vmem:[%s6424_s2] ss:$0 sm:$0xff] }
  0x40   : > { %v357_v51 = vpack.c.bf16 %v341_v49, %v340_v48  ;;  %v4681_v59 = vld [vmem:[%s6425_s3] ss:$0 sm:$0xff] }
  0x41   : > { %4291 = vmatpush3.bf16.msra.mxu0 %v4393_v9  ;;  %4331 = vmatpush3.bf16.msra.mxu1 %v4393_v9 }
  0x44   : > { %4293 = vmatmul.mubr.msk.bf16.vlgmr.msra.gmra.mrb[0].mxu0 %vm390_vm0, %v343_v18  ;;  %4309 = vmatmul.mubr.msk.bf16.vlgmr.msra.gmra.mrb[0].mxu1 %vm390_vm0, %v351_v19 }
  0x45   : > { %4296 = vmatprep.mubr.msk.bf16.mxu0 %vm390_vm0, %v344_v20  ;;  %4312 = vmatprep.mubr.msk.bf16.mxu1 %vm390_vm0, %v352_v21 }
  0x4c   : > { %4297 = vmatmul.mubr.msk.bf16.gmra.mrb[4].mxu0 %vm390_vm0, %v345_v30  ;;  %4313 = vmatmul.mubr.msk.bf16.gmra.mrb[4].mxu1 %vm390_vm0, %v353_v31 }
  0x4d   : > { %4300 = vmatprep.mubr.msk.bf16.mxu0 %vm390_vm0, %v346_v32  ;;  %4316 = vmatprep.mubr.msk.bf16.mxu1 %vm390_vm0, %v354_v33 }
  0x54   : > { %4301 = vmatmul.mubr.msk.bf16.gmra.mrb[8].mxu0 %vm390_vm0, %v347_v42  ;;  %4317 = vmatmul.mubr.msk.bf16.gmra.mrb[8].mxu1 %vm390_vm0, %v355_v43 }
  0x55   : > { %4304 = vmatprep.mubr.msk.bf16.mxu0 %vm390_vm0, %v348_v44  ;;  %4320 = vmatprep.mubr.msk.bf16.mxu1 %vm390_vm0, %v356_v45 }
  0x5c   : > { %4305 = vmatmul.mubr.msk.bf16.gmra.mrb[12].mxu0 %vm390_vm0, %v349_v50  ;;  %4321 = vmatmul.mubr.msk.bf16.gmra.mrb[12].mxu1 %vm390_vm0, %v357_v51 }
 0x117   : > { %v4294_v58 = vpop.f32.mrb[0].mxu0  ;;  %v4310_v60 = vpop.f32.mrb[0].mxu1 }
 0x118   : > { %v609_v61 = vmul.f32 %v4294_v58, %v4676_v57  ;;  %v625_v63 = vmul.f32 %v4310_v60, %v4676_v57  ;;  %v473_v0 = vpop.f32.mrb[1].mxu0  ;;  %v537_v1 = vpop.f32.mrb[1].mxu1 }
 0x119   : > { %v607_v3 = vmul.f32 %v4676_v57, %v473_v0  ;;  %v623_v4 = vmul.f32 %v4676_v57, %v537_v1  ;;  %v4295_v5 = vpop.f32.mrb[2].mxu0  ;;  %v4311_v6 = vpop.f32.mrb[2].mxu1 }
 0x11a   : > { %v648_v7 = vadd.f32 %v4681_v59, %v609_v61  ;;  %v664_v8 = vadd.f32 %v4681_v59, %v625_v63  ;;  %v4697_v9 = vmul.f32 %v4295_v5, %v4676_v57  ;;  %v4700_v10 = vmul.f32 %v4311_v6, %v4676_v57  ;;  %v476_v11 = vpop.f32.mrb[3].mxu0  ;;  %v540_v12 = vpop.f32.mrb[3].mxu1 }
 0x11b   : > { %v646_v13 = vadd.f32 %v4681_v59, %v607_v3  ;;  %v4704_v14 = vadd.f32 %v4681_v59, %v623_v4  ;;  %v4707_v15 = vmul.f32 %v4676_v57, %v476_v11  ;;  %v4710_v16 = vmul.f32 %v4676_v57, %v540_v12 }
 0x11c   : > { %v808_v17 = vcombine.high %v648_v7, %v648_v7  ;;  %v815_v18 = vrot.slane %v648_v7, %v4684_v62  ;;  %v1592_v19 = vcombine.high %v664_v8, %v664_v8  ;;  %v1599_v20 = vrot.slane %v664_v8, %v4684_v62 }
 0x11d   : > { %v710_v21 = vcombine.high %v646_v13, %v646_v13  ;;  %v4716_v22 = vrot.slane %v646_v13, %v4684_v62  ;;  %v1494_v23 = vcombine.high %v4704_v14, %v4704_v14  ;;  %v4722_v24 = vrot.slane %v4704_v14, %v4684_v62 }
 0x11e   : > { %v822_v25 = vrot.slane %v808_v17, %v4684_v62  ;;  %v823_v26 = vcombine.high %v815_v18, %v815_v18  ;;  %v831_v27 = vrot.slane %v815_v18, %v4684_v62  ;;  %v1606_v28 = vrot.slane %v1592_v19, %v4684_v62 }
 0x11f   : > { %v1607_v29 = vcombine.high %v1599_v20, %v1599_v20  ;;  %v1615_v30 = vrot.slane %v1599_v20, %v4684_v62  ;;  %v4729_v31 = vrot.slane %v710_v21, %v4684_v62  ;;  %v725_v32 = vcombine.high %v4716_v22, %v4716_v22  ;;  %v4733_v33 = vpop.f32.mrb[4].mxu0  ;;  %v4735_v34 = vpop.f32.mrb[4].mxu1 }
 0x120   : > { %v824_v35 = vcombine.high %v822_v25, %v822_v25  ;;  %v838_v36 = vrot.slane %v822_v25, %v4684_v62  ;;  %v845_v37 = vrot.slane %v823_v26, %v4684_v62  ;;  %v853_v38 = vcombine.high %v831_v27, %v831_v27  ;;  %v4744_v39 = vpop.f32.mrb[5].mxu0  ;;  %v4746_v40 = vpop.f32.mrb[5].mxu1 }
 0x121   : > { %v2345_v41 = vrot.slane %v831_v27, %v4690_v2  ;;  %v1608_v42 = vcombine.high %v1606_v28, %v1606_v28  ;;  %v1622_v43 = vrot.slane %v1606_v28, %v4684_v62  ;;  %v1629_v44 = vrot.slane %v1607_v29, %v4684_v62  ;;  %v4751_v45 = vpop.f32.mrb[6].mxu0  ;;  %v4753_v46 = vpop.f32.mrb[6].mxu1 }
 0x122   : > { %v852_v47 = vrot.slane %v824_v35, %v4684_v62  ;;  %v854_v48 = vcombine.high %v838_v36, %v838_v36  ;;  %v855_v49 = vcombine.high %v845_v37, %v845_v37  ;;  %v2349_v50 = vrot.slane %v845_v37, %v4690_v2  ;;  %v4757_v51 = vpop.f32.mrb[7].mxu0  ;;  %v4759_v52 = vpop.f32.mrb[7].mxu1 }
 0x123   : > { %v2353_v53 = vrot.slane %v853_v38, %v4690_v2  ;;  %v2361_v54 = vrot.slane %v838_v36, %v4690_v2  ;;  %3591 = vst.msk [vmem:[%s4740_s5 + $0x40] sm:$0x3] %vm3558_vm1, %v2345_v41  ;;  %3607 = vst.msk [vmem:[%s4740_s5 + $0x60] sm:$0x3] %vm3558_vm1, %v2345_v41  ;;  %v1636_v55 = vrot.slane %v1608_v42, %v4684_v62 }
 0x124   : > { %v1637_v56 = vcombine.high %v1615_v30, %v1615_v30  ;;  %v856_v58 = vcombine.high %v852_v47, %v852_v47  ;;  %v2357_v60 = vrot.slane %v855_v49, %v4690_v2  ;;  %v2365_v61 = vrot.slane %v852_v47, %v4690_v2  ;;  %3592 = vst.msk [vmem:[%s4740_s5 + $0x42] sm:$0x3] %vm3558_vm1, %v2349_v50 }
 0x125   : > { %v2369_v63 = vrot.slane %v854_v48, %v4690_v2  ;;  %3608 = vst.msk [vmem:[%s4740_s5 + $0x62] sm:$0x3] %vm3558_vm1, %v2349_v50  ;;  %3593 = vst.msk [vmem:[%s4740_s5 + $0x44] sm:$0x3] %vm3558_vm1, %v2353_v53  ;;  %v1638_v0 = vcombine.high %v1622_v43, %v1622_v43  ;;  %v1639_v1 = vcombine.high %v1629_v44, %v1629_v44 }
 0x126   : > { %3595 = vst.msk [vmem:[%s4740_s5 + $0x48] sm:$0x3] %vm3558_vm1, %v2361_v54  ;;  %3609 = vst.msk [vmem:[%s4740_s5 + $0x64] sm:$0x3] %vm3558_vm1, %v2353_v53  ;;  %v1640_v3 = vcombine.high %v1636_v55, %v1636_v55  ;;  %v2857_v4 = vrot.slane %v1615_v30, %v4690_v2  ;;  %v2373_v5 = vrot.slane %v856_v58, %v4690_v2 }
 0x127   : > { %3611 = vst.msk [vmem:[%s4740_s5 + $0x68] sm:$0x3] %vm3558_vm1, %v2361_v54  ;;  %3594 = vst.msk [vmem:[%s4740_s5 + $0x46] sm:$0x3] %vm3558_vm1, %v2357_v60  ;;  %v2861_v6 = vrot.slane %v1629_v44, %v4690_v2  ;;  %v2865_v7 = vrot.slane %v1637_v56, %v4690_v2  ;;  %v2873_v8 = vrot.slane %v1622_v43, %v4690_v2  ;;  %v4808_v18 = vpop.f32.mrb[8].mxu0  ;;  %v4810_v19 = vpop.f32.mrb[8].mxu1 }
 0x128   : > { %3596 = vst.msk [vmem:[%s4740_s5 + $0x4a] sm:$0x3] %vm3558_vm1, %v2365_v61  ;;  %3597 = vst.msk [vmem:[%s4740_s5 + $0x4c] sm:$0x3] %vm3558_vm1, %v2369_v63  ;;  %v2869_v11 = vrot.slane %v1639_v1, %v4690_v2  ;;  %v2877_v12 = vrot.slane %v1636_v55, %v4690_v2  ;;  %v2881_v13 = vrot.slane %v1638_v0, %v4690_v2  ;;  %v4838_v27 = vpop.f32.mrb[9].mxu0  ;;  %v4840_v28 = vpop.f32.mrb[9].mxu1 }
 0x129   : > { %3610 = vst.msk [vmem:[%s4740_s5 + $0x66] sm:$0x3] %vm3558_vm1, %v2357_v60  ;;  %3612 = vst.msk [vmem:[%s4740_s5 + $0x6a] sm:$0x3] %vm3558_vm1, %v2365_v61  ;;  %v2885_v17 = vrot.slane %v1640_v3, %v4690_v2  ;;  %v726_v20 = vcombine.high %v4729_v31, %v4729_v31  ;;  %v733_v21 = vrot.slane %v4716_v22, %v4684_v62  ;;  %v4870_v35 = vpop.f32.mrb[10].mxu1 }
 0x12a   : > { %3613 = vst.msk [vmem:[%s4740_s5 + $0x6c] sm:$0x3] %vm3558_vm1, %v2369_v63  ;;  %3847 = vst.msk [vmem:[%s4740_s5 + $0x240] sm:$0x3] %vm3558_vm1, %v2857_v4  ;;  %v740_v25 = vrot.slane %v4729_v31, %v4684_v62  ;;  %v747_v26 = vrot.slane %v725_v32, %v4684_v62  ;;  %v1508_v22 = vrot.slane %v1494_v23, %v4684_v62  ;;  %v4868_v32 = vpop.f32.mrb[10].mxu0 }
 0x12b   : > { %3863 = vst.msk [vmem:[%s4740_s5 + $0x260] sm:$0x3] %vm3558_vm1, %v2857_v4  ;;  %3598 = vst.msk [vmem:[%s4740_s5 + $0x4e] sm:$0x3] %vm3558_vm1, %v2373_v5  ;;  %v1509_v29 = vcombine.high %v4722_v24, %v4722_v24  ;;  %v1517_v30 = vrot.slane %v4722_v24, %v4684_v62  ;;  %v649_v31 = vadd.f32 %v4681_v59, %v4697_v9  ;;  %v4873_v38 = vpop.f32.mrb[11].mxu0  ;;  %v4875_v24 = vpop.f32.mrb[11].mxu1 }
 0x12c   : > { %3614 = vst.msk [vmem:[%s4740_s5 + $0x6e] sm:$0x3] %vm3558_vm1, %v2373_v5  ;;  %3848 = vst.msk [vmem:[%s4740_s5 + $0x242] sm:$0x3] %vm3558_vm1, %v2861_v6  ;;  %v754_v36 = vrot.slane %v726_v20, %v4684_v62  ;;  %v755_v37 = vcombine.high %v733_v21, %v733_v21  ;;  %v756_v14 = vcombine.high %v740_v25, %v740_v25 }
 0x12d   : > { %3849 = vst.msk [vmem:[%s4740_s5 + $0x244] sm:$0x3] %vm3558_vm1, %v2865_v7  ;;  %3851 = vst.msk [vmem:[%s4740_s5 + $0x248] sm:$0x3] %vm3558_vm1, %v2873_v8  ;;  %v757_v23 = vcombine.high %v747_v26, %v747_v26  ;;  %v2281_v9 = vrot.slane %v733_v21, %v4690_v2  ;;  %v2285_v41 = vrot.slane %v747_v26, %v4690_v2 }
 0x12e   : > { %3864 = vst.msk [vmem:[%s4740_s5 + $0x262] sm:$0x3] %vm3558_vm1, %v2861_v6  ;;  %3865 = vst.msk [vmem:[%s4740_s5 + $0x264] sm:$0x3] %vm3558_vm1, %v2865_v7  ;;  %v2297_v42 = vrot.slane %v740_v25, %v4690_v2  ;;  %v1510_v43 = vcombine.high %v1508_v22, %v1508_v22  ;;  %v758_v44 = vcombine.high %v754_v36, %v754_v36 }
 0x12f   : > { %3867 = vst.msk [vmem:[%s4740_s5 + $0x268] sm:$0x3] %vm3558_vm1, %v2873_v8  ;;  %3850 = vst.msk [vmem:[%s4740_s5 + $0x246] sm:$0x3] %vm3558_vm1, %v2869_v11  ;;  %v2289_v47 = vrot.slane %v755_v37, %v4690_v2  ;;  %v2293_v48 = vrot.slane %v757_v23, %v4690_v2  ;;  %v2301_v49 = vrot.slane %v754_v36, %v4690_v2  ;;  %v4918_v4 = vpop.f32.mrb[12].mxu0  ;;  %v4920_v5 = vpop.f32.mrb[12].mxu1 }
 0x130   : > { %3852 = vst.msk [vmem:[%s4740_s5 + $0x24a] sm:$0x3] %vm3558_vm1, %v2877_v12  ;;  %3853 = vst.msk [vmem:[%s4740_s5 + $0x24c] sm:$0x3] %vm3558_vm1, %v2881_v13  ;;  %v2305_v50 = vrot.slane %v756_v14, %v4690_v2  ;;  %v1524_v53 = vrot.slane %v1508_v22, %v4684_v62  ;;  %v1531_v54 = vrot.slane %v1509_v29, %v4684_v62 }
 0x131   : > { %3854 = vst.msk [vmem:[%s4740_s5 + $0x24e] sm:$0x3] %vm3558_vm1, %v2885_v17  ;;  %3866 = vst.msk [vmem:[%s4740_s5 + $0x266] sm:$0x3] %vm3558_vm1, %v2869_v11  ;;  %v1538_v55 = vrot.slane %v1510_v43, %v4684_v62  ;;  %v2309_v56 = vrot.slane %v758_v44, %v4690_v2  ;;  %v1539_v58 = vcombine.high %v1517_v30, %v1517_v30 }
 0x132   : > { %3868 = vst.msk [vmem:[%s4740_s5 + $0x26a] sm:$0x3] %vm3558_vm1, %v2877_v12  ;;  %3869 = vst.msk [vmem:[%s4740_s5 + $0x26c] sm:$0x3] %vm3558_vm1, %v2881_v13  ;;  %v2793_v60 = vrot.slane %v1517_v30, %v4690_v2  ;;  %v857_v61 = vcombine.high %v649_v31, %v649_v31  ;;  %v1540_v63 = vcombine.high %v1524_v53, %v1524_v53  ;;  %v4934_v12 = vpop.f32.mrb[13].mxu0  ;;  %v4936_v13 = vpop.f32.mrb[13].mxu1 }
 0x133   : > { %3870 = vst.msk [vmem:[%s4740_s5 + $0x26e] sm:$0x3] %vm3558_vm1, %v2885_v17  ;;  %3559 = vst.msk [vmem:[%s4740_s5] sm:$0x3] %vm3558_vm1, %v2281_v9  ;;  %v1541_v0 = vcombine.high %v1531_v54, %v1531_v54  ;;  %v1542_v1 = vcombine.high %v1538_v55, %v1538_v55  ;;  %v2797_v3 = vrot.slane %v1531_v54, %v4690_v2  ;;  %v4946_v26 = vpop.f32.mrb[14].mxu0 }
 0x134   : > { %3560 = vst.msk [vmem:[%s4740_s5 + $0x2] sm:$0x3] %vm3558_vm1, %v2285_v41  ;;  %3563 = vst.msk [vmem:[%s4740_s5 + $0x8] sm:$0x3] %vm3558_vm1, %v2297_v42  ;;  %v2801_v6 = vrot.slane %v1539_v58, %v4690_v2  ;;  %v2809_v7 = vrot.slane %v1524_v53, %v4690_v2  ;;  %v2813_v8 = vrot.slane %v1538_v55, %v4690_v2 }
 0x135   : > { %3575 = vst.msk [vmem:[%s4740_s5 + $0x20] sm:$0x3] %vm3558_vm1, %v2281_v9  ;;  %3576 = vst.msk [vmem:[%s4740_s5 + $0x22] sm:$0x3] %vm3558_vm1, %v2285_v41  ;;  %v864_v11 = vrot.slane %v649_v31, %v4684_v62  ;;  %v2805_v17 = vrot.slane %v1541_v0, %v4690_v2  ;;  %v2817_v20 = vrot.slane %v1540_v63, %v4690_v2 }
 0x136   : > { %3579 = vst.msk [vmem:[%s4740_s5 + $0x28] sm:$0x3] %vm3558_vm1, %v2297_v42  ;;  %3561 = vst.msk [vmem:[%s4740_s5 + $0x4] sm:$0x3] %vm3558_vm1, %v2289_v47  ;;  %v2821_v21 = vrot.slane %v1542_v1, %v4690_v2  ;;  %v871_v25 = vrot.slane %v857_v61, %v4684_v62  ;;  %v665_v30 = vadd.f32 %v4681_v59, %v4700_v10 }
 0x137   : > { %3562 = vst.msk [vmem:[%s4740_s5 + $0x6] sm:$0x3] %vm3558_vm1, %v2293_v48  ;;  %3564 = vst.msk [vmem:[%s4740_s5 + $0xa] sm:$0x3] %vm3558_vm1, %v2301_v49  ;;  %v872_v22 = vcombine.high %v864_v11, %v864_v11  ;;  %v880_v29 = vrot.slane %v864_v11, %v4684_v62  ;;  %v647_v31 = vadd.f32 %v4681_v59, %v4707_v15 }
 0x138   : > { %3577 = vst.msk [vmem:[%s4740_s5 + $0x24] sm:$0x3] %vm3558_vm1, %v2289_v47  ;;  %3578 = vst.msk [vmem:[%s4740_s5 + $0x26] sm:$0x3] %vm3558_vm1, %v2293_v48  ;;  %v873_v36 = vcombine.high %v871_v25, %v871_v25  ;;  %v887_v37 = vrot.slane %v871_v25, %v4684_v62  ;;  %v4980_v10 = vadd.f32 %v4681_v59, %v4710_v16  ;;  %v4991_v47 = vpop.f32.mrb[14].mxu1 }
 0x139   : > { %3580 = vst.msk [vmem:[%s4740_s5 + $0x2a] sm:$0x3] %vm3558_vm1, %v2301_v49  ;;  %3565 = vst.msk [vmem:[%s4740_s5 + $0xc] sm:$0x3] %vm3558_vm1, %v2305_v50  ;;  %v4984_v15 = vmul.f32 %v4733_v33, %v4676_v57  ;;  %v894_v14 = vrot.slane %v872_v22, %v4684_v62  ;;  %v902_v23 = vcombine.high %v880_v29, %v880_v29 }
 0x13a   : > { %3581 = vst.msk [vmem:[%s4740_s5 + $0x2c] sm:$0x3] %vm3558_vm1, %v2305_v50  ;;  %3566 = vst.msk [vmem:[%s4740_s5 + $0xe] sm:$0x3] %vm3558_vm1, %v2309_v56  ;;  %v2377_v9 = vrot.slane %v880_v29, %v4690_v2  ;;  %v1641_v41 = vcombine.high %v665_v30, %v665_v30  ;;  %v901_v42 = vrot.slane %v873_v36, %v4684_v62 }
 0x13b   : > { %3582 = vst.msk [vmem:[%s4740_s5 + $0x2e] sm:$0x3] %vm3558_vm1, %v2309_v56  ;;  %3815 = vst.msk [vmem:[%s4740_s5 + $0x200] sm:$0x3] %vm3558_vm1, %v2793_v60  ;;  %v903_v43 = vcombine.high %v887_v37, %v887_v37  ;;  %v2393_v44 = vrot.slane %v887_v37, %v4690_v2  ;;  %v1648_v16 = vrot.slane %v665_v30, %v4684_v62  ;;  %v5048_v37 = vpop.f32.mrb[15].mxu0 }
 0x13c   : > { %3831 = vst.msk [vmem:[%s4740_s5 + $0x220] sm:$0x3] %vm3558_vm1, %v2793_v60  ;;  %3816 = vst.msk [vmem:[%s4740_s5 + $0x202] sm:$0x3] %vm3558_vm1, %v2797_v3  ;;  %v904_v33 = vcombine.high %v894_v14, %v894_v14  ;;  %v2381_v48 = vrot.slane %v894_v14, %v4690_v2  ;;  %v2385_v49 = vrot.slane %v902_v23, %v4690_v2 }
 0x13d   : > { %3832 = vst.msk [vmem:[%s4740_s5 + $0x222] sm:$0x3] %vm3558_vm1, %v2797_v3  ;;  %3817 = vst.msk [vmem:[%s4740_s5 + $0x204] sm:$0x3] %vm3558_vm1, %v2801_v6  ;;  %v1655_v50 = vrot.slane %v1641_v41, %v4684_v62  ;;  %v905_v53 = vcombine.high %v901_v42, %v901_v42  ;;  %v2397_v54 = vrot.slane %v901_v42, %v4690_v2 }
 0x13e   : > { %3819 = vst.msk [vmem:[%s4740_s5 + $0x208] sm:$0x3] %vm3558_vm1, %v2809_v7  ;;  %3820 = vst.msk [vmem:[%s4740_s5 + $0x20a] sm:$0x3] %vm3558_vm1, %v2813_v8  ;;  %v2401_v55 = vrot.slane %v903_v43, %v4690_v2  ;;  %v1656_v56 = vcombine.high %v1648_v16, %v1648_v16  ;;  %v2389_v58 = vrot.slane %v904_v33, %v4690_v2 }
 0x13f   : > { %3833 = vst.msk [vmem:[%s4740_s5 + $0x224] sm:$0x3] %vm3558_vm1, %v2801_v6  ;;  %3835 = vst.msk [vmem:[%s4740_s5 + $0x228] sm:$0x3] %vm3558_vm1, %v2809_v7  ;;  %v1657_v60 = vcombine.high %v1655_v50, %v1655_v50  ;;  %v1664_v61 = vrot.slane %v1648_v16, %v4684_v62  ;;  %v1671_v63 = vrot.slane %v1655_v50, %v4684_v62 }
 0x140   : > { %3836 = vst.msk [vmem:[%s4740_s5 + $0x22a] sm:$0x3] %vm3558_vm1, %v2813_v8  ;;  %3818 = vst.msk [vmem:[%s4740_s5 + $0x206] sm:$0x3] %vm3558_vm1, %v2805_v17  ;;  %v2405_v0 = vrot.slane %v905_v53, %v4690_v2  ;;  %v1678_v1 = vrot.slane %v1656_v56, %v4684_v62  ;;  %v759_v3 = vcombine.high %v647_v31, %v647_v31  ;;  %v5091_v56 = vpop.f32.mrb[15].mxu1 }
 0x141   : > { %3821 = vst.msk [vmem:[%s4740_s5 + $0x20c] sm:$0x3] %vm3558_vm1, %v2817_v20  ;;  %3822 = vst.msk [vmem:[%s4740_s5 + $0x20e] sm:$0x3] %vm3558_vm1, %v2821_v21  ;;  %v766_v6 = vrot.slane %v647_v31, %v4684_v62  ;;  %v1685_v7 = vrot.slane %v1657_v60, %v4684_v62  ;;  %v1686_v8 = vcombine.high %v1664_v61, %v1664_v61 }
 0x142   : > { %3834 = vst.msk [vmem:[%s4740_s5 + $0x226] sm:$0x3] %vm3558_vm1, %v2805_v17  ;;  %3837 = vst.msk [vmem:[%s4740_s5 + $0x22c] sm:$0x3] %vm3558_vm1, %v2817_v20  ;;  %v1687_v11 = vcombine.high %v1671_v63, %v1671_v63  ;;  %v2889_v17 = vrot.slane %v1664_v61, %v4690_v2  ;;  %v1688_v20 = vcombine.high %v1678_v1, %v1678_v1 }
 0x143   : > { %3838 = vst.msk [vmem:[%s4740_s5 + $0x22e] sm:$0x3] %vm3558_vm1, %v2821_v21  ;;  %3599 = vst.msk [vmem:[%s4740_s5 + $0x50] sm:$0x3] %vm3558_vm1, %v2377_v9  ;;  %v2893_v21 = vrot.slane %v1678_v1, %v4690_v2  ;;  %v2905_v25 = vrot.slane %v1671_v63, %v4690_v2  ;;  %v773_v22 = vrot.slane %v759_v3, %v4684_v62 }
 0x144   : > { %3615 = vst.msk [vmem:[%s4740_s5 + $0x70] sm:$0x3] %vm3558_vm1, %v2377_v9  ;;  %3603 = vst.msk [vmem:[%s4740_s5 + $0x58] sm:$0x3] %vm3558_vm1, %v2393_v44  ;;  %v1689_v29 = vcombine.high %v1685_v7, %v1685_v7  ;;  %v2897_v30 = vrot.slane %v1686_v8, %v4690_v2  ;;  %v2909_v31 = vrot.slane %v1685_v7, %v4690_v2 }
 0x145   : > { %3619 = vst.msk [vmem:[%s4740_s5 + $0x78] sm:$0x3] %vm3558_vm1, %v2393_v44  ;;  %3600 = vst.msk [vmem:[%s4740_s5 + $0x52] sm:$0x3] %vm3558_vm1, %v2381_v48  ;;  %v2913_v36 = vrot.slane %v1687_v11, %v4690_v2  ;;  %v2901_v14 = vrot.slane %v1688_v20, %v4690_v2  ;;  %v774_v23 = vcombine.high %v766_v6, %v766_v6 }
 0x146   : > { %3601 = vst.msk [vmem:[%s4740_s5 + $0x54] sm:$0x3] %vm3558_vm1, %v2385_v49  ;;  %3616 = vst.msk [vmem:[%s4740_s5 + $0x72] sm:$0x3] %vm3558_vm1, %v2381_v48  ;;  %v775_v9 = vcombine.high %v773_v22, %v773_v22  ;;  %v782_v41 = vrot.slane %v766_v6, %v4684_v62  ;;  %v2917_v42 = vrot.slane %v1689_v29, %v4690_v2 }
 0x147   : > { %3617 = vst.msk [vmem:[%s4740_s5 + $0x74] sm:$0x3] %vm3558_vm1, %v2385_v49  ;;  %3604 = vst.msk [vmem:[%s4740_s5 + $0x5a] sm:$0x3] %vm3558_vm1, %v2397_v54  ;;  %v789_v43 = vrot.slane %v773_v22, %v4684_v62  ;;  %v1543_v44 = vcombine.high %v4980_v10, %v4980_v10  ;;  %v1550_v16 = vrot.slane %v4980_v10, %v4684_v62 }
 0x148   : > { %3605 = vst.msk [vmem:[%s4740_s5 + $0x5c] sm:$0x3] %vm3558_vm1, %v2401_v55  ;;  %3620 = vst.msk [vmem:[%s4740_s5 + $0x7a] sm:$0x3] %vm3558_vm1, %v2397_v54  ;;  %v796_v33 = vrot.slane %v774_v23, %v4684_v62  ;;  %v803_v48 = vrot.slane %v775_v9, %v4684_v62  ;;  %v804_v49 = vcombine.high %v782_v41, %v782_v41 }
 0x149   : > { %3621 = vst.msk [vmem:[%s4740_s5 + $0x7c] sm:$0x3] %vm3558_vm1, %v2401_v55  ;;  %3602 = vst.msk [vmem:[%s4740_s5 + $0x56] sm:$0x3] %vm3558_vm1, %v2389_v58  ;;  %v2313_v50 = vrot.slane %v782_v41, %v4690_v2  ;;  %v805_v10 = vcombine.high %v789_v43, %v789_v43  ;;  %v2329_v53 = vrot.slane %v789_v43, %v4690_v2 }
 0x14a   : > { %3618 = vst.msk [vmem:[%s4740_s5 + $0x76] sm:$0x3] %vm3558_vm1, %v2389_v58  ;;  %3606 = vst.msk [vmem:[%s4740_s5 + $0x5e] sm:$0x3] %vm3558_vm1, %v2405_v0  ;;  %v1557_v54 = vrot.slane %v1543_v44, %v4684_v62  ;;  %v1558_v55 = vcombine.high %v1550_v16, %v1550_v16  ;;  %v806_v58 = vcombine.high %v796_v33, %v796_v33 }
 0x14b   : > { %3622 = vst.msk [vmem:[%s4740_s5 + $0x7e] sm:$0x3] %vm3558_vm1, %v2405_v0  ;;  %3855 = vst.msk [vmem:[%s4740_s5 + $0x250] sm:$0x3] %vm3558_vm1, %v2889_v17  ;;  %v807_v60 = vcombine.high %v803_v48, %v803_v48  ;;  %v2317_v61 = vrot.slane %v796_v33, %v4690_v2  ;;  %v2321_v63 = vrot.slane %v804_v49, %v4690_v2 }
 0x14c   : > { %3871 = vst.msk [vmem:[%s4740_s5 + $0x270] sm:$0x3] %vm3558_vm1, %v2889_v17  ;;  %3856 = vst.msk [vmem:[%s4740_s5 + $0x252] sm:$0x3] %vm3558_vm1, %v2893_v21  ;;  %v2333_v0 = vrot.slane %v803_v48, %v4690_v2  ;;  %v2337_v1 = vrot.slane %v805_v10, %v4690_v2  ;;  %v1559_v3 = vcombine.high %v1557_v54, %v1557_v54 }
 0x14d   : > { %3859 = vst.msk [vmem:[%s4740_s5 + $0x258] sm:$0x3] %vm3558_vm1, %v2905_v25  ;;  %3872 = vst.msk [vmem:[%s4740_s5 + $0x272] sm:$0x3] %vm3558_vm1, %v2893_v21  ;;  %v1566_v6 = vrot.slane %v1550_v16, %v4684_v62  ;;  %v2325_v7 = vrot.slane %v806_v58, %v4690_v2  ;;  %v2341_v8 = vrot.slane %v807_v60, %v4690_v2 }
 0x14e   : > { %3875 = vst.msk [vmem:[%s4740_s5 + $0x278] sm:$0x3] %vm3558_vm1, %v2905_v25  ;;  %3857 = vst.msk [vmem:[%s4740_s5 + $0x254] sm:$0x3] %vm3558_vm1, %v2897_v30  ;;  %v1573_v11 = vrot.slane %v1557_v54, %v4684_v62  ;;  %v1580_v17 = vrot.slane %v1558_v55, %v4684_v62  ;;  %v1587_v20 = vrot.slane %v1559_v3, %v4684_v62 }
 0x14f   : > { %3860 = vst.msk [vmem:[%s4740_s5 + $0x25a] sm:$0x3] %vm3558_vm1, %v2909_v31  ;;  %3861 = vst.msk [vmem:[%s4740_s5 + $0x25c] sm:$0x3] %vm3558_vm1, %v2913_v36  ;;  %v1588_v21 = vcombine.high %v1566_v6, %v1566_v6  ;;  %v2825_v25 = vrot.slane %v1566_v6, %v4690_v2  ;;  %v652_v22 = vadd.f32 %v4681_v59, %v4984_v15 }
 0x150   : > { %3873 = vst.msk [vmem:[%s4740_s5 + $0x274] sm:$0x3] %vm3558_vm1, %v2897_v30  ;;  %3876 = vst.msk [vmem:[%s4740_s5 + $0x27a] sm:$0x3] %vm3558_vm1, %v2909_v31  ;;  %v1589_v29 = vcombine.high %v1573_v11, %v1573_v11  ;;  %v1590_v30 = vcombine.high %v1580_v17, %v1580_v17  ;;  %v2829_v31 = vrot.slane %v1580_v17, %v4690_v2 }
 0x151   : > { %3877 = vst.msk [vmem:[%s4740_s5 + $0x27c] sm:$0x3] %vm3558_vm1, %v2913_v36  ;;  %3858 = vst.msk [vmem:[%s4740_s5 + $0x256] sm:$0x3] %vm3558_vm1, %v2901_v14  ;;  %v2841_v36 = vrot.slane %v1573_v11, %v4690_v2  ;;  %v1591_v15 = vcombine.high %v1587_v20, %v1587_v20  ;;  %v2845_v23 = vrot.slane %v1587_v20, %v4690_v2 }
 0x152   : > { %3874 = vst.msk [vmem:[%s4740_s5 + $0x276] sm:$0x3] %vm3558_vm1, %v2901_v14  ;;  %3862 = vst.msk [vmem:[%s4740_s5 + $0x25e] sm:$0x3] %vm3558_vm1, %v2917_v42  ;;  %v2833_v14 = vrot.slane %v1588_v21, %v4690_v2  ;;  %v1004_v9 = vcombine.high %v652_v22, %v652_v22  ;;  %v2837_v41 = vrot.slane %v1590_v30, %v4690_v2 }
 0x153   : > { %3878 = vst.msk [vmem:[%s4740_s5 + $0x27e] sm:$0x3] %vm3558_vm1, %v2917_v42  ;;  %3567 = vst.msk [vmem:[%s4740_s5 + $0x10] sm:$0x3] %vm3558_vm1, %v2313_v50  ;;  %v2849_v42 = vrot.slane %v1589_v29, %v4690_v2  ;;  %v1011_v43 = vrot.slane %v652_v22, %v4684_v62  ;;  %v629_v44 = vmul.f32 %v4735_v34, %v4676_v57 }
 0x154   : > { %3583 = vst.msk [vmem:[%s4740_s5 + $0x30] sm:$0x3] %vm3558_vm1, %v2313_v50  ;;  %3571 = vst.msk [vmem:[%s4740_s5 + $0x18] sm:$0x3] %vm3558_vm1, %v2329_v53  ;;  %v2853_v16 = vrot.slane %v1591_v15, %v4690_v2  ;;  %v1018_v33 = vrot.slane %v1004_v9, %v4684_v62  ;;  %v611_v48 = vmul.f32 %v4676_v57, %v4744_v39 }
 0x155   : > { %3587 = vst.msk [vmem:[%s4740_s5 + $0x38] sm:$0x3] %vm3558_vm1, %v2329_v53  ;;  %3568 = vst.msk [vmem:[%s4740_s5 + $0x12] sm:$0x3] %vm3558_vm1, %v2317_v61  ;;  %v627_v34 = vmul.f32 %v4676_v57, %v4746_v40  ;;  %v1019_v49 = vcombine.high %v1011_v43, %v1011_v43  ;;  %v1027_v50 = vrot.slane %v1011_v43, %v4684_v62 }
 0x156   : > { %3569 = vst.msk [vmem:[%s4740_s5 + $0x14] sm:$0x3] %vm3558_vm1, %v2321_v63  ;;  %3584 = vst.msk [vmem:[%s4740_s5 + $0x32] sm:$0x3] %vm3558_vm1, %v2317_v61  ;;  %v668_v10 = vadd.f32 %v4681_v59, %v629_v44  ;;  %v5185_v53 = vmul.f32 %v4751_v45, %v4676_v57  ;;  %v1020_v39 = vcombine.high %v1018_v33, %v1018_v33 }
 0x157   : > { %3585 = vst.msk [vmem:[%s4740_s5 + $0x34] sm:$0x3] %vm3558_vm1, %v2321_v63  ;;  %3572 = vst.msk [vmem:[%s4740_s5 + $0x1a] sm:$0x3] %vm3558_vm1, %v2333_v0  ;;  %v1034_v40 = vrot.slane %v1018_v33, %v4684_v62  ;;  %v650_v54 = vadd.f32 %v4681_v59, %v611_v48  ;;  %v5194_v55 = vadd.f32 %v4681_v59, %v627_v34 }
 0x158   : > { %3573 = vst.msk [vmem:[%s4740_s5 + $0x1c] sm:$0x3] %vm3558_vm1, %v2337_v1  ;;  %3588 = vst.msk [vmem:[%s4740_s5 + $0x3a] sm:$0x3] %vm3558_vm1, %v2333_v0  ;;  %v1041_v58 = vrot.slane %v1019_v49, %v4684_v62  ;;  %v1049_v60 = vcombine.high %v1027_v50, %v1027_v50  ;;  %v2473_v45 = vrot.slane %v1027_v50, %v4690_v2 }
 0x159   : > { %3589 = vst.msk [vmem:[%s4740_s5 + $0x3c] sm:$0x3] %vm3558_vm1, %v2337_v1  ;;  %3570 = vst.msk [vmem:[%s4740_s5 + $0x16] sm:$0x3] %vm3558_vm1, %v2325_v7  ;;  %v1788_v61 = vcombine.high %v668_v10, %v668_v10  ;;  %v1048_v63 = vrot.slane %v1020_v39, %v4684_v62  ;;  %v1050_v0 = vcombine.high %v1034_v40, %v1034_v40 }
 0x15a   : > { %3574 = vst.msk [vmem:[%s4740_s5 + $0x1e] sm:$0x3] %vm3558_vm1, %v2341_v8  ;;  %3586 = vst.msk [vmem:[%s4740_s5 + $0x36] sm:$0x3] %vm3558_vm1, %v2325_v7  ;;  %v2489_v1 = vrot.slane %v1034_v40, %v4690_v2  ;;  %v1795_v3 = vrot.slane %v668_v10, %v4684_v62  ;;  %v1051_v6 = vcombine.high %v1041_v58, %v1041_v58 }
 0x15b   : > { %3590 = vst.msk [vmem:[%s4740_s5 + $0x3e] sm:$0x3] %vm3558_vm1, %v2341_v8  ;;  %3823 = vst.msk [vmem:[%s4740_s5 + $0x210] sm:$0x3] %vm3558_vm1, %v2825_v25  ;;  %v2477_v7 = vrot.slane %v1041_v58, %v4690_v2  ;;  %v2481_v8 = vrot.slane %v1049_v60, %v4690_v2  ;;  %v1802_v11 = vrot.slane %v1788_v61, %v4684_v62 }
 0x15c   : > { %3839 = vst.msk [vmem:[%s4740_s5 + $0x230] sm:$0x3] %vm3558_vm1, %v2825_v25  ;;  %3824 = vst.msk [vmem:[%s4740_s5 + $0x212] sm:$0x3] %vm3558_vm1, %v2829_v31  ;;  %v1052_v17 = vcombine.high %v1048_v63, %v1048_v63  ;;  %v2493_v20 = vrot.slane %v1048_v63, %v4690_v2  ;;  %v2497_v21 = vrot.slane %v1050_v0, %v4690_v2 }
 0x15d   : > { %3827 = vst.msk [vmem:[%s4740_s5 + $0x218] sm:$0x3] %vm3558_vm1, %v2841_v36  ;;  %3840 = vst.msk [vmem:[%s4740_s5 + $0x232] sm:$0x3] %vm3558_vm1, %v2829_v31  ;;  %v1803_v25 = vcombine.high %v1795_v3, %v1795_v3  ;;  %v2485_v22 = vrot.slane %v1051_v6, %v4690_v2  ;;  %v1804_v29 = vcombine.high %v1802_v11, %v1802_v11 }
 0x15e   : > { %3843 = vst.msk [vmem:[%s4740_s5 + $0x238] sm:$0x3] %vm3558_vm1, %v2841_v36  ;;  %3825 = vst.msk [vmem:[%s4740_s5 + $0x214] sm:$0x3] %vm3558_vm1, %v2833_v14  ;;  %v1811_v30 = vrot.slane %v1795_v3, %v4684_v62  ;;  %v1818_v31 = vrot.slane %v1802_v11, %v4684_v62  ;;  %v2501_v36 = vrot.slane %v1052_v17, %v4690_v2 }
 0x15f   : > { %3828 = vst.msk [vmem:[%s4740_s5 + $0x21a] sm:$0x3] %vm3558_vm1, %v2845_v23  ;;  %3841 = vst.msk [vmem:[%s4740_s5 + $0x234] sm:$0x3] %vm3558_vm1, %v2833_v14  ;;  %v1825_v15 = vrot.slane %v1803_v25, %v4684_v62  ;;  %v906_v14 = vcombine.high %v650_v54, %v650_v54  ;;  %v1832_v9 = vrot.slane %v1804_v29, %v4684_v62 }
 0x160   : > { %3844 = vst.msk [vmem:[%s4740_s5 + $0x23a] sm:$0x3] %vm3558_vm1, %v2845_v23  ;;  %3826 = vst.msk [vmem:[%s4740_s5 + $0x216] sm:$0x3] %vm3558_vm1, %v2837_v41  ;;  %v913_v23 = vrot.slane %v650_v54, %v4684_v62  ;;  %v2985_v43 = vrot.slane %v1811_v30, %v4690_v2  ;;  %v3001_v33 = vrot.slane %v1818_v31, %v4690_v2 }
 0x161   : > { %3829 = vst.msk [vmem:[%s4740_s5 + $0x21c] sm:$0x3] %vm3558_vm1, %v2849_v42  ;;  %3842 = vst.msk [vmem:[%s4740_s5 + $0x236] sm:$0x3] %vm3558_vm1, %v2837_v41  ;;  %v1833_v41 = vcombine.high %v1811_v30, %v1811_v30  ;;  %v1835_v44 = vcombine.high %v1825_v15, %v1825_v15  ;;  %v920_v48 = vrot.slane %v906_v14, %v4684_v62 }
 0x162   : > { %3845 = vst.msk [vmem:[%s4740_s5 + $0x23c] sm:$0x3] %vm3558_vm1, %v2849_v42  ;;  %3830 = vst.msk [vmem:[%s4740_s5 + $0x21e] sm:$0x3] %vm3558_vm1, %v2853_v16  ;;  %v1834_v42 = vcombine.high %v1818_v31, %v1818_v31  ;;  %v1836_v34 = vcombine.high %v1832_v9, %v1832_v9  ;;  %v3005_v50 = vrot.slane %v1832_v9, %v4690_v2 }
 0x163   : > { %3846 = vst.msk [vmem:[%s4740_s5 + $0x23e] sm:$0x3] %vm3558_vm1, %v2853_v16  ;;  %3655 = vst.msk [vmem:[%s4740_s5 + $0xc0] sm:$0x3] %vm3558_vm1, %v2473_v45  ;;  %v2989_v16 = vrot.slane %v1825_v15, %v4690_v2  ;;  %v2993_v49 = vrot.slane %v1833_v41, %v4690_v2  ;;  %v2997_v39 = vrot.slane %v1835_v44, %v4690_v2 }
 0x164   : > { %3671 = vst.msk [vmem:[%s4740_s5 + $0xe0] sm:$0x3] %vm3558_vm1, %v2473_v45  ;;  %3659 = vst.msk [vmem:[%s4740_s5 + $0xc8] sm:$0x3] %vm3558_vm1, %v2489_v1  ;;  %v3009_v10 = vrot.slane %v1834_v42, %v4690_v2  ;;  %v921_v40 = vcombine.high %v913_v23, %v913_v23  ;;  %v922_v54 = vcombine.high %v920_v48, %v920_v48 }
 0x165   : > { %3675 = vst.msk [vmem:[%s4740_s5 + $0xe8] sm:$0x3] %vm3558_vm1, %v2489_v1  ;;  %3656 = vst.msk [vmem:[%s4740_s5 + $0xc2] sm:$0x3] %vm3558_vm1, %v2477_v7  ;;  %v929_v58 = vrot.slane %v913_v23, %v4684_v62  ;;  %v3013_v60 = vrot.slane %v1836_v34, %v4690_v2  ;;  %v936_v45 = vrot.slane %v920_v48, %v4684_v62 }
 0x166   : > { %3657 = vst.msk [vmem:[%s4740_s5 + $0xc4] sm:$0x3] %vm3558_vm1, %v2481_v8  ;;  %3672 = vst.msk [vmem:[%s4740_s5 + $0xe2] sm:$0x3] %vm3558_vm1, %v2477_v7  ;;  %v1690_v61 = vcombine.high %v5194_v55, %v5194_v55  ;;  %v1697_v63 = vrot.slane %v5194_v55, %v4684_v62  ;;  %v943_v0 = vrot.slane %v921_v40, %v4684_v62 }
 0x167   : > { %3673 = vst.msk [vmem:[%s4740_s5 + $0xe4] sm:$0x3] %vm3558_vm1, %v2481_v8  ;;  %3660 = vst.msk [vmem:[%s4740_s5 + $0xca] sm:$0x3] %vm3558_vm1, %v2493_v20  ;;  %v950_v1 = vrot.slane %v922_v54, %v4684_v62  ;;  %v951_v3 = vcombine.high %v929_v58, %v929_v58  ;;  %v2409_v6 = vrot.slane %v929_v58, %v4690_v2 }
 0x168   : > { %3661 = vst.msk [vmem:[%s4740_s5 + $0xcc] sm:$0x3] %vm3558_vm1, %v2497_v21  ;;  %3676 = vst.msk [vmem:[%s4740_s5 + $0xea] sm:$0x3] %vm3558_vm1, %v2493_v20  ;;  %v952_v55 = vcombine.high %v936_v45, %v936_v45  ;;  %v2425_v7 = vrot.slane %v936_v45, %v4690_v2  ;;  %v1704_v8 = vrot.slane %v1690_v61, %v4684_v62 }
 0x169   : > { %3677 = vst.msk [vmem:[%s4740_s5 + $0xec] sm:$0x3] %vm3558_vm1, %v2497_v21  ;;  %3658 = vst.msk [vmem:[%s4740_s5 + $0xc6] sm:$0x3] %vm3558_vm1, %v2485_v22  ;;  %v1705_v11 = vcombine.high %v1697_v63, %v1697_v63  ;;  %v953_v17 = vcombine.high %v943_v0, %v943_v0  ;;  %v954_v20 = vcombine.high %v950_v1, %v950_v1 }
 0x16a   : > { %3674 = vst.msk [vmem:[%s4740_s5 + $0xe6] sm:$0x3] %vm3558_vm1, %v2485_v22  ;;  %3662 = vst.msk [vmem:[%s4740_s5 + $0xce] sm:$0x3] %vm3558_vm1, %v2501_v36  ;;  %v2413_v21 = vrot.slane %v943_v0, %v4690_v2  ;;  %v2417_v25 = vrot.slane %v951_v3, %v4690_v2  ;;  %v2429_v22 = vrot.slane %v950_v1, %v4690_v2 }
 0x16b   : > { %3678 = vst.msk [vmem:[%s4740_s5 + $0xee] sm:$0x3] %vm3558_vm1, %v2501_v36  ;;  %3911 = vst.msk [vmem:[%s4740_s5 + $0x2c0] sm:$0x3] %vm3558_vm1, %v2985_v43  ;;  %v2433_v29 = vrot.slane %v952_v55, %v4690_v2  ;;  %v1706_v30 = vcombine.high %v1704_v8, %v1704_v8  ;;  %v1713_v31 = vrot.slane %v1697_v63, %v4684_v62  ;;  %v5389_v63 = vld [vmem:[%s6425_s3] ss:$0 sm:$0xff] }
 0x16c   : > { %3927 = vst.msk [vmem:[%s4740_s5 + $0x2e0] sm:$0x3] %vm3558_vm1, %v2985_v43  ;;  %3912 = vst.msk [vmem:[%s4740_s5 + $0x2c2] sm:$0x3] %vm3558_vm1, %v2989_v16  ;;  %v2421_v36 = vrot.slane %v953_v17, %v4690_v2  ;;  %v2437_v15 = vrot.slane %v954_v20, %v4690_v2  ;;  %v1720_v14 = vrot.slane %v1704_v8, %v4684_v62 }
 0x16d   : > { %3915 = vst.msk [vmem:[%s4740_s5 + $0x2c8] sm:$0x3] %vm3558_vm1, %v3001_v33  ;;  %3928 = vst.msk [vmem:[%s4740_s5 + $0x2e2] sm:$0x3] %vm3558_vm1, %v2989_v16  ;;  %v1727_v23 = vrot.slane %v1705_v11, %v4684_v62  ;;  %v1734_v9 = vrot.slane %v1706_v30, %v4684_v62  ;;  %v1735_v41 = vcombine.high %v1713_v31, %v1713_v31 }
 0x16e   : > { %3931 = vst.msk [vmem:[%s4740_s5 + $0x2e8] sm:$0x3] %vm3558_vm1, %v3001_v33  ;;  %3913 = vst.msk [vmem:[%s4740_s5 + $0x2c4] sm:$0x3] %vm3558_vm1, %v2993_v49  ;;  %v2921_v42 = vrot.slane %v1713_v31, %v4690_v2  ;;  %v653_v43 = vadd.f32 %v4681_v59, %v5185_v53  ;;  %v1736_v44 = vcombine.high %v1720_v14, %v1720_v14 }
 0x16f   : > { %3916 = vst.msk [vmem:[%s4740_s5 + $0x2ca] sm:$0x3] %vm3558_vm1, %v3005_v50  ;;  %3917 = vst.msk [vmem:[%s4740_s5 + $0x2cc] sm:$0x3] %vm3558_vm1, %v3009_v10  ;;  %v1737_v16 = vcombine.high %v1727_v23, %v1727_v23  ;;  %v2925_v33 = vrot.slane %v1727_v23, %v4690_v2  ;;  %v2937_v48 = vrot.slane %v1720_v14, %v4690_v2 }
 0x170   : > { %3929 = vst.msk [vmem:[%s4740_s5 + $0x2e4] sm:$0x3] %vm3558_vm1, %v2993_v49  ;;  %3932 = vst.msk [vmem:[%s4740_s5 + $0x2ea] sm:$0x3] %vm3558_vm1, %v3005_v50  ;;  %v1738_v59 = vcombine.high %v1734_v9, %v1734_v9  ;;  %v2929_v53 = vrot.slane %v1735_v41, %v4690_v2  ;;  %v2941_v34 = vrot.slane %v1734_v9, %v4690_v2 }
 0x171   : > { %3933 = vst.msk [vmem:[%s4740_s5 + $0x2ec] sm:$0x3] %vm3558_vm1, %v3009_v10  ;;  %3914 = vst.msk [vmem:[%s4740_s5 + $0x2c6] sm:$0x3] %vm3558_vm1, %v2997_v39  ;;  %v1053_v49 = vcombine.high %v653_v43, %v653_v43  ;;  %v2933_v50 = vrot.slane %v1737_v16, %v4690_v2  ;;  %v2945_v10 = vrot.slane %v1736_v44, %v4690_v2 }
 0x172   : > { %3930 = vst.msk [vmem:[%s4740_s5 + $0x2e6] sm:$0x3] %vm3558_vm1, %v2997_v39  ;;  %3918 = vst.msk [vmem:[%s4740_s5 + $0x2ce] sm:$0x3] %vm3558_vm1, %v3013_v60  ;;  %v1060_v39 = vrot.slane %v653_v43, %v4684_v62  ;;  %v630_v40 = vmul.f32 %v4753_v46, %v4676_v57  ;;  %v2949_v54 = vrot.slane %v1738_v59, %v4690_v2 }
 0x173   : > { %3934 = vst.msk [vmem:[%s4740_s5 + $0x2ee] sm:$0x3] %vm3558_vm1, %v3013_v60  ;;  %3623 = vst.msk [vmem:[%s4740_s5 + $0x80] sm:$0x3] %vm3558_vm1, %v2409_v6  ;;  %v1067_v58 = vrot.slane %v1053_v49, %v4684_v62  ;;  %v612_v60 = vmul.f32 %v4676_v57, %v4757_v51  ;;  %v628_v46 = vmul.f32 %v4676_v57, %v4759_v52  ;;  %v5395_v57 = vld [vmem:[%s6424_s2] ss:$0 sm:$0xff] }
 0x174   : > { %3639 = vst.msk [vmem:[%s4740_s5 + $0xa0] sm:$0x3] %vm3558_vm1, %v2409_v6  ;;  %3627 = vst.msk [vmem:[%s4740_s5 + $0x88] sm:$0x3] %vm3558_vm1, %v2425_v7  ;;  %v1068_v45 = vcombine.high %v1060_v39, %v1060_v39  ;;  %v1076_v61 = vrot.slane %v1060_v39, %v4684_v62  ;;  %v669_v51 = vadd.f32 %v5389_v63, %v630_v40 }
 0x175   : > { %3643 = vst.msk [vmem:[%s4740_s5 + $0xa8] sm:$0x3] %vm3558_vm1, %v2425_v7  ;;  %3624 = vst.msk [vmem:[%s4740_s5 + $0x82] sm:$0x3] %vm3558_vm1, %v2413_v21  ;;  %v5399_v52 = vmul.f32 %v5395_v57, %v4808_v18  ;;  %v1069_v0 = vcombine.high %v1067_v58, %v1067_v58  ;;  %v1083_v1 = vrot.slane %v1067_v58, %v4684_v62 }
 0x176   : > { %3625 = vst.msk [vmem:[%s4740_s5 + $0x84] sm:$0x3] %vm3558_vm1, %v2417_v25  ;;  %3640 = vst.msk [vmem:[%s4740_s5 + $0xa2] sm:$0x3] %vm3558_vm1, %v2413_v21  ;;  %v651_v3 = vadd.f32 %v5389_v63, %v612_v60  ;;  %v5408_v6 = vadd.f32 %v5389_v63, %v628_v46  ;;  %v1090_v55 = vrot.slane %v1068_v45, %v4684_v62 }
 0x177   : > { %3641 = vst.msk [vmem:[%s4740_s5 + $0xa4] sm:$0x3] %vm3558_vm1, %v2417_v25  ;;  %3628 = vst.msk [vmem:[%s4740_s5 + $0x8a] sm:$0x3] %vm3558_vm1, %v2429_v22  ;;  %v1098_v7 = vcombine.high %v1076_v61, %v1076_v61  ;;  %v2505_v18 = vrot.slane %v1076_v61, %v4690_v2  ;;  %v1837_v8 = vcombine.high %v669_v51, %v669_v51 }
 0x178   : > { %3629 = vst.msk [vmem:[%s4740_s5 + $0x8c] sm:$0x3] %vm3558_vm1, %v2433_v29  ;;  %3644 = vst.msk [vmem:[%s4740_s5 + $0xaa] sm:$0x3] %vm3558_vm1, %v2429_v22  ;;  %v1097_v11 = vrot.slane %v1069_v0, %v4684_v62  ;;  %v1099_v17 = vcombine.high %v1083_v1, %v1083_v1  ;;  %v2521_v20 = vrot.slane %v1083_v1, %v4690_v2 }
 0x179   : > { %3645 = vst.msk [vmem:[%s4740_s5 + $0xac] sm:$0x3] %vm3558_vm1, %v2433_v29  ;;  %3626 = vst.msk [vmem:[%s4740_s5 + $0x86] sm:$0x3] %vm3558_vm1, %v2421_v36  ;;  %v1844_v21 = vrot.slane %v669_v51, %v4684_v62  ;;  %v1100_v25 = vcombine.high %v1090_v55, %v1090_v55  ;;  %v2509_v22 = vrot.slane %v1090_v55, %v4690_v2 }
 0x17a   : > { %3630 = vst.msk [vmem:[%s4740_s5 + $0x8e] sm:$0x3] %vm3558_vm1, %v2437_v15  ;;  %3642 = vst.msk [vmem:[%s4740_s5 + $0xa6] sm:$0x3] %vm3558_vm1, %v2421_v36  ;;  %v2513_v29 = vrot.slane %v1098_v7, %v4690_v2  ;;  %v1851_v30 = vrot.slane %v1837_v8, %v4684_v62  ;;  %v1101_v31 = vcombine.high %v1097_v11, %v1097_v11 }
 0x17b   : > { %3646 = vst.msk [vmem:[%s4740_s5 + $0xae] sm:$0x3] %vm3558_vm1, %v2437_v15  ;;  %3879 = vst.msk [vmem:[%s4740_s5 + $0x280] sm:$0x3] %vm3558_vm1, %v2921_v42  ;;  %v2525_v36 = vrot.slane %v1097_v11, %v4690_v2  ;;  %v2529_v15 = vrot.slane %v1099_v17, %v4690_v2  ;;  %v1852_v14 = vcombine.high %v1844_v21, %v1844_v21 }
 0x17c   : > { %3895 = vst.msk [vmem:[%s4740_s5 + $0x2a0] sm:$0x3] %vm3558_vm1, %v2921_v42  ;;  %3880 = vst.msk [vmem:[%s4740_s5 + $0x282] sm:$0x3] %vm3558_vm1, %v2925_v33  ;;  %v2517_v23 = vrot.slane %v1100_v25, %v4690_v2  ;;  %v1853_v9 = vcombine.high %v1851_v30, %v1851_v30  ;;  %v1860_v41 = vrot.slane %v1844_v21, %v4684_v62 }
 0x17d   : > { %3883 = vst.msk [vmem:[%s4740_s5 + $0x288] sm:$0x3] %vm3558_vm1, %v2937_v48  ;;  %3896 = vst.msk [vmem:[%s4740_s5 + $0x2a2] sm:$0x3] %vm3558_vm1, %v2925_v33  ;;  %v1867_v42 = vrot.slane %v1851_v30, %v4684_v62  ;;  %v2533_v43 = vrot.slane %v1101_v31, %v4690_v2  ;;  %v1874_v44 = vrot.slane %v1852_v14, %v4684_v62 }
 0x17e   : > { %3899 = vst.msk [vmem:[%s4740_s5 + $0x2a8] sm:$0x3] %vm3558_vm1, %v2937_v48  ;;  %3881 = vst.msk [vmem:[%s4740_s5 + $0x284] sm:$0x3] %vm3558_vm1, %v2929_v53  ;;  %v955_v16 = vcombine.high %v651_v3, %v651_v3  ;;  %v962_v33 = vrot.slane %v651_v3, %v4684_v62  ;;  %v1881_v48 = vrot.slane %v1853_v9, %v4684_v62 }
 0x17f   : > { %3884 = vst.msk [vmem:[%s4740_s5 + $0x28a] sm:$0x3] %vm3558_vm1, %v2941_v34  ;;  %3897 = vst.msk [vmem:[%s4740_s5 + $0x2a4] sm:$0x3] %vm3558_vm1, %v2929_v53  ;;  %v1882_v59 = vcombine.high %v1860_v41, %v1860_v41  ;;  %v1883_v53 = vcombine.high %v1867_v42, %v1867_v42  ;;  %v1884_v49 = vcombine.high %v1874_v44, %v1874_v44 }
 0x180   : > { %3900 = vst.msk [vmem:[%s4740_s5 + $0x2aa] sm:$0x3] %vm3558_vm1, %v2941_v34  ;;  %3882 = vst.msk [vmem:[%s4740_s5 + $0x286] sm:$0x3] %vm3558_vm1, %v2933_v50  ;;  %v3017_v34 = vrot.slane %v1860_v41, %v4690_v2  ;;  %v969_v39 = vrot.slane %v955_v16, %v4684_v62  ;;  %v1885_v40 = vcombine.high %v1881_v48, %v1881_v48 }
 0x181   : > { %3885 = vst.msk [vmem:[%s4740_s5 + $0x28c] sm:$0x3] %vm3558_vm1, %v2945_v10  ;;  %3898 = vst.msk [vmem:[%s4740_s5 + $0x2a6] sm:$0x3] %vm3558_vm1, %v2933_v50  ;;  %v3021_v50 = vrot.slane %v1874_v44, %v4690_v2  ;;  %v3037_v58 = vrot.slane %v1881_v48, %v4690_v2  ;;  %v3041_v60 = vrot.slane %v1883_v53, %v4690_v2 }
 0x182   : > { %3901 = vst.msk [vmem:[%s4740_s5 + $0x2ac] sm:$0x3] %vm3558_vm1, %v2945_v10  ;;  %3886 = vst.msk [vmem:[%s4740_s5 + $0x28e] sm:$0x3] %vm3558_vm1, %v2949_v54  ;;  %v3033_v10 = vrot.slane %v1867_v42, %v4690_v2  ;;  %v3029_v46 = vrot.slane %v1884_v49, %v4690_v2  ;;  %v970_v45 = vcombine.high %v962_v33, %v962_v33 }
 0x183   : > { %3902 = vst.msk [vmem:[%s4740_s5 + $0x2ae] sm:$0x3] %vm3558_vm1, %v2949_v54  ;;  %3663 = vst.msk [vmem:[%s4740_s5 + $0xd0] sm:$0x3] %vm3558_vm1, %v2505_v18  ;;  %v3025_v54 = vrot.slane %v1882_v59, %v4690_v2  ;;  %v971_v61 = vcombine.high %v969_v39, %v969_v39  ;;  %v978_v51 = vrot.slane %v962_v33, %v4684_v62 }
 0x184   : > { %3679 = vst.msk [vmem:[%s4740_s5 + $0xf0] sm:$0x3] %vm3558_vm1, %v2505_v18  ;;  %3667 = vst.msk [vmem:[%s4740_s5 + $0xd8] sm:$0x3] %vm3558_vm1, %v2521_v20  ;;  %v3045_v0 = vrot.slane %v1885_v40, %v4690_v2  ;;  %v985_v1 = vrot.slane %v969_v39, %v4684_v62  ;;  %v1739_v3 = vcombine.high %v5408_v6, %v5408_v6 }
 0x185   : > { %3683 = vst.msk [vmem:[%s4740_s5 + $0xf8] sm:$0x3] %vm3558_vm1, %v2521_v20  ;;  %3664 = vst.msk [vmem:[%s4740_s5 + $0xd2] sm:$0x3] %vm3558_vm1, %v2509_v22  ;;  %v1746_v55 = vrot.slane %v5408_v6, %v4684_v62  ;;  %v992_v7 = vrot.slane %v970_v45, %v4684_v62  ;;  %v999_v18 = vrot.slane %v971_v61, %v4684_v62 }
 0x186   : > { %3665 = vst.msk [vmem:[%s4740_s5 + $0xd4] sm:$0x3] %vm3558_vm1, %v2513_v29  ;;  %3680 = vst.msk [vmem:[%s4740_s5 + $0xf2] sm:$0x3] %vm3558_vm1, %v2509_v22  ;;  %v1000_v8 = vcombine.high %v978_v51, %v978_v51  ;;  %v2441_v11 = vrot.slane %v978_v51, %v4690_v2  ;;  %v1001_v6 = vcombine.high %v985_v1, %v985_v1 }
 0x187   : > { %3681 = vst.msk [vmem:[%s4740_s5 + $0xf4] sm:$0x3] %vm3558_vm1, %v2513_v29  ;;  %3668 = vst.msk [vmem:[%s4740_s5 + $0xda] sm:$0x3] %vm3558_vm1, %v2525_v36  ;;  %v2457_v17 = vrot.slane %v985_v1, %v4690_v2  ;;  %v1753_v20 = vrot.slane %v1739_v3, %v4684_v62  ;;  %v1754_v21 = vcombine.high %v1746_v55, %v1746_v55 }
 0x188   : > { %3669 = vst.msk [vmem:[%s4740_s5 + $0xdc] sm:$0x3] %vm3558_vm1, %v2529_v15  ;;  %3684 = vst.msk [vmem:[%s4740_s5 + $0xfa] sm:$0x3] %vm3558_vm1, %v2525_v36  ;;  %v1002_v25 = vcombine.high %v992_v7, %v992_v7  ;;  %v1003_v22 = vcombine.high %v999_v18, %v999_v18  ;;  %v2445_v29 = vrot.slane %v992_v7, %v4690_v2 }
 0x189   : > { %3685 = vst.msk [vmem:[%s4740_s5 + $0xfc] sm:$0x3] %vm3558_vm1, %v2529_v15  ;;  %3666 = vst.msk [vmem:[%s4740_s5 + $0xd6] sm:$0x3] %vm3558_vm1, %v2517_v23  ;;  %v2449_v30 = vrot.slane %v1000_v8, %v4690_v2  ;;  %v2461_v31 = vrot.slane %v999_v18, %v4690_v2  ;;  %v2465_v36 = vrot.slane %v1001_v6, %v4690_v2 }
 0x18a   : > { %3682 = vst.msk [vmem:[%s4740_s5 + $0xf6] sm:$0x3] %vm3558_vm1, %v2517_v23  ;;  %3670 = vst.msk [vmem:[%s4740_s5 + $0xde] sm:$0x3] %vm3558_vm1, %v2533_v43  ;;  %v1755_v15 = vcombine.high %v1753_v20, %v1753_v20  ;;  %v1762_v14 = vrot.slane %v1746_v55, %v4684_v62  ;;  %v2453_v23 = vrot.slane %v1002_v25, %v4690_v2 }
 0x18b   : > { %3686 = vst.msk [vmem:[%s4740_s5 + $0xfe] sm:$0x3] %vm3558_vm1, %v2533_v43  ;;  %3919 = vst.msk [vmem:[%s4740_s5 + $0x2d0] sm:$0x3] %vm3558_vm1, %v3017_v34  ;;  %v2469_v9 = vrot.slane %v1003_v22, %v4690_v2  ;;  %v1769_v41 = vrot.slane %v1753_v20, %v4684_v62  ;;  %v1776_v42 = vrot.slane %v1754_v21, %v4684_v62 }
 0x18c   : > { %3935 = vst.msk [vmem:[%s4740_s5 + $0x2f0] sm:$0x3] %vm3558_vm1, %v3017_v34  ;;  %3920 = vst.msk [vmem:[%s4740_s5 + $0x2d2] sm:$0x3] %vm3558_vm1, %v3021_v50  ;;  %v1783_v43 = vrot.slane %v1755_v15, %v4684_v62  ;;  %v1784_v44 = vcombine.high %v1762_v14, %v1762_v14  ;;  %v2953_v16 = vrot.slane %v1762_v14, %v4690_v2 }
 0x18d   : > { %3923 = vst.msk [vmem:[%s4740_s5 + $0x2d8] sm:$0x3] %vm3558_vm1, %v3033_v10  ;;  %3936 = vst.msk [vmem:[%s4740_s5 + $0x2f2] sm:$0x3] %vm3558_vm1, %v3021_v50  ;;  %v656_v33 = vadd.f32 %v5389_v63, %v5399_v52  ;;  %v1785_v48 = vcombine.high %v1769_v41, %v1769_v41  ;;  %v1786_v59 = vcombine.high %v1776_v42, %v1776_v42 }
 0x18e   : > { %3939 = vst.msk [vmem:[%s4740_s5 + $0x2f8] sm:$0x3] %vm3558_vm1, %v3033_v10  ;;  %3921 = vst.msk [vmem:[%s4740_s5 + $0x2d4] sm:$0x3] %vm3558_vm1, %v3025_v54  ;;  %v2957_v53 = vrot.slane %v1776_v42, %v4690_v2  ;;  %v2969_v34 = vrot.slane %v1769_v41, %v4690_v2  ;;  %v1787_v52 = vcombine.high %v1783_v43, %v1783_v43 }
 0x18f   : > { %3924 = vst.msk [vmem:[%s4740_s5 + $0x2da] sm:$0x3] %vm3558_vm1, %v3037_v58  ;;  %3925 = vst.msk [vmem:[%s4740_s5 + $0x2dc] sm:$0x3] %vm3558_vm1, %v3041_v60  ;;  %v2961_v49 = vrot.slane %v1784_v44, %v4690_v2  ;;  %v2973_v50 = vrot.slane %v1783_v43, %v4690_v2  ;;  %v1200_v10 = vcombine.high %v656_v33, %v656_v33 }
 0x190   : > { %3937 = vst.msk [vmem:[%s4740_s5 + $0x2f4] sm:$0x3] %vm3558_vm1, %v3025_v54  ;;  %3940 = vst.msk [vmem:[%s4740_s5 + $0x2fa] sm:$0x3] %vm3558_vm1, %v3037_v58  ;;  %v2965_v39 = vrot.slane %v1786_v59, %v4690_v2  ;;  %v2977_v40 = vrot.slane %v1785_v48, %v4690_v2  ;;  %v1207_v54 = vrot.slane %v656_v33, %v4684_v62 }
 0x191   : > { %3941 = vst.msk [vmem:[%s4740_s5 + $0x2fc] sm:$0x3] %vm3558_vm1, %v3041_v60  ;;  %3922 = vst.msk [vmem:[%s4740_s5 + $0x2d6] sm:$0x3] %vm3558_vm1, %v3029_v46  ;;  %v633_v58 = vmul.f32 %v5395_v57, %v4810_v19  ;;  %v2981_v60 = vrot.slane %v1787_v52, %v4690_v2  ;;  %v615_v45 = vmul.f32 %v5395_v57, %v4838_v27 }
 0x192   : > { %3938 = vst.msk [vmem:[%s4740_s5 + $0x2f6] sm:$0x3] %vm3558_vm1, %v3029_v46  ;;  %3926 = vst.msk [vmem:[%s4740_s5 + $0x2de] sm:$0x3] %vm3558_vm1, %v3045_v0  ;;  %v1214_v46 = vrot.slane %v1200_v10, %v4684_v62  ;;  %v631_v19 = vmul.f32 %v5395_v57, %v4840_v28  ;;  %v1215_v61 = vcombine.high %v1207_v54, %v1207_v54 }
 0x193   : > { %3942 = vst.msk [vmem:[%s4740_s5 + $0x2fe] sm:$0x3] %vm3558_vm1, %v3045_v0  ;;  %3631 = vst.msk [vmem:[%s4740_s5 + $0x90] sm:$0x3] %vm3558_vm1, %v2441_v11  ;;  %v1223_v51 = vrot.slane %v1207_v54, %v4684_v62  ;;  %v672_v0 = vadd.f32 %v5389_v63, %v633_v58  ;;  %v5603_v1 = vmul.f32 %v5395_v57, %v4868_v32 }
 0x194   : > { %3647 = vst.msk [vmem:[%s4740_s5 + $0xb0] sm:$0x3] %vm3558_vm1, %v2441_v11  ;;  %3635 = vst.msk [vmem:[%s4740_s5 + $0x98] sm:$0x3] %vm3558_vm1, %v2457_v17  ;;  %v1216_v27 = vcombine.high %v1214_v46, %v1214_v46  ;;  %v1230_v28 = vrot.slane %v1214_v46, %v4684_v62  ;;  %v654_v3 = vadd.f32 %v5389_v63, %v615_v45 }
 0x195   : > { %3651 = vst.msk [vmem:[%s4740_s5 + $0xb8] sm:$0x3] %vm3558_vm1, %v2457_v17  ;;  %3632 = vst.msk [vmem:[%s4740_s5 + $0x92] sm:$0x3] %vm3558_vm1, %v2445_v29  ;;  %v5612_v55 = vadd.f32 %v5389_v63, %v631_v19  ;;  %v1237_v7 = vrot.slane %v1215_v61, %v4684_v62  ;;  %v1245_v18 = vcombine.high %v1223_v51, %v1223_v51 }
 0x196   : > { %3633 = vst.msk [vmem:[%s4740_s5 + $0x94] sm:$0x3] %vm3558_vm1, %v2449_v30  ;;  %3648 = vst.msk [vmem:[%s4740_s5 + $0xb2] sm:$0x3] %vm3558_vm1, %v2445_v29  ;;  %v2601_v32 = vrot.slane %v1223_v51, %v4690_v2  ;;  %v1984_v8 = vcombine.high %v672_v0, %v672_v0  ;;  %v1244_v11 = vrot.slane %v1216_v27, %v4684_v62 }
 0x197   : > { %3649 = vst.msk [vmem:[%s4740_s5 + $0xb4] sm:$0x3] %vm3558_vm1, %v2449_v30  ;;  %3636 = vst.msk [vmem:[%s4740_s5 + $0x9a] sm:$0x3] %vm3558_vm1, %v2461_v31  ;;  %v1246_v6 = vcombine.high %v1230_v28, %v1230_v28  ;;  %v2617_v17 = vrot.slane %v1230_v28, %v4690_v2  ;;  %v1991_v20 = vrot.slane %v672_v0, %v4684_v62 }
 0x198   : > { %3637 = vst.msk [vmem:[%s4740_s5 + $0x9c] sm:$0x3] %vm3558_vm1, %v2465_v36  ;;  %3652 = vst.msk [vmem:[%s4740_s5 + $0xba] sm:$0x3] %vm3558_vm1, %v2461_v31  ;;  %v1247_v21 = vcombine.high %v1237_v7, %v1237_v7  ;;  %v2605_v25 = vrot.slane %v1237_v7, %v4690_v2  ;;  %v2609_v22 = vrot.slane %v1245_v18, %v4690_v2 }
 0x199   : > { %3653 = vst.msk [vmem:[%s4740_s5 + $0xbc] sm:$0x3] %vm3558_vm1, %v2465_v36  ;;  %3634 = vst.msk [vmem:[%s4740_s5 + $0x96] sm:$0x3] %vm3558_vm1, %v2453_v23  ;;  %v1998_v29 = vrot.slane %v1984_v8, %v4684_v62  ;;  %v1248_v30 = vcombine.high %v1244_v11, %v1244_v11  ;;  %v2621_v31 = vrot.slane %v1244_v11, %v4690_v2 }
 0x19a   : > { %3638 = vst.msk [vmem:[%s4740_s5 + $0x9e] sm:$0x3] %vm3558_vm1, %v2469_v9  ;;  %3650 = vst.msk [vmem:[%s4740_s5 + $0xb6] sm:$0x3] %vm3558_vm1, %v2453_v23  ;;  %v2625_v36 = vrot.slane %v1246_v6, %v4690_v2  ;;  %v1999_v15 = vcombine.high %v1991_v20, %v1991_v20  ;;  %v2613_v14 = vrot.slane %v1247_v21, %v4690_v2 }
 0x19b   : > { %3654 = vst.msk [vmem:[%s4740_s5 + $0xbe] sm:$0x3] %vm3558_vm1, %v2469_v9  ;;  %3887 = vst.msk [vmem:[%s4740_s5 + $0x290] sm:$0x3] %vm3558_vm1, %v2953_v16  ;;  %v2000_v23 = vcombine.high %v1998_v29, %v1998_v29  ;;  %v2007_v9 = vrot.slane %v1991_v20, %v4684_v62  ;;  %v2014_v41 = vrot.slane %v1998_v29, %v4684_v62 }
 0x19c   : > { %3903 = vst.msk [vmem:[%s4740_s5 + $0x2b0] sm:$0x3] %vm3558_vm1, %v2953_v16  ;;  %3888 = vst.msk [vmem:[%s4740_s5 + $0x292] sm:$0x3] %vm3558_vm1, %v2957_v53  ;;  %v2629_v42 = vrot.slane %v1248_v30, %v4690_v2  ;;  %v2021_v43 = vrot.slane %v1999_v15, %v4684_v62  ;;  %v1102_v44 = vcombine.high %v654_v3, %v654_v3 }
 0x19d   : > { %3891 = vst.msk [vmem:[%s4740_s5 + $0x298] sm:$0x3] %vm3558_vm1, %v2969_v34  ;;  %3904 = vst.msk [vmem:[%s4740_s5 + $0x2b2] sm:$0x3] %vm3558_vm1, %v2957_v53  ;;  %v1109_v16 = vrot.slane %v654_v3, %v4684_v62  ;;  %v2028_v33 = vrot.slane %v2000_v23, %v4684_v62  ;;  %v2029_v48 = vcombine.high %v2007_v9, %v2007_v9 }
 0x19e   : > { %3907 = vst.msk [vmem:[%s4740_s5 + $0x2b8] sm:$0x3] %vm3558_vm1, %v2969_v34  ;;  %3889 = vst.msk [vmem:[%s4740_s5 + $0x294] sm:$0x3] %vm3558_vm1, %v2961_v49  ;;  %v2030_v59 = vcombine.high %v2014_v41, %v2014_v41  ;;  %v3113_v53 = vrot.slane %v2007_v9, %v4690_v2  ;;  %v2031_v34 = vcombine.high %v2021_v43, %v2021_v43 }
 0x19f   : > { %3892 = vst.msk [vmem:[%s4740_s5 + $0x29a] sm:$0x3] %vm3558_vm1, %v2973_v50  ;;  %3905 = vst.msk [vmem:[%s4740_s5 + $0x2b4] sm:$0x3] %vm3558_vm1, %v2961_v49  ;;  %v3117_v52 = vrot.slane %v2021_v43, %v4690_v2  ;;  %v3129_v49 = vrot.slane %v2014_v41, %v4690_v2  ;;  %v2032_v10 = vcombine.high %v2028_v33, %v2028_v33 }
 0x1a0   : > { %3908 = vst.msk [vmem:[%s4740_s5 + $0x2ba] sm:$0x3] %vm3558_vm1, %v2973_v50  ;;  %3890 = vst.msk [vmem:[%s4740_s5 + $0x296] sm:$0x3] %vm3558_vm1, %v2965_v39  ;;  %v1116_v50 = vrot.slane %v1102_v44, %v4684_v62  ;;  %v3137_v54 = vrot.slane %v2030_v59, %v4690_v2  ;;  %v3125_v58 = vrot.slane %v2031_v34, %v4690_v2 }
 0x1a1   : > { %3893 = vst.msk [vmem:[%s4740_s5 + $0x29c] sm:$0x3] %vm3558_vm1, %v2977_v40  ;;  %3906 = vst.msk [vmem:[%s4740_s5 + $0x2b6] sm:$0x3] %vm3558_vm1, %v2965_v39  ;;  %v3121_v39 = vrot.slane %v2029_v48, %v4690_v2  ;;  %v1125_v45 = vrot.slane %v1109_v16, %v4684_v62  ;;  %v3141_v19 = vrot.slane %v2032_v10, %v4690_v2 }
 0x1a2   : > { %3909 = vst.msk [vmem:[%s4740_s5 + $0x2bc] sm:$0x3] %vm3558_vm1, %v2977_v40  ;;  %3894 = vst.msk [vmem:[%s4740_s5 + $0x29e] sm:$0x3] %vm3558_vm1, %v2981_v60  ;;  %v3133_v40 = vrot.slane %v2028_v33, %v4690_v2  ;;  %v1118_v46 = vcombine.high %v1116_v50, %v1116_v50  ;;  %v1132_v61 = vrot.slane %v1116_v50, %v4684_v62 }
 0x1a3   : > { %3910 = vst.msk [vmem:[%s4740_s5 + $0x2be] sm:$0x3] %vm3558_vm1, %v2981_v60  ;;  %3719 = vst.msk [vmem:[%s4740_s5 + $0x140] sm:$0x3] %vm3558_vm1, %v2601_v32  ;;  %v1117_v60 = vcombine.high %v1109_v16, %v1109_v16  ;;  %v1886_v51 = vcombine.high %v5612_v55, %v5612_v55  ;;  %v1893_v0 = vrot.slane %v5612_v55, %v4684_v62 }
 0x1a4   : > { %3735 = vst.msk [vmem:[%s4740_s5 + $0x160] sm:$0x3] %vm3558_vm1, %v2601_v32  ;;  %3723 = vst.msk [vmem:[%s4740_s5 + $0x148] sm:$0x3] %vm3558_vm1, %v2617_v17  ;;  %v1146_v28 = vrot.slane %v1118_v46, %v4684_v62  ;;  %v1147_v3 = vcombine.high %v1125_v45, %v1125_v45  ;;  %v2537_v7 = vrot.slane %v1125_v45, %v4690_v2 }
 0x1a5   : > { %3739 = vst.msk [vmem:[%s4740_s5 + $0x168] sm:$0x3] %vm3558_vm1, %v2617_v17  ;;  %3720 = vst.msk [vmem:[%s4740_s5 + $0x142] sm:$0x3] %vm3558_vm1, %v2605_v25  ;;  %v1139_v27 = vrot.slane %v1117_v60, %v4684_v62  ;;  %v1148_v55 = vcombine.high %v1132_v61, %v1132_v61  ;;  %v2553_v18 = vrot.slane %v1132_v61, %v4690_v2 }
 0x1a6   : > { %3721 = vst.msk [vmem:[%s4740_s5 + $0x144] sm:$0x3] %vm3558_vm1, %v2609_v22  ;;  %3736 = vst.msk [vmem:[%s4740_s5 + $0x162] sm:$0x3] %vm3558_vm1, %v2605_v25  ;;  %v1900_v32 = vrot.slane %v1886_v51, %v4684_v62  ;;  %v1901_v8 = vcombine.high %v1893_v0, %v1893_v0  ;;  %v1150_v6 = vcombine.high %v1146_v28, %v1146_v28 }
 0x1a7   : > { %3737 = vst.msk [vmem:[%s4740_s5 + $0x164] sm:$0x3] %vm3558_vm1, %v2609_v22  ;;  %3724 = vst.msk [vmem:[%s4740_s5 + $0x14a] sm:$0x3] %vm3558_vm1, %v2621_v31  ;;  %v1149_v11 = vcombine.high %v1139_v27, %v1139_v27  ;;  %v2541_v17 = vrot.slane %v1139_v27, %v4690_v2  ;;  %v2545_v20 = vrot.slane %v1147_v3, %v4690_v2 }
 0x1a8   : > { %3725 = vst.msk [vmem:[%s4740_s5 + $0x14c] sm:$0x3] %vm3558_vm1, %v2625_v36  ;;  %3740 = vst.msk [vmem:[%s4740_s5 + $0x16a] sm:$0x3] %vm3558_vm1, %v2621_v31  ;;  %v2557_v21 = vrot.slane %v1146_v28, %v4690_v2  ;;  %v2561_v25 = vrot.slane %v1148_v55, %v4690_v2  ;;  %v1902_v22 = vcombine.high %v1900_v32, %v1900_v32 }
 0x1a9   : > { %3741 = vst.msk [vmem:[%s4740_s5 + $0x16c] sm:$0x3] %vm3558_vm1, %v2625_v36  ;;  %3722 = vst.msk [vmem:[%s4740_s5 + $0x146] sm:$0x3] %vm3558_vm1, %v2613_v14  ;;  %v1909_v29 = vrot.slane %v1893_v0, %v4684_v62  ;;  %v2549_v30 = vrot.slane %v1149_v11, %v4690_v2  ;;  %v2565_v31 = vrot.slane %v1150_v6, %v4690_v2 }
 0x1aa   : > { %3738 = vst.msk [vmem:[%s4740_s5 + $0x166] sm:$0x3] %vm3558_vm1, %v2613_v14  ;;  %3726 = vst.msk [vmem:[%s4740_s5 + $0x14e] sm:$0x3] %vm3558_vm1, %v2629_v42  ;;  %v1916_v36 = vrot.slane %v1900_v32, %v4684_v62  ;;  %v1923_v15 = vrot.slane %v1901_v8, %v4684_v62  ;;  %v1930_v14 = vrot.slane %v1902_v22, %v4684_v62 }
 0x1ab   : > { %3742 = vst.msk [vmem:[%s4740_s5 + $0x16e] sm:$0x3] %vm3558_vm1, %v2629_v42  ;;  %3975 = vst.msk [vmem:[%s4740_s5 + $0x340] sm:$0x3] %vm3558_vm1, %v3113_v53  ;;  %v1931_v23 = vcombine.high %v1909_v29, %v1909_v29  ;;  %v3049_v9 = vrot.slane %v1909_v29, %v4690_v2  ;;  %v657_v41 = vadd.f32 %v5389_v63, %v5603_v1 }
 0x1ac   : > { %3991 = vst.msk [vmem:[%s4740_s5 + $0x360] sm:$0x3] %vm3558_vm1, %v3113_v53  ;;  %3976 = vst.msk [vmem:[%s4740_s5 + $0x342] sm:$0x3] %vm3558_vm1, %v3117_v52  ;;  %v1932_v42 = vcombine.high %v1916_v36, %v1916_v36  ;;  %v1933_v43 = vcombine.high %v1923_v15, %v1923_v15  ;;  %v3053_v44 = vrot.slane %v1923_v15, %v4690_v2 }
 0x1ad   : > { %3979 = vst.msk [vmem:[%s4740_s5 + $0x348] sm:$0x3] %vm3558_vm1, %v3129_v49  ;;  %3992 = vst.msk [vmem:[%s4740_s5 + $0x362] sm:$0x3] %vm3558_vm1, %v3117_v52  ;;  %v3065_v16 = vrot.slane %v1916_v36, %v4690_v2  ;;  %v1934_v1 = vcombine.high %v1930_v14, %v1930_v14  ;;  %v3057_v33 = vrot.slane %v1931_v23, %v4690_v2 }
 0x1ae   : > { %3995 = vst.msk [vmem:[%s4740_s5 + $0x368] sm:$0x3] %vm3558_vm1, %v3129_v49  ;;  %3977 = vst.msk [vmem:[%s4740_s5 + $0x344] sm:$0x3] %vm3558_vm1, %v3121_v39  ;;  %v3069_v48 = vrot.slane %v1930_v14, %v4690_v2  ;;  %v1249_v59 = vcombine.high %v657_v41, %v657_v41  ;;  %v3061_v53 = vrot.slane %v1933_v43, %v4690_v2 }
 0x1af   : > { %3980 = vst.msk [vmem:[%s4740_s5 + $0x34a] sm:$0x3] %vm3558_vm1, %v3133_v40  ;;  %3981 = vst.msk [vmem:[%s4740_s5 + $0x34c] sm:$0x3] %vm3558_vm1, %v3137_v54  ;;  %v3073_v34 = vrot.slane %v1932_v42, %v4690_v2  ;;  %v1256_v52 = vrot.slane %v657_v41, %v4684_v62  ;;  %v634_v49 = vmul.f32 %v5395_v57, %v4870_v35 }
 0x1b0   : > { %3993 = vst.msk [vmem:[%s4740_s5 + $0x364] sm:$0x3] %vm3558_vm1, %v3121_v39  ;;  %3996 = vst.msk [vmem:[%s4740_s5 + $0x36a] sm:$0x3] %vm3558_vm1, %v3133_v40  ;;  %v3077_v50 = vrot.slane %v1934_v1, %v4690_v2  ;;  %v1263_v10 = vrot.slane %v1249_v59, %v4684_v62  ;;  %v616_v39 = vmul.f32 %v5395_v57, %v4873_v38 }
 0x1b1   : > { %3997 = vst.msk [vmem:[%s4740_s5 + $0x36c] sm:$0x3] %vm3558_vm1, %v3137_v54  ;;  %3978 = vst.msk [vmem:[%s4740_s5 + $0x346] sm:$0x3] %vm3558_vm1, %v3125_v58  ;;  %v632_v35 = vmul.f32 %v5395_v57, %v4875_v24  ;;  %v1264_v40 = vcombine.high %v1256_v52, %v1256_v52  ;;  %v1272_v54 = vrot.slane %v1256_v52, %v4684_v62 }
 0x1b2   : > { %3994 = vst.msk [vmem:[%s4740_s5 + $0x366] sm:$0x3] %vm3558_vm1, %v3125_v58  ;;  %3982 = vst.msk [vmem:[%s4740_s5 + $0x34e] sm:$0x3] %vm3558_vm1, %v3141_v19  ;;  %v673_v58 = vadd.f32 %v5389_v63, %v634_v49  ;;  %v5807_v60 = vmul.f32 %v5395_v57, %v4918_v4  ;;  %v1265_v38 = vcombine.high %v1263_v10, %v1263_v10 }
 0x1b3   : > { %3998 = vst.msk [vmem:[%s4740_s5 + $0x36e] sm:$0x3] %vm3558_vm1, %v3141_v19  ;;  %3687 = vst.msk [vmem:[%s4740_s5 + $0x100] sm:$0x3] %vm3558_vm1, %v2537_v7  ;;  %v1279_v24 = vrot.slane %v1263_v10, %v4684_v62  ;;  %v655_v46 = vadd.f32 %v5389_v63, %v616_v39  ;;  %v5816_v45 = vadd.f32 %v5389_v63, %v632_v35 }
 0x1b4   : > { %3703 = vst.msk [vmem:[%s4740_s5 + $0x120] sm:$0x3] %vm3558_vm1, %v2537_v7  ;;  %3691 = vst.msk [vmem:[%s4740_s5 + $0x108] sm:$0x3] %vm3558_vm1, %v2553_v18  ;;  %v1286_v19 = vrot.slane %v1264_v40, %v4684_v62  ;;  %v1294_v61 = vcombine.high %v1272_v54, %v1272_v54  ;;  %v2633_v4 = vrot.slane %v1272_v54, %v4690_v2 }
 0x1b5   : > { %3707 = vst.msk [vmem:[%s4740_s5 + $0x128] sm:$0x3] %vm3558_vm1, %v2553_v18  ;;  %3688 = vst.msk [vmem:[%s4740_s5 + $0x102] sm:$0x3] %vm3558_vm1, %v2541_v17  ;;  %v2033_v51 = vcombine.high %v673_v58, %v673_v58  ;;  %v1293_v0 = vrot.slane %v1265_v38, %v4684_v62  ;;  %v1295_v27 = vcombine.high %v1279_v24, %v1279_v24 }
 0x1b6   : > { %3689 = vst.msk [vmem:[%s4740_s5 + $0x104] sm:$0x3] %vm3558_vm1, %v2545_v20  ;;  %3704 = vst.msk [vmem:[%s4740_s5 + $0x122] sm:$0x3] %vm3558_vm1, %v2541_v17  ;;  %v2649_v28 = vrot.slane %v1279_v24, %v4690_v2  ;;  %v2040_v3 = vrot.slane %v673_v58, %v4684_v62  ;;  %v1296_v7 = vcombine.high %v1286_v19, %v1286_v19 }
 0x1b7   : > { %3705 = vst.msk [vmem:[%s4740_s5 + $0x124] sm:$0x3] %vm3558_vm1, %v2545_v20  ;;  %3692 = vst.msk [vmem:[%s4740_s5 + $0x10a] sm:$0x3] %vm3558_vm1, %v2557_v21  ;;  %v2637_v55 = vrot.slane %v1286_v19, %v4690_v2  ;;  %v2641_v18 = vrot.slane %v1294_v61, %v4690_v2  ;;  %v2047_v32 = vrot.slane %v2033_v51, %v4684_v62 }
 0x1b8   : > { %3693 = vst.msk [vmem:[%s4740_s5 + $0x10c] sm:$0x3] %vm3558_vm1, %v2561_v25  ;;  %3708 = vst.msk [vmem:[%s4740_s5 + $0x12a] sm:$0x3] %vm3558_vm1, %v2557_v21  ;;  %v1297_v8 = vcombine.high %v1293_v0, %v1293_v0  ;;  %v2653_v11 = vrot.slane %v1293_v0, %v4690_v2  ;;  %v2657_v6 = vrot.slane %v1295_v27, %v4690_v2 }
 0x1b9   : > { %3709 = vst.msk [vmem:[%s4740_s5 + $0x12c] sm:$0x3] %vm3558_vm1, %v2561_v25  ;;  %3690 = vst.msk [vmem:[%s4740_s5 + $0x106] sm:$0x3] %vm3558_vm1, %v2549_v30  ;;  %v2048_v17 = vcombine.high %v2040_v3, %v2040_v3  ;;  %v2645_v20 = vrot.slane %v1296_v7, %v4690_v2  ;;  %v2049_v21 = vcombine.high %v2047_v32, %v2047_v32 }
 0x1ba   : > { %3694 = vst.msk [vmem:[%s4740_s5 + $0x10e] sm:$0x3] %vm3558_vm1, %v2565_v31  ;;  %3706 = vst.msk [vmem:[%s4740_s5 + $0x126] sm:$0x3] %vm3558_vm1, %v2549_v30  ;;  %v2056_v25 = vrot.slane %v2040_v3, %v4684_v62  ;;  %v2063_v22 = vrot.slane %v2047_v32, %v4684_v62  ;;  %v2661_v29 = vrot.slane %v1297_v8, %v4690_v2 }
 0x1bb   : > { %3710 = vst.msk [vmem:[%s4740_s5 + $0x12e] sm:$0x3] %vm3558_vm1, %v2565_v31  ;;  %3943 = vst.msk [vmem:[%s4740_s5 + $0x300] sm:$0x3] %vm3558_vm1, %v3049_v9  ;;  %v2070_v30 = vrot.slane %v2048_v17, %v4684_v62  ;;  %v1151_v31 = vcombine.high %v655_v46, %v655_v46  ;;  %v1158_v36 = vrot.slane %v655_v46, %v4684_v62 }
 0x1bc   : > { %3959 = vst.msk [vmem:[%s4740_s5 + $0x320] sm:$0x3] %vm3558_vm1, %v3049_v9  ;;  %3944 = vst.msk [vmem:[%s4740_s5 + $0x302] sm:$0x3] %vm3558_vm1, %v3053_v44  ;;  %v2077_v15 = vrot.slane %v2049_v21, %v4684_v62  ;;  %v2078_v14 = vcombine.high %v2056_v25, %v2056_v25  ;;  %v2079_v23 = vcombine.high %v2063_v22, %v2063_v22 }
 0x1bd   : > { %3947 = vst.msk [vmem:[%s4740_s5 + $0x308] sm:$0x3] %vm3558_vm1, %v3065_v16  ;;  %3960 = vst.msk [vmem:[%s4740_s5 + $0x322] sm:$0x3] %vm3558_vm1, %v3053_v44  ;;  %v3145_v9 = vrot.slane %v2056_v25, %v4690_v2  ;;  %v2080_v41 = vcombine.high %v2070_v30, %v2070_v30  ;;  %v3149_v42 = vrot.slane %v2070_v30, %v4690_v2 }
 0x1be   : > { %3963 = vst.msk [vmem:[%s4740_s5 + $0x328] sm:$0x3] %vm3558_vm1, %v3065_v16  ;;  %3945 = vst.msk [vmem:[%s4740_s5 + $0x304] sm:$0x3] %vm3558_vm1, %v3057_v33  ;;  %v3161_v43 = vrot.slane %v2063_v22, %v4690_v2  ;;  %v1165_v44 = vrot.slane %v1151_v31, %v4684_v62  ;;  %v2081_v16 = vcombine.high %v2077_v15, %v2077_v15 }
 0x1bf   : > { %3948 = vst.msk [vmem:[%s4740_s5 + $0x30a] sm:$0x3] %vm3558_vm1, %v3069_v48  ;;  %3961 = vst.msk [vmem:[%s4740_s5 + $0x324] sm:$0x3] %vm3558_vm1, %v3057_v33  ;;  %v3153_v1 = vrot.slane %v2078_v14, %v4690_v2  ;;  %v3165_v33 = vrot.slane %v2077_v15, %v4690_v2  ;;  %v3157_v59 = vrot.slane %v2080_v41, %v4690_v2 }
 0x1c0   : > { %3964 = vst.msk [vmem:[%s4740_s5 + $0x32a] sm:$0x3] %vm3558_vm1, %v3069_v48  ;;  %3946 = vst.msk [vmem:[%s4740_s5 + $0x306] sm:$0x3] %vm3558_vm1, %v3061_v53  ;;  %v3169_v48 = vrot.slane %v2079_v23, %v4690_v2  ;;  %v1174_v52 = vrot.slane %v1158_v36, %v4684_v62  ;;  %v3173_v49 = vrot.slane %v2081_v16, %v4690_v2 }
 0x1c1   : > { %3949 = vst.msk [vmem:[%s4740_s5 + $0x30c] sm:$0x3] %vm3558_vm1, %v3073_v34  ;;  %3962 = vst.msk [vmem:[%s4740_s5 + $0x326] sm:$0x3] %vm3558_vm1, %v3061_v53  ;;  %v1166_v53 = vcombine.high %v1158_v36, %v1158_v36  ;;  %v1935_v10 = vcombine.high %v5816_v45, %v5816_v45  ;;  %v1942_v39 = vrot.slane %v5816_v45, %v4684_v62 }
 0x1c2   : > { %3965 = vst.msk [vmem:[%s4740_s5 + $0x32c] sm:$0x3] %vm3558_vm1, %v3073_v34  ;;  %3950 = vst.msk [vmem:[%s4740_s5 + $0x30e] sm:$0x3] %vm3558_vm1, %v3077_v50  ;;  %v1167_v34 = vcombine.high %v1165_v44, %v1165_v44  ;;  %v1196_v54 = vcombine.high %v1174_v52, %v1174_v52  ;;  %v2569_v58 = vrot.slane %v1174_v52, %v4690_v2 }
 0x1c3   : > { %3966 = vst.msk [vmem:[%s4740_s5 + $0x32e] sm:$0x3] %vm3558_vm1, %v3077_v50  ;;  %3727 = vst.msk [vmem:[%s4740_s5 + $0x150] sm:$0x3] %vm3558_vm1, %v2633_v4  ;;  %v1181_v50 = vrot.slane %v1165_v44, %v4684_v62  ;;  %v1188_v35 = vrot.slane %v1166_v53, %v4684_v62  ;;  %v1949_v46 = vrot.slane %v1935_v10, %v4684_v62 }
 0x1c4   : > { %3743 = vst.msk [vmem:[%s4740_s5 + $0x170] sm:$0x3] %vm3558_vm1, %v2633_v4  ;;  %3731 = vst.msk [vmem:[%s4740_s5 + $0x158] sm:$0x3] %vm3558_vm1, %v2649_v28  ;;  %v1195_v40 = vrot.slane %v1167_v34, %v4684_v62  ;;  %v1950_v45 = vcombine.high %v1942_v39, %v1942_v39  ;;  %v2577_v51 = vrot.slane %v1196_v54, %v4690_v2 }
 0x1c5   : > { %3747 = vst.msk [vmem:[%s4740_s5 + $0x178] sm:$0x3] %vm3558_vm1, %v2649_v28  ;;  %3728 = vst.msk [vmem:[%s4740_s5 + $0x152] sm:$0x3] %vm3558_vm1, %v2637_v55  ;;  %v1197_v38 = vcombine.high %v1181_v50, %v1181_v50  ;;  %v2585_v24 = vrot.slane %v1181_v50, %v4690_v2  ;;  %v1198_v19 = vcombine.high %v1188_v35, %v1188_v35 }
 0x1c6   : > { %3729 = vst.msk [vmem:[%s4740_s5 + $0x154] sm:$0x3] %vm3558_vm1, %v2641_v18  ;;  %3744 = vst.msk [vmem:[%s4740_s5 + $0x172] sm:$0x3] %vm3558_vm1, %v2637_v55  ;;  %v1199_v61 = vcombine.high %v1195_v40, %v1195_v40  ;;  %v2573_v4 = vrot.slane %v1188_v35, %v4690_v2  ;;  %v2589_v0 = vrot.slane %v1195_v40, %v4690_v2 }
 0x1c7   : > { %3745 = vst.msk [vmem:[%s4740_s5 + $0x174] sm:$0x3] %vm3558_vm1, %v2641_v18  ;;  %3732 = vst.msk [vmem:[%s4740_s5 + $0x15a] sm:$0x3] %vm3558_vm1, %v2653_v11  ;;  %v2593_v27 = vrot.slane %v1197_v38, %v4690_v2  ;;  %v1951_v28 = vcombine.high %v1949_v46, %v1949_v46  ;;  %v1958_v3 = vrot.slane %v1942_v39, %v4684_v62 }
 0x1c8   : > { %3733 = vst.msk [vmem:[%s4740_s5 + $0x15c] sm:$0x3] %vm3558_vm1, %v2657_v6  ;;  %3748 = vst.msk [vmem:[%s4740_s5 + $0x17a] sm:$0x3] %vm3558_vm1, %v2653_v11  ;;  %v2581_v7 = vrot.slane %v1198_v19, %v4690_v2  ;;  %v2597_v55 = vrot.slane %v1199_v61, %v4690_v2  ;;  %v1965_v18 = vrot.slane %v1949_v46, %v4684_v62 }
 0x1c9   : > { %3749 = vst.msk [vmem:[%s4740_s5 + $0x17c] sm:$0x3] %vm3558_vm1, %v2657_v6  ;;  %3730 = vst.msk [vmem:[%s4740_s5 + $0x156] sm:$0x3] %vm3558_vm1, %v2645_v20  ;;  %v1972_v32 = vrot.slane %v1950_v45, %v4684_v62  ;;  %v1979_v8 = vrot.slane %v1951_v28, %v4684_v62  ;;  %v1980_v11 = vcombine.high %v1958_v3, %v1958_v3 }
 0x1ca   : > { %3746 = vst.msk [vmem:[%s4740_s5 + $0x176] sm:$0x3] %vm3558_vm1, %v2645_v20  ;;  %3734 = vst.msk [vmem:[%s4740_s5 + $0x15e] sm:$0x3] %vm3558_vm1, %v2661_v29  ;;  %v3081_v6 = vrot.slane %v1958_v3, %v4690_v2  ;;  %v660_v17 = vadd.f32 %v5389_v63, %v5807_v60  ;;  %v1981_v20 = vcombine.high %v1965_v18, %v1965_v18 }
 0x1cb   : > { %3750 = vst.msk [vmem:[%s4740_s5 + $0x17e] sm:$0x3] %vm3558_vm1, %v2661_v29  ;;  %3983 = vst.msk [vmem:[%s4740_s5 + $0x350] sm:$0x3] %vm3558_vm1, %v3145_v9  ;;  %v1982_v21 = vcombine.high %v1972_v32, %v1972_v32  ;;  %v3085_v25 = vrot.slane %v1972_v32, %v4690_v2  ;;  %v3097_v22 = vrot.slane %v1965_v18, %v4690_v2 }
 0x1cc   : > { %3999 = vst.msk [vmem:[%s4740_s5 + $0x370] sm:$0x3] %vm3558_vm1, %v3145_v9  ;;  %3984 = vst.msk [vmem:[%s4740_s5 + $0x352] sm:$0x3] %vm3558_vm1, %v3149_v42  ;;  %v1983_v60 = vcombine.high %v1979_v8, %v1979_v8  ;;  %v3089_v29 = vrot.slane %v1980_v11, %v4690_v2  ;;  %v3101_v30 = vrot.slane %v1979_v8, %v4690_v2 }
 0x1cd   : > { %3987 = vst.msk [vmem:[%s4740_s5 + $0x358] sm:$0x3] %vm3558_vm1, %v3161_v43  ;;  %4000 = vst.msk [vmem:[%s4740_s5 + $0x372] sm:$0x3] %vm3558_vm1, %v3149_v42  ;;  %v1396_v31 = vcombine.high %v660_v17, %v660_v17  ;;  %v3093_v36 = vrot.slane %v1982_v21, %v4690_v2  ;;  %v3105_v15 = vrot.slane %v1981_v20, %v4690_v2 }
 0x1ce   : > { %4003 = vst.msk [vmem:[%s4740_s5 + $0x378] sm:$0x3] %vm3558_vm1, %v3161_v43  ;;  %3985 = vst.msk [vmem:[%s4740_s5 + $0x354] sm:$0x3] %vm3558_vm1, %v3153_v1  ;;  %v1403_v14 = vrot.slane %v660_v17, %v4684_v62  ;;  %v637_v23 = vmul.f32 %v5395_v57, %v4920_v5  ;;  %v3109_v9 = vrot.slane %v1983_v60, %v4690_v2 }
 0x1cf   : > { %3988 = vst.msk [vmem:[%s4740_s5 + $0x35a] sm:$0x3] %vm3558_vm1, %v3165_v33  ;;  %3989 = vst.msk [vmem:[%s4740_s5 + $0x35c] sm:$0x3] %vm3558_vm1, %v3169_v48  ;;  %v1410_v41 = vrot.slane %v1396_v31, %v4684_v62  ;;  %v619_v42 = vmul.f32 %v5395_v57, %v4934_v12  ;;  %v635_v5 = vmul.f32 %v5395_v57, %v4936_v13 }
 0x1d0   : > { %4001 = vst.msk [vmem:[%s4740_s5 + $0x374] sm:$0x3] %vm3558_vm1, %v3153_v1  ;;  %4004 = vst.msk [vmem:[%s4740_s5 + $0x37a] sm:$0x3] %vm3558_vm1, %v3165_v33  ;;  %v1411_v43 = vcombine.high %v1403_v14, %v1403_v14  ;;  %v1419_v44 = vrot.slane %v1403_v14, %v4684_v62  ;;  %v676_v16 = vadd.f32 %v5389_v63, %v637_v23 }
 0x1d1   : > { %4005 = vst.msk [vmem:[%s4740_s5 + $0x37c] sm:$0x3] %vm3558_vm1, %v3169_v48  ;;  %3986 = vst.msk [vmem:[%s4740_s5 + $0x356] sm:$0x3] %vm3558_vm1, %v3157_v59  ;;  %v6011_v1 = vmul.f32 %v5395_v57, %v4946_v26  ;;  %v1412_v12 = vcombine.high %v1410_v41, %v1410_v41  ;;  %v1426_v13 = vrot.slane %v1410_v41, %v4684_v62 }
 0x1d2   : > { %4002 = vst.msk [vmem:[%s4740_s5 + $0x376] sm:$0x3] %vm3558_vm1, %v3157_v59  ;;  %3990 = vst.msk [vmem:[%s4740_s5 + $0x35e] sm:$0x3] %vm3558_vm1, %v3173_v49  ;;  %v658_v33 = vadd.f32 %v5389_v63, %v619_v42  ;;  %v6020_v48 = vadd.f32 %v5389_v63, %v635_v5  ;;  %v1433_v59 = vrot.slane %v1411_v43, %v4684_v62 }
 0x1d3   : > { %4006 = vst.msk [vmem:[%s4740_s5 + $0x37e] sm:$0x3] %vm3558_vm1, %v3173_v49  ;;  %3695 = vst.msk [vmem:[%s4740_s5 + $0x110] sm:$0x3] %vm3558_vm1, %v2569_v58  ;;  %v1441_v53 = vcombine.high %v1419_v44, %v1419_v44  ;;  %v2729_v26 = vrot.slane %v1419_v44, %v4690_v2  ;;  %v2180_v57 = vcombine.high %v676_v16, %v676_v16 }
 0x1d4   : > { %3711 = vst.msk [vmem:[%s4740_s5 + $0x130] sm:$0x3] %vm3558_vm1, %v2569_v58  ;;  %3699 = vst.msk [vmem:[%s4740_s5 + $0x118] sm:$0x3] %vm3558_vm1, %v2585_v24  ;;  %v1440_v34 = vrot.slane %v1412_v12, %v4684_v62  ;;  %v1442_v52 = vcombine.high %v1426_v13, %v1426_v13  ;;  %v2745_v49 = vrot.slane %v1426_v13, %v4690_v2 }
 0x1d5   : > { %3715 = vst.msk [vmem:[%s4740_s5 + $0x138] sm:$0x3] %vm3558_vm1, %v2585_v24  ;;  %3696 = vst.msk [vmem:[%s4740_s5 + $0x112] sm:$0x3] %vm3558_vm1, %v2573_v4  ;;  %v2187_v50 = vrot.slane %v676_v16, %v4684_v62  ;;  %v1443_v63 = vcombine.high %v1433_v59, %v1433_v59  ;;  %v2733_v10 = vrot.slane %v1433_v59, %v4690_v2 }
 0x1d6   : > { %3697 = vst.msk [vmem:[%s4740_s5 + $0x114] sm:$0x3] %vm3558_vm1, %v2577_v51  ;;  %3712 = vst.msk [vmem:[%s4740_s5 + $0x132] sm:$0x3] %vm3558_vm1, %v2573_v4  ;;  %v2737_v39 = vrot.slane %v1441_v53, %v4690_v2  ;;  %v2194_v35 = vrot.slane %v2180_v57, %v4684_v62  ;;  %v1444_v40 = vcombine.high %v1440_v34, %v1440_v34 }
 0x1d7   : > { %3713 = vst.msk [vmem:[%s4740_s5 + $0x134] sm:$0x3] %vm3558_vm1, %v2577_v51  ;;  %3700 = vst.msk [vmem:[%s4740_s5 + $0x11a] sm:$0x3] %vm3558_vm1, %v2589_v0  ;;  %v2749_v54 = vrot.slane %v1440_v34, %v4690_v2  ;;  %v2753_v58 = vrot.slane %v1442_v52, %v4690_v2  ;;  %v2195_v38 = vcombine.high %v2187_v50, %v2187_v50 }
 0x1d8   : > { %3701 = vst.msk [vmem:[%s4740_s5 + $0x11c] sm:$0x3] %vm3558_vm1, %v2593_v27  ;;  %3716 = vst.msk [vmem:[%s4740_s5 + $0x13a] sm:$0x3] %vm3558_vm1, %v2589_v0  ;;  %v2741_v24 = vrot.slane %v1443_v63, %v4690_v2  ;;  %v2196_v46 = vcombine.high %v2194_v35, %v2194_v35  ;;  %v2203_v45 = vrot.slane %v2187_v50, %v4684_v62 }
 0x1d9   : > { %3717 = vst.msk [vmem:[%s4740_s5 + $0x13c] sm:$0x3] %vm3558_vm1, %v2593_v27  ;;  %3698 = vst.msk [vmem:[%s4740_s5 + $0x116] sm:$0x3] %vm3558_vm1, %v2581_v7  ;;  %v2210_v19 = vrot.slane %v2194_v35, %v4684_v62  ;;  %v2757_v61 = vrot.slane %v1444_v40, %v4690_v2  ;;  %v2217_v4 = vrot.slane %v2195_v38, %v4684_v62 }
 0x1da   : > { %3702 = vst.msk [vmem:[%s4740_s5 + $0x11e] sm:$0x3] %vm3558_vm1, %v2597_v55  ;;  %3714 = vst.msk [vmem:[%s4740_s5 + $0x136] sm:$0x3] %vm3558_vm1, %v2581_v7  ;;  %v1298_v51 = vcombine.high %v658_v33, %v658_v33  ;;  %v1305_v0 = vrot.slane %v658_v33, %v4684_v62  ;;  %v2224_v27 = vrot.slane %v2196_v46, %v4684_v62 }
 0x1db   : > { %3718 = vst.msk [vmem:[%s4740_s5 + $0x13e] sm:$0x3] %vm3558_vm1, %v2597_v55  ;;  %3951 = vst.msk [vmem:[%s4740_s5 + $0x310] sm:$0x3] %vm3558_vm1, %v3081_v6  ;;  %v2225_v28 = vcombine.high %v2203_v45, %v2203_v45  ;;  %v2226_v3 = vcombine.high %v2210_v19, %v2210_v19  ;;  %v3241_v7 = vrot.slane %v2203_v45, %v4690_v2 }
 0x1dc   : > { %3967 = vst.msk [vmem:[%s4740_s5 + $0x330] sm:$0x3] %vm3558_vm1, %v3081_v6  ;;  %3952 = vst.msk [vmem:[%s4740_s5 + $0x312] sm:$0x3] %vm3558_vm1, %v3085_v25  ;;  %v2227_v55 = vcombine.high %v2217_v4, %v2217_v4  ;;  %v3245_v18 = vrot.slane %v2217_v4, %v4690_v2  ;;  %v3257_v32 = vrot.slane %v2210_v19, %v4690_v2  ;;  %v4397_v4 = vld [vmem:[%s6424_s2] ss:$0 sm:$0xff] }
 0x1dd   : > { %3955 = vst.msk [vmem:[%s4740_s5 + $0x318] sm:$0x3] %vm3558_vm1, %v3097_v22  ;;  %3968 = vst.msk [vmem:[%s4740_s5 + $0x332] sm:$0x3] %vm3558_vm1, %v3085_v25  ;;  %v1312_v8 = vrot.slane %v1298_v51, %v4684_v62  ;;  %v2228_v11 = vcombine.high %v2224_v27, %v2224_v27  ;;  %v3249_v6 = vrot.slane %v2225_v28, %v4690_v2 }
 0x1de   : > { %3971 = vst.msk [vmem:[%s4740_s5 + $0x338] sm:$0x3] %vm3558_vm1, %v3097_v22  ;;  %3953 = vst.msk [vmem:[%s4740_s5 + $0x314] sm:$0x3] %vm3558_vm1, %v3089_v29  ;;  %v3261_v17 = vrot.slane %v2224_v27, %v4690_v2  ;;  %v3265_v20 = vrot.slane %v2226_v3, %v4690_v2  ;;  %v3253_v21 = vrot.slane %v2227_v55, %v4690_v2 }
 0x1df   : > { %3956 = vst.msk [vmem:[%s4740_s5 + $0x31a] sm:$0x3] %vm3558_vm1, %v3101_v30  ;;  %3969 = vst.msk [vmem:[%s4740_s5 + $0x334] sm:$0x3] %vm3558_vm1, %v3089_v29  ;;  %v1313_v25 = vcombine.high %v1305_v0, %v1305_v0  ;;  %v1314_v22 = vcombine.high %v1312_v8, %v1312_v8  ;;  %v1321_v60 = vrot.slane %v1305_v0, %v4684_v62 }
 0x1e0   : > { %3972 = vst.msk [vmem:[%s4740_s5 + $0x33a] sm:$0x3] %vm3558_vm1, %v3101_v30  ;;  %3954 = vst.msk [vmem:[%s4740_s5 + $0x316] sm:$0x3] %vm3558_vm1, %v3093_v36  ;;  %v3269_v29 = vrot.slane %v2228_v11, %v4690_v2  ;;  %v1328_v30 = vrot.slane %v1312_v8, %v4684_v62  ;;  %v2082_v31 = vcombine.high %v6020_v48, %v6020_v48 }
 0x1e1   : > { %3957 = vst.msk [vmem:[%s4740_s5 + $0x31c] sm:$0x3] %vm3558_vm1, %v3105_v15  ;;  %3970 = vst.msk [vmem:[%s4740_s5 + $0x336] sm:$0x3] %vm3558_vm1, %v3093_v36  ;;  %v2089_v36 = vrot.slane %v6020_v48, %v4684_v62  ;;  %v1342_v14 = vrot.slane %v1314_v22, %v4684_v62  ;;  %v1343_v23 = vcombine.high %v1321_v60, %v1321_v60 }
 0x1e2   : > { %3973 = vst.msk [vmem:[%s4740_s5 + $0x33c] sm:$0x3] %vm3558_vm1, %v3105_v15  ;;  %3958 = vst.msk [vmem:[%s4740_s5 + $0x31e] sm:$0x3] %vm3558_vm1, %v3109_v9  ;;  %v1335_v15 = vrot.slane %v1313_v25, %v4684_v62  ;;  %v1344_v41 = vcombine.high %v1328_v30, %v1328_v30  ;;  %v2681_v42 = vrot.slane %v1328_v30, %v4690_v2 }
 0x1e3   : > { %3974 = vst.msk [vmem:[%s4740_s5 + $0x33e] sm:$0x3] %vm3558_vm1, %v3109_v9  ;;  %3783 = vst.msk [vmem:[%s4740_s5 + $0x1c0] sm:$0x3] %vm3558_vm1, %v2729_v26  ;;  %v2665_v9 = vrot.slane %v1321_v60, %v4690_v2  ;;  %v2096_v5 = vrot.slane %v2082_v31, %v4684_v62  ;;  %v2097_v43 = vcombine.high %v2089_v36, %v2089_v36 }
 0x1e4   : > { %3799 = vst.msk [vmem:[%s4740_s5 + $0x1e0] sm:$0x3] %vm3558_vm1, %v2729_v26  ;;  %3787 = vst.msk [vmem:[%s4740_s5 + $0x1c8] sm:$0x3] %vm3558_vm1, %v2745_v49  ;;  %v1345_v44 = vcombine.high %v1335_v15, %v1335_v15  ;;  %v1346_v16 = vcombine.high %v1342_v14, %v1342_v14  ;;  %v2669_v12 = vrot.slane %v1335_v15, %v4690_v2 }
 0x1e5   : > { %3803 = vst.msk [vmem:[%s4740_s5 + $0x1e8] sm:$0x3] %vm3558_vm1, %v2745_v49  ;;  %3784 = vst.msk [vmem:[%s4740_s5 + $0x1c2] sm:$0x3] %vm3558_vm1, %v2733_v10  ;;  %v2673_v13 = vrot.slane %v1343_v23, %v4690_v2  ;;  %v2685_v33 = vrot.slane %v1342_v14, %v4690_v2  ;;  %v2689_v48 = vrot.slane %v1344_v41, %v4690_v2 }
 0x1e6   : > { %3785 = vst.msk [vmem:[%s4740_s5 + $0x1c4] sm:$0x3] %vm3558_vm1, %v2737_v39  ;;  %3800 = vst.msk [vmem:[%s4740_s5 + $0x1e2] sm:$0x3] %vm3558_vm1, %v2733_v10  ;;  %v2098_v59 = vcombine.high %v2096_v5, %v2096_v5  ;;  %v2105_v53 = vrot.slane %v2089_v36, %v4684_v62  ;;  %v2677_v26 = vrot.slane %v1345_v44, %v4690_v2  ;;  %v4396_v10 = vld [vmem:[%s6425_s3] ss:$0 sm:$0xff] }
 0x1e7   : > { %3801 = vst.msk [vmem:[%s4740_s5 + $0x1e4] sm:$0x3] %vm3558_vm1, %v2737_v39  ;;  %3788 = vst.msk [vmem:[%s4740_s5 + $0x1ca] sm:$0x3] %vm3558_vm1, %v2749_v54  ;;  %v2693_v57 = vrot.slane %v1346_v16, %v4690_v2  ;;  %v2112_v34 = vrot.slane %v2096_v5, %v4684_v62  ;;  %v2119_v52 = vrot.slane %v2097_v43, %v4684_v62 }
 0x1e8   : > { %3789 = vst.msk [vmem:[%s4740_s5 + $0x1cc] sm:$0x3] %vm3558_vm1, %v2753_v58  ;;  %3804 = vst.msk [vmem:[%s4740_s5 + $0x1ea] sm:$0x3] %vm3558_vm1, %v2749_v54  ;;  %v2126_v49 = vrot.slane %v2098_v59, %v4684_v62  ;;  %v2127_v50 = vcombine.high %v2105_v53, %v2105_v53  ;;  %v3177_v63 = vrot.slane %v2105_v53, %v4690_v2 }
 0x1e9   : > { %3805 = vst.msk [vmem:[%s4740_s5 + $0x1ec] sm:$0x3] %vm3558_vm1, %v2753_v58  ;;  %3786 = vst.msk [vmem:[%s4740_s5 + $0x1c6] sm:$0x3] %vm3558_vm1, %v2741_v24  ;;  %v661_v39 = vadd.f32 %v4396_v10, %v6011_v1  ;;  %v2128_v35 = vcombine.high %v2112_v34, %v2112_v34  ;;  %v2129_v40 = vcombine.high %v2119_v52, %v2119_v52 }
 0x1ea   : > { %3802 = vst.msk [vmem:[%s4740_s5 + $0x1e6] sm:$0x3] %vm3558_vm1, %v2741_v24  ;;  %3790 = vst.msk [vmem:[%s4740_s5 + $0x1ce] sm:$0x3] %vm3558_vm1, %v2757_v61  ;;  %v3181_v54 = vrot.slane %v2119_v52, %v4690_v2  ;;  %v3193_v58 = vrot.slane %v2112_v34, %v4690_v2  ;;  %v2130_v38 = vcombine.high %v2126_v49, %v2126_v49 }
 0x1eb   : > { %3806 = vst.msk [vmem:[%s4740_s5 + $0x1ee] sm:$0x3] %vm3558_vm1, %v2757_v61  ;;  %4039 = vst.msk [vmem:[%s4740_s5 + $0x3c0] sm:$0x3] %vm3558_vm1, %v3241_v7  ;;  %v3185_v1 = vrot.slane %v2127_v50, %v4690_v2  ;;  %v3197_v24 = vrot.slane %v2126_v49, %v4690_v2  ;;  %v1445_v46 = vcombine.high %v661_v39, %v661_v39 }
 0x1ec   : > { %4055 = vst.msk [vmem:[%s4740_s5 + $0x3e0] sm:$0x3] %vm3558_vm1, %v3241_v7  ;;  %4040 = vst.msk [vmem:[%s4740_s5 + $0x3c2] sm:$0x3] %vm3558_vm1, %v3245_v18  ;;  %v3189_v45 = vrot.slane %v2129_v40, %v4690_v2  ;;  %v3201_v19 = vrot.slane %v2128_v35, %v4690_v2  ;;  %v1452_v61 = vrot.slane %v661_v39, %v4684_v62 }
 0x1ed   : > { %4043 = vst.msk [vmem:[%s4740_s5 + $0x3c8] sm:$0x3] %vm3558_vm1, %v3257_v32  ;;  %4056 = vst.msk [vmem:[%s4740_s5 + $0x3e2] sm:$0x3] %vm3558_vm1, %v3245_v18  ;;  %v638_v51 = vmul.f32 %v4397_v4, %v4991_v47  ;;  %v3205_v0 = vrot.slane %v2130_v38, %v4690_v2  ;;  %v1459_v27 = vrot.slane %v1445_v46, %v4684_v62 }
 0x1ee   : > { %4059 = vst.msk [vmem:[%s4740_s5 + $0x3e8] sm:$0x3] %vm3558_vm1, %v3257_v32  ;;  %4041 = vst.msk [vmem:[%s4740_s5 + $0x3c4] sm:$0x3] %vm3558_vm1, %v3249_v6  ;;  %v620_v28 = vmul.f32 %v4397_v4, %v5048_v37  ;;  %v636_v3 = vmul.f32 %v4397_v4, %v5091_v56  ;;  %v1460_v47 = vcombine.high %v1452_v61, %v1452_v61 }
 0x1ef   : > { %4044 = vst.msk [vmem:[%s4740_s5 + $0x3ca] sm:$0x3] %vm3558_vm1, %v3261_v17  ;;  %4045 = vst.msk [vmem:[%s4740_s5 + $0x3cc] sm:$0x3] %vm3558_vm1, %v3265_v20  ;;  %v1468_v7 = vrot.slane %v1452_v61, %v4684_v62  ;;  %v677_v55 = vadd.f32 %v4396_v10, %v638_v51  ;;  %v1461_v37 = vcombine.high %v1459_v27, %v1459_v27 }
 0x1f0   : > { %4057 = vst.msk [vmem:[%s4740_s5 + $0x3e4] sm:$0x3] %vm3558_vm1, %v3249_v6  ;;  %4060 = vst.msk [vmem:[%s4740_s5 + $0x3ea] sm:$0x3] %vm3558_vm1, %v3261_v17  ;;  %v1475_v56 = vrot.slane %v1459_v27, %v4684_v62  ;;  %v659_v18 = vadd.f32 %v4396_v10, %v620_v28  ;;  %v6219_v32 = vadd.f32 %v4396_v10, %v636_v3 }
 0x1f1   : > { %4061 = vst.msk [vmem:[%s4740_s5 + $0x3ec] sm:$0x3] %vm3558_vm1, %v3265_v20  ;;  %4042 = vst.msk [vmem:[%s4740_s5 + $0x3c6] sm:$0x3] %vm3558_vm1, %v3253_v21  ;;  %v1482_v8 = vrot.slane %v1460_v47, %v4684_v62  ;;  %v1490_v11 = vcombine.high %v1468_v7, %v1468_v7  ;;  %v2761_v6 = vrot.slane %v1468_v7, %v4690_v2 }
 0x1f2   : > { %4058 = vst.msk [vmem:[%s4740_s5 + $0x3e6] sm:$0x3] %vm3558_vm1, %v3253_v21  ;;  %4046 = vst.msk [vmem:[%s4740_s5 + $0x3ce] sm:$0x3] %vm3558_vm1, %v3269_v29  ;;  %v2229_v17 = vcombine.high %v677_v55, %v677_v55  ;;  %v1489_v20 = vrot.slane %v1461_v37, %v4684_v62  ;;  %v1491_v21 = vcombine.high %v1475_v56, %v1475_v56 }
 0x1f3   : > { %4062 = vst.msk [vmem:[%s4740_s5 + $0x3ee] sm:$0x3] %vm3558_vm1, %v3269_v29  ;;  %3751 = vst.msk [vmem:[%s4740_s5 + $0x180] sm:$0x3] %vm3558_vm1, %v2665_v9  ;;  %v2777_v25 = vrot.slane %v1475_v56, %v4690_v2  ;;  %v2236_v22 = vrot.slane %v677_v55, %v4684_v62  ;;  %v1492_v60 = vcombine.high %v1482_v8, %v1482_v8 }
 0x1f4   : > { %3767 = vst.msk [vmem:[%s4740_s5 + $0x1a0] sm:$0x3] %vm3558_vm1, %v2665_v9  ;;  %3755 = vst.msk [vmem:[%s4740_s5 + $0x188] sm:$0x3] %vm3558_vm1, %v2681_v42  ;;  %v2765_v29 = vrot.slane %v1482_v8, %v4690_v2  ;;  %v2769_v30 = vrot.slane %v1490_v11, %v4690_v2  ;;  %v2243_v31 = vrot.slane %v2229_v17, %v4684_v62 }
 0x1f5   : > { %3771 = vst.msk [vmem:[%s4740_s5 + $0x1a8] sm:$0x3] %vm3558_vm1, %v2681_v42  ;;  %3752 = vst.msk [vmem:[%s4740_s5 + $0x182] sm:$0x3] %vm3558_vm1, %v2669_v12  ;;  %v1493_v36 = vcombine.high %v1489_v20, %v1489_v20  ;;  %v2781_v15 = vrot.slane %v1489_v20, %v4690_v2  ;;  %v2785_v14 = vrot.slane %v1491_v21, %v4690_v2 }
 0x1f6   : > { %3753 = vst.msk [vmem:[%s4740_s5 + $0x184] sm:$0x3] %vm3558_vm1, %v2673_v13  ;;  %3768 = vst.msk [vmem:[%s4740_s5 + $0x1a2] sm:$0x3] %vm3558_vm1, %v2669_v12  ;;  %v2244_v23 = vcombine.high %v2236_v22, %v2236_v22  ;;  %v2773_v9 = vrot.slane %v1492_v60, %v4690_v2  ;;  %v2245_v41 = vcombine.high %v2243_v31, %v2243_v31 }
 0x1f7   : > { %3769 = vst.msk [vmem:[%s4740_s5 + $0x1a4] sm:$0x3] %vm3558_vm1, %v2673_v13  ;;  %3756 = vst.msk [vmem:[%s4740_s5 + $0x18a] sm:$0x3] %vm3558_vm1, %v2685_v33  ;;  %v2252_v42 = vrot.slane %v2236_v22, %v4684_v62  ;;  %v2259_v5 = vrot.slane %v2243_v31, %v4684_v62  ;;  %v2789_v43 = vrot.slane %v1493_v36, %v4690_v2 }
 0x1f8   : > { %3757 = vst.msk [vmem:[%s4740_s5 + $0x18c] sm:$0x3] %vm3558_vm1, %v2689_v48  ;;  %3772 = vst.msk [vmem:[%s4740_s5 + $0x1aa] sm:$0x3] %vm3558_vm1, %v2685_v33  ;;  %v2266_v44 = vrot.slane %v2244_v23, %v4684_v62  ;;  %v1347_v16 = vcombine.high %v659_v18, %v659_v18  ;;  %v1354_v12 = vrot.slane %v659_v18, %v4684_v62 }
 0x1f9   : > { %3773 = vst.msk [vmem:[%s4740_s5 + $0x1ac] sm:$0x3] %vm3558_vm1, %v2689_v48  ;;  %3754 = vst.msk [vmem:[%s4740_s5 + $0x186] sm:$0x3] %vm3558_vm1, %v2677_v26  ;;  %v2273_v13 = vrot.slane %v2245_v41, %v4684_v62  ;;  %v2274_v33 = vcombine.high %v2252_v42, %v2252_v42  ;;  %v2275_v48 = vcombine.high %v2259_v5, %v2259_v5 }
 0x1fa   : > { %3758 = vst.msk [vmem:[%s4740_s5 + $0x18e] sm:$0x3] %vm3558_vm1, %v2693_v57  ;;  %3770 = vst.msk [vmem:[%s4740_s5 + $0x1a6] sm:$0x3] %vm3558_vm1, %v2677_v26  ;;  %v3273_v59 = vrot.slane %v2252_v42, %v4690_v2  ;;  %v2276_v53 = vcombine.high %v2266_v44, %v2266_v44  ;;  %v3277_v26 = vrot.slane %v2266_v44, %v4690_v2 }
 0x1fb   : > { %3774 = vst.msk [vmem:[%s4740_s5 + $0x1ae] sm:$0x3] %vm3558_vm1, %v2693_v57  ;;  %4007 = vst.msk [vmem:[%s4740_s5 + $0x380] sm:$0x3] %vm3558_vm1, %v3177_v63  ;;  %v3289_v57 = vrot.slane %v2259_v5, %v4690_v2  ;;  %v1361_v34 = vrot.slane %v1347_v16, %v4684_v62  ;;  %v2277_v52 = vcombine.high %v2273_v13, %v2273_v13 }
 0x1fc   : > { %4023 = vst.msk [vmem:[%s4740_s5 + $0x3a0] sm:$0x3] %vm3558_vm1, %v3177_v63  ;;  %4008 = vst.msk [vmem:[%s4740_s5 + $0x382] sm:$0x3] %vm3558_vm1, %v3181_v54  ;;  %v3281_v49 = vrot.slane %v2274_v33, %v4690_v2  ;;  %v3293_v50 = vrot.slane %v2273_v13, %v4690_v2  ;;  %v3297_v63 = vrot.slane %v2275_v48, %v4690_v2 }
 0x1fd   : > { %4011 = vst.msk [vmem:[%s4740_s5 + $0x388] sm:$0x3] %vm3558_vm1, %v3193_v58  ;;  %4024 = vst.msk [vmem:[%s4740_s5 + $0x3a2] sm:$0x3] %vm3558_vm1, %v3181_v54  ;;  %v3285_v10 = vrot.slane %v2276_v53, %v4690_v2  ;;  %v1362_v39 = vcombine.high %v1354_v12, %v1354_v12  ;;  %v1363_v35 = vcombine.high %v1361_v34, %v1361_v34 }
 0x1fe   : > { %4027 = vst.msk [vmem:[%s4740_s5 + $0x3a8] sm:$0x3] %vm3558_vm1, %v3193_v58  ;;  %4009 = vst.msk [vmem:[%s4740_s5 + $0x384] sm:$0x3] %vm3558_vm1, %v3185_v1  ;;  %v1370_v40 = vrot.slane %v1354_v12, %v4684_v62  ;;  %v3301_v54 = vrot.slane %v2277_v52, %v4690_v2  ;;  %v1377_v58 = vrot.slane %v1361_v34, %v4684_v62 }
 0x1ff   : > { %4012 = vst.msk [vmem:[%s4740_s5 + $0x38a] sm:$0x3] %vm3558_vm1, %v3197_v24  ;;  %4025 = vst.msk [vmem:[%s4740_s5 + $0x3a4] sm:$0x3] %vm3558_vm1, %v3185_v1  ;;  %v2131_v38 = vcombine.high %v6219_v32, %v6219_v32  ;;  %v2138_v1 = vrot.slane %v6219_v32, %v4684_v62  ;;  %v1391_v46 = vrot.slane %v1363_v35, %v4684_v62 }
 0x200   : > { %4028 = vst.msk [vmem:[%s4740_s5 + $0x3aa] sm:$0x3] %vm3558_vm1, %v3197_v24  ;;  %4010 = vst.msk [vmem:[%s4740_s5 + $0x386] sm:$0x3] %vm3558_vm1, %v3189_v45  ;;  %v1384_v24 = vrot.slane %v1362_v39, %v4684_v62  ;;  %v1393_v61 = vcombine.high %v1377_v58, %v1377_v58  ;;  %v2713_v4 = vrot.slane %v1377_v58, %v4690_v2 }
 0x201   : > { %4013 = vst.msk [vmem:[%s4740_s5 + $0x38c] sm:$0x3] %vm3558_vm1, %v3201_v19  ;;  %4026 = vst.msk [vmem:[%s4740_s5 + $0x3a6] sm:$0x3] %vm3558_vm1, %v3189_v45  ;;  %v1392_v45 = vcombine.high %v1370_v40, %v1370_v40  ;;  %v2145_v51 = vrot.slane %v2131_v38, %v4684_v62  ;;  %v1395_v28 = vcombine.high %v1391_v46, %v1391_v46 }
 0x202   : > { %4029 = vst.msk [vmem:[%s4740_s5 + $0x3ac] sm:$0x3] %vm3558_vm1, %v3201_v19  ;;  %4014 = vst.msk [vmem:[%s4740_s5 + $0x38e] sm:$0x3] %vm3558_vm1, %v3205_v0  ;;  %v2697_v19 = vrot.slane %v1370_v40, %v4690_v2  ;;  %v1394_v27 = vcombine.high %v1384_v24, %v1384_v24  ;;  %v2701_v3 = vrot.slane %v1384_v24, %v4690_v2 }
 0x203   : > { %4030 = vst.msk [vmem:[%s4740_s5 + $0x3ae] sm:$0x3] %vm3558_vm1, %v3205_v0  ;;  %3791 = vst.msk [vmem:[%s4740_s5 + $0x1d0] sm:$0x3] %vm3558_vm1, %v2761_v6  ;;  %v2146_v0 = vcombine.high %v2138_v1, %v2138_v1  ;;  %v2705_v47 = vrot.slane %v1392_v45, %v4690_v2  ;;  %v2717_v7 = vrot.slane %v1391_v46, %v4690_v2 }
 0x204   : > { %3807 = vst.msk [vmem:[%s4740_s5 + $0x1f0] sm:$0x3] %vm3558_vm1, %v2761_v6  ;;  %3795 = vst.msk [vmem:[%s4740_s5 + $0x1d8] sm:$0x3] %vm3558_vm1, %v2777_v25  ;;  %v2721_v55 = vrot.slane %v1393_v61, %v4690_v2  ;;  %v2147_v37 = vcombine.high %v2145_v51, %v2145_v51  ;;  %v2154_v56 = vrot.slane %v2138_v1, %v4684_v62 }
 0x205   : > { %3811 = vst.msk [vmem:[%s4740_s5 + $0x1f8] sm:$0x3] %vm3558_vm1, %v2777_v25  ;;  %3792 = vst.msk [vmem:[%s4740_s5 + $0x1d2] sm:$0x3] %vm3558_vm1, %v2765_v29  ;;  %v2709_v18 = vrot.slane %v1394_v27, %v4690_v2  ;;  %v2725_v32 = vrot.slane %v1395_v28, %v4690_v2  ;;  %v2161_v8 = vrot.slane %v2145_v51, %v4684_v62 }
 0x206   : > { %3793 = vst.msk [vmem:[%s4740_s5 + $0x1d4] sm:$0x3] %vm3558_vm1, %v2769_v30  ;;  %3808 = vst.msk [vmem:[%s4740_s5 + $0x1f2] sm:$0x3] %vm3558_vm1, %v2765_v29  ;;  %v2168_v11 = vrot.slane %v2146_v0, %v4684_v62  ;;  %v2175_v6 = vrot.slane %v2147_v37, %v4684_v62  ;;  %v2176_v17 = vcombine.high %v2154_v56, %v2154_v56 }
 0x207   : > { %3809 = vst.msk [vmem:[%s4740_s5 + $0x1f4] sm:$0x3] %vm3558_vm1, %v2769_v30  ;;  %3796 = vst.msk [vmem:[%s4740_s5 + $0x1da] sm:$0x3] %vm3558_vm1, %v2781_v15  ;;  %v3209_v20 = vrot.slane %v2154_v56, %v4690_v2  ;;  %v2177_v21 = vcombine.high %v2161_v8, %v2161_v8  ;;  %v3225_v22 = vrot.slane %v2161_v8, %v4690_v2 }
 0x208   : > { %3797 = vst.msk [vmem:[%s4740_s5 + $0x1dc] sm:$0x3] %vm3558_vm1, %v2785_v14  ;;  %3812 = vst.msk [vmem:[%s4740_s5 + $0x1fa] sm:$0x3] %vm3558_vm1, %v2781_v15  ;;  %v2178_v25 = vcombine.high %v2168_v11, %v2168_v11  ;;  %v3213_v62 = vrot.slane %v2168_v11, %v4690_v2  ;;  %v2179_v60 = vcombine.high %v2175_v6, %v2175_v6 }
 0x209   : > { %3813 = vst.msk [vmem:[%s4740_s5 + $0x1fc] sm:$0x3] %vm3558_vm1, %v2785_v14  ;;  %3794 = vst.msk [vmem:[%s4740_s5 + $0x1d6] sm:$0x3] %vm3558_vm1, %v2773_v9  ;;  %v3217_v29 = vrot.slane %v2176_v17, %v4690_v2  ;;  %v3229_v30 = vrot.slane %v2175_v6, %v4690_v2  ;;  %v3233_v36 = vrot.slane %v2177_v21, %v4690_v2 }
 0x20a   : > { %3810 = vst.msk [vmem:[%s4740_s5 + $0x1f6] sm:$0x3] %vm3558_vm1, %v2773_v9  ;;  %3798 = vst.msk [vmem:[%s4740_s5 + $0x1de] sm:$0x3] %vm3558_vm1, %v2789_v43  ;;  %v3221_v31 = vrot.slane %v2178_v25, %v4690_v2  ;;  %v3237_v15 = vrot.slane %v2179_v60, %v4690_v2 }
 0x20b   : > { %3814 = vst.msk [vmem:[%s4740_s5 + $0x1fe] sm:$0x3] %vm3558_vm1, %v2789_v43  ;;  %4047 = vst.msk [vmem:[%s4740_s5 + $0x3d0] sm:$0x3] %vm3558_vm1, %v3273_v59 }
 0x20c   : > { %4063 = vst.msk [vmem:[%s4740_s5 + $0x3f0] sm:$0x3] %vm3558_vm1, %v3273_v59  ;;  %4048 = vst.msk [vmem:[%s4740_s5 + $0x3d2] sm:$0x3] %vm3558_vm1, %v3277_v26 }
 0x20d   : > { %4051 = vst.msk [vmem:[%s4740_s5 + $0x3d8] sm:$0x3] %vm3558_vm1, %v3289_v57  ;;  %4064 = vst.msk [vmem:[%s4740_s5 + $0x3f2] sm:$0x3] %vm3558_vm1, %v3277_v26 }
 0x20e   : > { %4067 = vst.msk [vmem:[%s4740_s5 + $0x3f8] sm:$0x3] %vm3558_vm1, %v3289_v57  ;;  %4049 = vst.msk [vmem:[%s4740_s5 + $0x3d4] sm:$0x3] %vm3558_vm1, %v3281_v49 }
 0x20f   : > { %4052 = vst.msk [vmem:[%s4740_s5 + $0x3da] sm:$0x3] %vm3558_vm1, %v3293_v50  ;;  %4053 = vst.msk [vmem:[%s4740_s5 + $0x3dc] sm:$0x3] %vm3558_vm1, %v3297_v63 }
 0x210   : > { %4065 = vst.msk [vmem:[%s4740_s5 + $0x3f4] sm:$0x3] %vm3558_vm1, %v3281_v49  ;;  %4068 = vst.msk [vmem:[%s4740_s5 + $0x3fa] sm:$0x3] %vm3558_vm1, %v3293_v50 }
 0x211   : > { %4069 = vst.msk [vmem:[%s4740_s5 + $0x3fc] sm:$0x3] %vm3558_vm1, %v3297_v63  ;;  %4050 = vst.msk [vmem:[%s4740_s5 + $0x3d6] sm:$0x3] %vm3558_vm1, %v3285_v10 }
 0x212   : > { %4066 = vst.msk [vmem:[%s4740_s5 + $0x3f6] sm:$0x3] %vm3558_vm1, %v3285_v10  ;;  %4054 = vst.msk [vmem:[%s4740_s5 + $0x3de] sm:$0x3] %vm3558_vm1, %v3301_v54 }
 0x213   : > { %4070 = vst.msk [vmem:[%s4740_s5 + $0x3fe] sm:$0x3] %vm3558_vm1, %v3301_v54  ;;  %3759 = vst.msk [vmem:[%s4740_s5 + $0x190] sm:$0x3] %vm3558_vm1, %v2697_v19 }
 0x214   : > { %3775 = vst.msk [vmem:[%s4740_s5 + $0x1b0] sm:$0x3] %vm3558_vm1, %v2697_v19  ;;  %3763 = vst.msk [vmem:[%s4740_s5 + $0x198] sm:$0x3] %vm3558_vm1, %v2713_v4 }
 0x215   : > { %3779 = vst.msk [vmem:[%s4740_s5 + $0x1b8] sm:$0x3] %vm3558_vm1, %v2713_v4  ;;  %3760 = vst.msk [vmem:[%s4740_s5 + $0x192] sm:$0x3] %vm3558_vm1, %v2701_v3 }
 0x216   : > { %3761 = vst.msk [vmem:[%s4740_s5 + $0x194] sm:$0x3] %vm3558_vm1, %v2705_v47  ;;  %3776 = vst.msk [vmem:[%s4740_s5 + $0x1b2] sm:$0x3] %vm3558_vm1, %v2701_v3 }
 0x217   : > { %3777 = vst.msk [vmem:[%s4740_s5 + $0x1b4] sm:$0x3] %vm3558_vm1, %v2705_v47  ;;  %3764 = vst.msk [vmem:[%s4740_s5 + $0x19a] sm:$0x3] %vm3558_vm1, %v2717_v7 }
 0x218   : > { %3765 = vst.msk [vmem:[%s4740_s5 + $0x19c] sm:$0x3] %vm3558_vm1, %v2721_v55  ;;  %3780 = vst.msk [vmem:[%s4740_s5 + $0x1ba] sm:$0x3] %vm3558_vm1, %v2717_v7 }
 0x219   : > { %3781 = vst.msk [vmem:[%s4740_s5 + $0x1bc] sm:$0x3] %vm3558_vm1, %v2721_v55  ;;  %3762 = vst.msk [vmem:[%s4740_s5 + $0x196] sm:$0x3] %vm3558_vm1, %v2709_v18 }
 0x21a   : > { %3766 = vst.msk [vmem:[%s4740_s5 + $0x19e] sm:$0x3] %vm3558_vm1, %v2725_v32  ;;  %3778 = vst.msk [vmem:[%s4740_s5 + $0x1b6] sm:$0x3] %vm3558_vm1, %v2709_v18 }
 0x21b   : > { %3782 = vst.msk [vmem:[%s4740_s5 + $0x1be] sm:$0x3] %vm3558_vm1, %v2725_v32  ;;  %4015 = vst.msk [vmem:[%s4740_s5 + $0x390] sm:$0x3] %vm3558_vm1, %v3209_v20 }
 0x21c   : > { %4031 = vst.msk [vmem:[%s4740_s5 + $0x3b0] sm:$0x3] %vm3558_vm1, %v3209_v20  ;;  %4016 = vst.msk [vmem:[%s4740_s5 + $0x392] sm:$0x3] %vm3558_vm1, %v3213_v62 }
 0x21d   : > { %4019 = vst.msk [vmem:[%s4740_s5 + $0x398] sm:$0x3] %vm3558_vm1, %v3225_v22  ;;  %4032 = vst.msk [vmem:[%s4740_s5 + $0x3b2] sm:$0x3] %vm3558_vm1, %v3213_v62 }
 0x21e   : > { %4035 = vst.msk [vmem:[%s4740_s5 + $0x3b8] sm:$0x3] %vm3558_vm1, %v3225_v22  ;;  %4017 = vst.msk [vmem:[%s4740_s5 + $0x394] sm:$0x3] %vm3558_vm1, %v3217_v29 }
 0x21f   : > { %4020 = vst.msk [vmem:[%s4740_s5 + $0x39a] sm:$0x3] %vm3558_vm1, %v3229_v30  ;;  %4033 = vst.msk [vmem:[%s4740_s5 + $0x3b4] sm:$0x3] %vm3558_vm1, %v3217_v29 }
 0x220   : > { %4036 = vst.msk [vmem:[%s4740_s5 + $0x3ba] sm:$0x3] %vm3558_vm1, %v3229_v30  ;;  %4018 = vst.msk [vmem:[%s4740_s5 + $0x396] sm:$0x3] %vm3558_vm1, %v3221_v31 }
 0x221   : > { %4021 = vst.msk [vmem:[%s4740_s5 + $0x39c] sm:$0x3] %vm3558_vm1, %v3233_v36  ;;  %4034 = vst.msk [vmem:[%s4740_s5 + $0x3b6] sm:$0x3] %vm3558_vm1, %v3221_v31 }
 0x222   : > { %4037 = vst.msk [vmem:[%s4740_s5 + $0x3bc] sm:$0x3] %vm3558_vm1, %v3233_v36  ;;  %4022 = vst.msk [vmem:[%s4740_s5 + $0x39e] sm:$0x3] %vm3558_vm1, %v3237_v15 }
 0x223   : > { %4038 = vst.msk [vmem:[%s4740_s5 + $0x3be] sm:$0x3] %vm3558_vm1, %v3237_v15 }
 0x224 PF: > { %s17_s20 = sadd.s32 1, %s4478_s20   ;;  %s6430_s15 = smov %s4462_s16 }
 0x225   : > { %p14_p9 = scmp.ge.s32.totalorder %s17_s20, 4   ;;  %s6431_s16 = smov %s4466_s17 }
 0x226   : > { %s6432_s17 = smov %s4558_s27  ;;  %s6433_s18 = smov %s4474_s19 }
 0x227   : > { %s6434_s19 = smov %s6436_s22  ;;  %16 = sbr.rel (!%p14_p9) target bundleno = 4 (0x4), region = 85 }
 0x22e   :  { %4109 = vsyncpa [#allocation3], 1 }
 0x22f   :  { %4111 = vsyncpa [#allocation3 + $0x1], 1 }

</bundles_post_ra>
